<compile_context>
chip_gen: v7x
topology: tpu7x:2x2x1
jax: 0.10.0
libtpu: 0.0.40
codegen_flags: <defaults>
</compile_context>

<pallas_src>
import jax
import jax.numpy as jnp
from jax.experimental import pallas as pl
from jax.experimental.pallas import tpu as pltpu


# ---------------------------------------------------------------------------
# Kernel
# ---------------------------------------------------------------------------
def graphprop_kernel(nf_bf_ref, from_col_ref, to_col_ref, to_row_ref,
                     wm1_ref, bm1_ref, wm2_ref, bm2_ref,
                     wn1_ref, bn1_ref, wn2_ref, bn2_ref,
                     out_ref, agg_ref):
    e = pl.program_id(0)
    num_e = pl.num_programs(0)

    @pl.when(e == 0)
    def _init():
        agg_ref[...] = jnp.zeros_like(agg_ref)

    nf_bf = nf_bf_ref[...]                       # (N, Dp) bf16
    from_idx = from_col_ref[...]                 # (TE, 1) i32
    to_idx_c = to_col_ref[...]                   # (TE, 1) i32
    to_idx_r = to_row_ref[...]                   # (1, TE) i32
    TE = from_idx.shape[0]
    N = nf_bf.shape[0]

    # One-hot selection matrices in bf16 (0/1 exact). Padded edges carry the
    # out-of-range index N -> all-zero rows/columns -> they gather zeros and
    # scatter nothing (pure compare, never an OOB memory access).
    col = jax.lax.broadcasted_iota(jnp.int32, (TE, N), 1)
    from_oh = (col == from_idx).astype(jnp.bfloat16)         # (TE, N)
    to_oh = (col == to_idx_c).astype(jnp.bfloat16)           # (TE, N)
    # Transposed scatter one-hot built directly (no XLU transpose).
    row = jax.lax.broadcasted_iota(jnp.int32, (N, TE), 0)
    scat_oh = (row == to_idx_r).astype(jnp.bfloat16)         # (N, TE)

    # Gather endpoint features on the MXU (bf16 x bf16, f32 accumulation).
    # One-hot selection of bf16 values -> casting the result back to bf16 is
    # exact (no extra rounding vs. a direct gather of nf_bf).
    from_feat = jnp.dot(from_oh, nf_bf,
                        preferred_element_type=jnp.float32).astype(jnp.bfloat16)
    to_feat = jnp.dot(to_oh, nf_bf,
                      preferred_element_type=jnp.float32).astype(jnp.bfloat16)

    # Message MLP. First layer fused to a single K = 2*Dp matmul: the concat
    # of two lane-aligned 128-wide bf16 slabs is cheap vreg copies (no XLU).
    x = jnp.concatenate([from_feat, to_feat], axis=-1)        # (TE, 2*Dp) bf16
    h = jnp.dot(x, wm1_ref[...], preferred_element_type=jnp.float32) + bm1_ref[...]
    h = jnp.maximum(h, 0.0)                                   # f32
    msg = (jnp.dot(h.astype(jnp.bfloat16), wm2_ref[...],
                   preferred_element_type=jnp.float32) + bm2_ref[...])
    msg = jnp.maximum(msg, 0.0)                               # (TE, Mp) f32

    # unsorted_segment_sum: transposed one-hot @ messages, f32 accumulation
    # in the persistent VMEM scratch.
    agg_ref[...] += jnp.dot(scat_oh, msg.astype(jnp.bfloat16),
                            preferred_element_type=jnp.float32)   # (N, Mp)

    @pl.when(e == num_e - 1)
    def _finalize():
        # Node-update MLP on [agg | nf], first layer fused to K = Mp + Dp.
        u = jnp.concatenate([agg_ref[...].astype(jnp.bfloat16), nf_bf], axis=-1)
        h2 = (jnp.dot(u, wn1_ref[...], preferred_element_type=jnp.float32)
              + bn1_ref[...])
        h2 = jnp.maximum(h2, 0.0)
        mlp_out = (jnp.dot(h2.astype(jnp.bfloat16), wn2_ref[...],
                           preferred_element_type=jnp.float32) + bn2_ref[...])
        out_ref[...] = jnp.maximum(mlp_out, 0.0)              # (N, Dp) f32
        # Residual add with the un-rounded f32 node features is done in the
        # wrapper (keeps module-exact residual and halves node-feature DMA).


# ---------------------------------------------------------------------------
# Wrapper
# ---------------------------------------------------------------------------
def _round_up(x, m):
    return ((x + m - 1) // m) * m


def _pad2(x, rows, cols):
    r, c = x.shape
    return jnp.pad(x.astype(jnp.float32), ((0, rows - r), (0, cols - c)))


def _default_vmem_limit():
    # ~75% of physical VMEM: ~96 MiB on v5e/v6e (128 MiB), ~48 MiB on v7x
    # (64 MiB), leaving headroom for compiler-internal scratch.
    try:
        cap = pltpu.get_tpu_info().vmem_capacity_bytes
    except Exception:
        cap = 64 * 1024 * 1024
    return int(cap) * 3 // 4


def graph_prop(node_features, from_idx, to_idx, params, *, edge_tile=256,
               lane=128, vmem_limit_bytes=None, validate_indices=True):
    """One GraphProp propagation step (residual update, embedding prop_type).

    edge_tile: 256 fills the 256-deep MXU on v6e/v7x; use 128 on v5e.
    """
    N, D = node_features.shape
    E = from_idx.shape[0]
    (wm1, bm1, wm2, bm2, wn1, bn1, wn2, bn2) = params
    H1 = wm1.shape[1]          # message hidden
    M = wm2.shape[1]           # message output dim
    G1 = wn1.shape[1]          # node-update hidden
    assert wm1.shape[0] == 2 * D
    assert wn1.shape[0] == M + D and wn2.shape[1] == D

    if validate_indices:
        # The padded-edge trick uses index == N as the "dead edge" marker.
        assert int(jnp.max(from_idx)) < N and int(jnp.max(to_idx)) < N
        assert int(jnp.min(from_idx)) >= 0 and int(jnp.min(to_idx)) >= 0

    if vmem_limit_bytes is None:
        vmem_limit_bytes = _default_vmem_limit()

    # Lane-dense padding of feature / hidden dims (exactly math-preserving:
    # padded units see zero weights + zero bias -> relu(0) = 0).
    Dp, Mp = _round_up(D, lane), _round_up(M, lane)
    H1p, G1p = _round_up(H1, lane), _round_up(G1, lane)
    TE = edge_tile
    Ep = _round_up(max(E, TE), TE)

    nf_f32 = node_features.astype(jnp.float32)
    nf_bf = jnp.pad(nf_f32, ((0, 0), (0, Dp - D))).astype(jnp.bfloat16)

    # K-fused, bf16 weights (biases stay f32 for the f32 epilogues).
    wm1_full = jnp.concatenate(
        [_pad2(wm1[:D], Dp, H1p), _pad2(wm1[D:], Dp, H1p)], axis=0
    ).astype(jnp.bfloat16)                                    # (2*Dp, H1p)
    bm1p = _pad2(bm1, 1, H1p)
    wm2p = _pad2(wm2, H1p, Mp).astype(jnp.bfloat16)
    bm2p = _pad2(bm2, 1, Mp)
    wn1_full = jnp.concatenate(
        [_pad2(wn1[:M], Mp, G1p), _pad2(wn1[M:], Dp, G1p)], axis=0
    ).astype(jnp.bfloat16)                                    # (Mp+Dp, G1p)
    bn1p = _pad2(bn1, 1, G1p)
    wn2p = _pad2(wn2, G1p, Dp).astype(jnp.bfloat16)
    bn2p = _pad2(bn2, 1, Dp)

    # Pad edge list to a multiple of TE with out-of-range index N (harmless).
    pad_e = Ep - E
    f_idx = jnp.pad(from_idx.astype(jnp.int32), (0, pad_e), constant_values=N)
    t_idx = jnp.pad(to_idx.astype(jnp.int32), (0, pad_e), constant_values=N)
    f_col = f_idx.reshape(Ep, 1)
    t_col = t_idx.reshape(Ep, 1)
    t_row = t_idx.reshape(1, Ep)

    grid = (Ep // TE,)

    def build_and_run(single_buffer):
        def const_spec(shape):
            imap = lambda e, _n=len(shape): (0,) * _n
            if single_buffer:
                # Constant-index blocks never change across the edge grid:
                # single-buffer them to halve their VMEM footprint.
                return pl.BlockSpec(shape, imap, pipeline_mode=pl.Buffered(1))
            return pl.BlockSpec(shape, imap)

        edge_col_spec = pl.BlockSpec((TE, 1), lambda e: (e, 0))
        edge_row_spec = pl.BlockSpec((1, TE), lambda e: (0, e))

        in_specs = [
            const_spec((N, Dp)),                  # node features, bf16 (single copy)
            edge_col_spec,                        # from_idx  (column layout)
            edge_col_spec,                        # to_idx    (column layout)
            edge_row_spec,                        # to_idx    (lane-dense row layout)
            const_spec((2 * Dp, H1p)), const_spec((1, H1p)),   # message L1 (fused K) + bias
            const_spec((H1p, Mp)), const_spec((1, Mp)),        # message L2 + bias
            const_spec((Mp + Dp, G1p)), const_spec((1, G1p)),  # node L1 (fused K) + bias
            const_spec((G1p, Dp)), const_spec((1, Dp)),        # node L2 + bias
        ]
        if single_buffer:
            out_spec = pl.BlockSpec((N, Dp), lambda e: (0, 0),
                                    pipeline_mode=pl.Buffered(1))
        else:
            out_spec = pl.BlockSpec((N, Dp), lambda e: (0, 0))

        call = pl.pallas_call(
            graphprop_kernel,
            out_shape=jax.ShapeDtypeStruct((N, Dp), jnp.float32),
            grid_spec=pltpu.PrefetchScalarGridSpec(
                num_scalar_prefetch=0,
                grid=grid,
                in_specs=in_specs,
                out_specs=out_spec,
                scratch_shapes=[pltpu.VMEM((N, Mp), jnp.float32)],  # agg accumulator
            ),
            compiler_params=pltpu.CompilerParams(
                dimension_semantics=("arbitrary",),   # edge axis accumulates
                vmem_limit_bytes=vmem_limit_bytes,
            ),
        )
        return call(nf_bf, f_col, t_col, t_row,
                    wm1_full, bm1p, wm2p, bm2p, wn1_full, bn1p, wn2p, bn2p)

    try:
        mlp_out = build_and_run(True)
    except Exception:
        # pipeline_mode / pl.Buffered not available in this jax version:
        # fall back to default double-buffering (identical math).
        mlp_out = build_and_run(False)

    # Residual add with the original f32 node features (module-exact).
    return nf_f32 + mlp_out[:, :D]


# ---------------------------------------------------------------------------
# Params + references
# ---------------------------------------------------------------------------
def init_params(key, node_feature_dim, node_hidden_sizes, message_hidden_sizes):
    """Deterministic Linear-layer params (uniform, ~PyTorch default scale)."""
    def linear(key, fan_in, fan_out):
        k1, k2 = jax.random.split(key)
        bound = 1.0 / jnp.sqrt(fan_in)
        w = jax.random.uniform(k1, (fan_in, fan_out), jnp.float32, -bound, bound)
        b = jax.random.uniform(k2, (1, fan_out), jnp.float32, -bound, bound)
        return w, b

    D = node_feature_dim
    msg_in = 2 * D                                   # no edge features
    node_sizes = list(node_hidden_sizes) + [D]       # module appends node_feature_dim
    node_in = 2 * D                                  # prop_type == "embedding"

    ks = jax.random.split(key, 4)
    wm1, bm1 = linear(ks[0], msg_in, message_hidden_sizes[0])
    wm2, bm2 = linear(ks[1], message_hidden_sizes[0], message_hidden_sizes[1])
    wn1, bn1 = linear(ks[2], node_in, node_sizes[0])
    wn2, bn2 = linear(ks[3], node_sizes[0], node_sizes[1])
    return (wm1, bm1, wm2, bm2, wn1, bn1, wn2, bn2)


def graph_prop_reference(node_features, from_idx, to_idx, params):
    """Pure-f32 reference (exact module semantics)."""
    (wm1, bm1, wm2, bm2, wn1, bn1, wn2, bn2) = params
    from_feat = node_features[from_idx]
    to_feat = node_features[to_idx]
    x = jnp.concatenate([from_feat, to_feat], axis=-1)
    h = jax.nn.relu(x @ wm1 + bm1)
    msg = jax.nn.relu(h @ wm2 + bm2)
    agg = jax.ops.segment_sum(msg, to_idx, num_segments=node_features.shape[0])
    u = jnp.concatenate([agg, node_features], axis=-1)
    h2 = jax.nn.relu(u @ wn1 + bn1)
    mlp_out = jax.nn.relu(h2 @ wn2 + bn2)
    return node_features + mlp_out


def graph_prop_reference_matched(node_features, from_idx, to_idx, params):
    """Reference with the kernel's bf16 quantization points (tight check)."""
    (wm1, bm1, wm2, bm2, wn1, bn1, wn2, bn2) = params
    D = node_features.shape[1]
    M = wm2.shape[1]
    bf = lambda x: x.astype(jnp.bfloat16).astype(jnp.float32)
    nf_b = bf(node_features)
    from_feat = nf_b[from_idx]
    to_feat = nf_b[to_idx]
    h = jax.nn.relu(from_feat @ bf(wm1[:D]) + to_feat @ bf(wm1[D:]) + bm1)
    msg = jax.nn.relu(bf(h) @ bf(wm2) + bm2)
    agg = jax.ops.segment_sum(bf(msg), to_idx, num_segments=node_features.shape[0])
    h2 = jax.nn.relu(bf(agg) @ bf(wn1[:M]) + nf_b @ bf(wn1[M:]) + bn1)
    mlp_out = jax.nn.relu(bf(h2) @ bf(wn2) + bn2)
    return node_features + mlp_out


# ---------------------------------------------------------------------------
# Demo
# ---------------------------------------------------------------------------
if __name__ == "__main__":
    # Small, module-consistent shapes:
    #   D = 32, N = 64 nodes, E = 600 directed edges (not a tile multiple ->
    #   exercises edge padding and a 3-step edge grid with TE=256),
    #   message_hidden_sizes = [64, 32], node_hidden_sizes = [64]
    #   (module appends D -> [64, 32]).
    N, D, E = 64, 32, 600
    node_hidden_sizes = [64]
    message_hidden_sizes = [64, 32]

    key = jax.random.PRNGKey(0)
    k_nf, k_from, k_to, k_par = jax.random.split(key, 4)
    node_features = jax.random.normal(k_nf, (N, D), jnp.float32)
    from_idx = jax.random.randint(k_from, (E,), 0, N, jnp.int32)
    to_idx = jax.random.randint(k_to, (E,), 0, N, jnp.int32)
    params = init_params(k_par, D, node_hidden_sizes, message_hidden_sizes)

    out = graph_prop(node_features, from_idx, to_idx, params, edge_tile=256)
    out = jax.block_until_ready(out)
    assert out.shape == (N, D)

    with jax.default_matmul_precision("highest"):
        ref_matched = graph_prop_reference_matched(node_features, from_idx, to_idx, params)
        ref_f32 = graph_prop_reference(node_features, from_idx, to_idx, params)

    # Tight check against the quantization-matched reference (what the kernel
    # computes), loose check against the pure-f32 module semantics (bf16
    # rounding of node features / weights / messages only).
    assert jnp.allclose(out, ref_matched, atol=1e-3, rtol=1e-3), \
        float(jnp.max(jnp.abs(out - ref_matched)))
    assert jnp.allclose(out, ref_f32, atol=1e-1, rtol=1e-1), \
        float(jnp.max(jnp.abs(out - ref_f32)))

    print("KERNEL_OK")
</pallas_src>

<mosaic_0001>
module attributes {stable_mosaic.version = 11 : i64} {
  func.func @graphprop_kernel(%arg0: i32, %arg1: memref<64x128xbf16, #tpu.memory_space<vmem>>, %arg2: memref<256x1xi32, #tpu.memory_space<vmem>>, %arg3: memref<256x1xi32, #tpu.memory_space<vmem>>, %arg4: memref<1x256xi32, #tpu.memory_space<vmem>>, %arg5: memref<256x128xbf16, #tpu.memory_space<vmem>>, %arg6: memref<1x128xf32, #tpu.memory_space<vmem>>, %arg7: memref<128x128xbf16, #tpu.memory_space<vmem>>, %arg8: memref<1x128xf32, #tpu.memory_space<vmem>>, %arg9: memref<256x128xbf16, #tpu.memory_space<vmem>>, %arg10: memref<1x128xf32, #tpu.memory_space<vmem>>, %arg11: memref<128x128xbf16, #tpu.memory_space<vmem>>, %arg12: memref<1x128xf32, #tpu.memory_space<vmem>>, %arg13: memref<64x128xf32, #tpu.memory_space<vmem>>, %arg14: memref<64x128xf32, #tpu.memory_space<vmem>>) attributes {dimension_semantics = [#tpu.dimension_semantics<arbitrary>], iteration_bounds = array<i64: 3>, scalar_prefetch = 0 : i64, scratch_operands = 1 : i64, tpu.core_type = #tpu.core_type<tc>, window_params = [{pipeline_mode = #tpu.pipeline_mode<synchronous>, transform_indices = @transform_0, window_bounds = array<i64: 64, 128>}, {transform_indices = @transform_1, window_bounds = array<i64: 256, 1>}, {transform_indices = @transform_2, window_bounds = array<i64: 256, 1>}, {transform_indices = @transform_3, window_bounds = array<i64: 1, 256>}, {pipeline_mode = #tpu.pipeline_mode<synchronous>, transform_indices = @transform_4, window_bounds = array<i64: 256, 128>}, {pipeline_mode = #tpu.pipeline_mode<synchronous>, transform_indices = @transform_5, window_bounds = array<i64: 1, 128>}, {pipeline_mode = #tpu.pipeline_mode<synchronous>, transform_indices = @transform_6, window_bounds = array<i64: 128, 128>}, {pipeline_mode = #tpu.pipeline_mode<synchronous>, transform_indices = @transform_7, window_bounds = array<i64: 1, 128>}, {pipeline_mode = #tpu.pipeline_mode<synchronous>, transform_indices = @transform_8, window_bounds = array<i64: 256, 128>}, {pipeline_mode = #tpu.pipeline_mode<synchronous>, transform_indices = @transform_9, window_bounds = array<i64: 1, 128>}, {pipeline_mode = #tpu.pipeline_mode<synchronous>, transform_indices = @transform_10, window_bounds = array<i64: 128, 128>}, {pipeline_mode = #tpu.pipeline_mode<synchronous>, transform_indices = @transform_11, window_bounds = array<i64: 1, 128>}, {pipeline_mode = #tpu.pipeline_mode<synchronous>, transform_indices = @transform_12, window_bounds = array<i64: 64, 128>}]} {
    %c0_i32 = arith.constant 0 : i32
    %0 = arith.cmpi eq, %arg0, %c0_i32 : i32
    %1 = arith.extui %0 : i1 to i32
    %c0_i32_0 = arith.constant 0 : i32
    %2 = arith.cmpi ne, %1, %c0_i32_0 : i32
    scf.if %2 {
      %cst_27 = arith.constant 0.000000e+00 : f32
      %52 = vector.broadcast %cst_27 : f32 to vector<64x128xf32>
      %c0_28 = arith.constant 0 : index
      %c0_29 = arith.constant 0 : index
      %53 = vector.load %arg14[%c0_28, %c0_29] : memref<64x128xf32, #tpu.memory_space<vmem>>, vector<64x128xf32>
      tpu.vector_store %arg14[%c0_28, %c0_29], %52 {strides = array<i32>} : memref<64x128xf32, #tpu.memory_space<vmem>>, vector<64x128xf32>,
    } else {
    }
    %c0 = arith.constant 0 : index
    %c0_1 = arith.constant 0 : index
    %3 = vector.load %arg1[%c0, %c0_1] : memref<64x128xbf16, #tpu.memory_space<vmem>>, vector<64x128xbf16>
    %c0_2 = arith.constant 0 : index
    %c0_3 = arith.constant 0 : index
    %4 = vector.load %arg2[%c0_2, %c0_3] : memref<256x1xi32, #tpu.memory_space<vmem>>, vector<256x1xi32>
    %c0_4 = arith.constant 0 : index
    %c0_5 = arith.constant 0 : index
    %5 = vector.load %arg3[%c0_4, %c0_5] : memref<256x1xi32, #tpu.memory_space<vmem>>, vector<256x1xi32>
    %c0_6 = arith.constant 0 : index
    %c0_7 = arith.constant 0 : index
    %6 = vector.load %arg4[%c0_6, %c0_7] : memref<1x256xi32, #tpu.memory_space<vmem>>, vector<1x256xi32>
    %7 = tpu.iota {dimensions = array<i32: 1>} : vector<256x64xi32>
    %8 = vector.broadcast %4 : vector<256x1xi32> to vector<256x64xi32>
    %9 = arith.cmpi eq, %7, %8 : vector<256x64xi32>
    %10 = arith.extui %9 : vector<256x64xi1> to vector<256x64xi32>
    %11 = arith.sitofp %10 : vector<256x64xi32> to vector<256x64xf32>
    %12 = arith.truncf %11 : vector<256x64xf32> to vector<256x64xbf16>
    %13 = vector.broadcast %5 : vector<256x1xi32> to vector<256x64xi32>
    %14 = arith.cmpi eq, %7, %13 : vector<256x64xi32>
    %15 = arith.extui %14 : vector<256x64xi1> to vector<256x64xi32>
    %16 = arith.sitofp %15 : vector<256x64xi32> to vector<256x64xf32>
    %17 = arith.truncf %16 : vector<256x64xf32> to vector<256x64xbf16>
    %18 = tpu.iota {dimensions = array<i32: 0>} : vector<64x256xi32>
    %19 = vector.broadcast %6 : vector<1x256xi32> to vector<64x256xi32>
    %20 = arith.cmpi eq, %18, %19 : vector<64x256xi32>
    %21 = arith.extui %20 : vector<64x256xi1> to vector<64x256xi32>
    %22 = arith.sitofp %21 : vector<64x256xi32> to vector<64x256xf32>
    %23 = arith.truncf %22 : vector<64x256xf32> to vector<64x256xbf16>
    %cst = arith.constant dense<0.000000e+00> : vector<256x128xf32>
    %24 = tpu.matmul %12, %3, %cst {dimension_numbers = #tpu.dot_dimension_numbers<[1], [0], [0], [1], [0, 0, 1, 1], [], []>} : vector<256x64xbf16>, vector<64x128xbf16>, vector<256x128xf32> -> vector<256x128xf32>
    %25 = arith.truncf %24 : vector<256x128xf32> to vector<256x128xbf16>
    %cst_8 = arith.constant dense<0.000000e+00> : vector<256x128xf32>
    %26 = tpu.matmul %17, %3, %cst_8 {dimension_numbers = #tpu.dot_dimension_numbers<[1], [0], [0], [1], [0, 0, 1, 1], [], []>} : vector<256x64xbf16>, vector<64x128xbf16>, vector<256x128xf32> -> vector<256x128xf32>
    %27 = arith.truncf %26 : vector<256x128xf32> to vector<256x128xbf16>
    %28 = tpu.concatenate %25, %27 in 1 : vector<256x128xbf16>, vector<256x128xbf16> -> vector<256x256xbf16>
    %c0_9 = arith.constant 0 : index
    %c0_10 = arith.constant 0 : index
    %29 = vector.load %arg5[%c0_9, %c0_10] : memref<256x128xbf16, #tpu.memory_space<vmem>>, vector<256x128xbf16>
    %cst_11 = arith.constant dense<0.000000e+00> : vector<256x128xf32>
    %30 = tpu.matmul %28, %29, %cst_11 {dimension_numbers = #tpu.dot_dimension_numbers<[1], [0], [0], [1], [0, 0, 1, 1], [], []>} : vector<256x256xbf16>, vector<256x128xbf16>, vector<256x128xf32> -> vector<256x128xf32>
    %c0_12 = arith.constant 0 : index
    %c0_13 = arith.constant 0 : index
    %31 = vector.load %arg6[%c0_12, %c0_13] : memref<1x128xf32, #tpu.memory_space<vmem>>, vector<1x128xf32>
    %32 = vector.broadcast %31 : vector<1x128xf32> to vector<256x128xf32>
    %33 = arith.addf %30, %32 : vector<256x128xf32>
    %cst_14 = arith.constant 0.000000e+00 : f32
    %34 = vector.broadcast %cst_14 : f32 to vector<256x128xf32>
    %35 = arith.maximumf %33, %34 : vector<256x128xf32>
    %36 = arith.truncf %35 : vector<256x128xf32> to vector<256x128xbf16>
    %c0_15 = arith.constant 0 : index
    %c0_16 = arith.constant 0 : index
    %37 = vector.load %arg7[%c0_15, %c0_16] : memref<128x128xbf16, #tpu.memory_space<vmem>>, vector<128x128xbf16>
    %cst_17 = arith.constant dense<0.000000e+00> : vector<256x128xf32>
    %38 = tpu.matmul %36, %37, %cst_17 {dimension_numbers = #tpu.dot_dimension_numbers<[1], [0], [0], [1], [0, 0, 1, 1], [], []>} : vector<256x128xbf16>, vector<128x128xbf16>, vector<256x128xf32> -> vector<256x128xf32>
    %c0_18 = arith.constant 0 : index
    %c0_19 = arith.constant 0 : index
    %39 = vector.load %arg8[%c0_18, %c0_19] : memref<1x128xf32, #tpu.memory_space<vmem>>, vector<1x128xf32>
    %40 = vector.broadcast %39 : vector<1x128xf32> to vector<256x128xf32>
    %41 = arith.addf %38, %40 : vector<256x128xf32>
    %cst_20 = arith.constant 0.000000e+00 : f32
    %42 = vector.broadcast %cst_20 : f32 to vector<256x128xf32>
    %43 = arith.maximumf %41, %42 : vector<256x128xf32>
    %c0_21 = arith.constant 0 : index
    %c0_22 = arith.constant 0 : index
    %44 = vector.load %arg14[%c0_21, %c0_22] : memref<64x128xf32, #tpu.memory_space<vmem>>, vector<64x128xf32>
    %45 = arith.truncf %43 : vector<256x128xf32> to vector<256x128xbf16>
    %cst_23 = arith.constant dense<0.000000e+00> : vector<64x128xf32>
    %46 = tpu.matmul %23, %45, %cst_23 {dimension_numbers = #tpu.dot_dimension_numbers<[1], [0], [0], [1], [0, 0, 1, 1], [], []>} : vector<64x256xbf16>, vector<256x128xbf16>, vector<64x128xf32> -> vector<64x128xf32>
    %47 = arith.addf %44, %46 : vector<64x128xf32>
    %c0_24 = arith.constant 0 : index
    %c0_25 = arith.constant 0 : index
    %48 = vector.load %arg14[%c0_24, %c0_25] : memref<64x128xf32, #tpu.memory_space<vmem>>, vector<64x128xf32>
    tpu.vector_store %arg14[%c0_24, %c0_25], %47 {strides = array<i32>} : memref<64x128xf32, #tpu.memory_space<vmem>>, vector<64x128xf32>,
    %c2_i32 = arith.constant 2 : i32
    %49 = arith.cmpi eq, %arg0, %c2_i32 : i32
    %50 = arith.extui %49 : i1 to i32
    %c0_i32_26 = arith.constant 0 : i32
    %51 = arith.cmpi ne, %50, %c0_i32_26 : i32
    scf.if %51 {
      %c0_27 = arith.constant 0 : index
      %c0_28 = arith.constant 0 : index
      %52 = vector.load %arg14[%c0_27, %c0_28] : memref<64x128xf32, #tpu.memory_space<vmem>>, vector<64x128xf32>
      %53 = arith.truncf %52 : vector<64x128xf32> to vector<64x128xbf16>
      %54 = tpu.concatenate %53, %3 in 1 : vector<64x128xbf16>, vector<64x128xbf16> -> vector<64x256xbf16>
      %c0_29 = arith.constant 0 : index
      %c0_30 = arith.constant 0 : index
      %55 = vector.load %arg9[%c0_29, %c0_30] : memref<256x128xbf16, #tpu.memory_space<vmem>>, vector<256x128xbf16>
      %cst_31 = arith.constant dense<0.000000e+00> : vector<64x128xf32>
      %56 = tpu.matmul %54, %55, %cst_31 {dimension_numbers = #tpu.dot_dimension_numbers<[1], [0], [0], [1], [0, 0, 1, 1], [], []>} : vector<64x256xbf16>, vector<256x128xbf16>, vector<64x128xf32> -> vector<64x128xf32>
      %c0_32 = arith.constant 0 : index
      %c0_33 = arith.constant 0 : index
      %57 = vector.load %arg10[%c0_32, %c0_33] : memref<1x128xf32, #tpu.memory_space<vmem>>, vector<1x128xf32>
      %58 = vector.broadcast %57 : vector<1x128xf32> to vector<64x128xf32>
      %59 = arith.addf %56, %58 : vector<64x128xf32>
      %cst_34 = arith.constant 0.000000e+00 : f32
      %60 = vector.broadcast %cst_34 : f32 to vector<64x128xf32>
      %61 = arith.maximumf %59, %60 : vector<64x128xf32>
      %62 = arith.truncf %61 : vector<64x128xf32> to vector<64x128xbf16>
      %c0_35 = arith.constant 0 : index
      %c0_36 = arith.constant 0 : index
      %63 = vector.load %arg11[%c0_35, %c0_36] : memref<128x128xbf16, #tpu.memory_space<vmem>>, vector<128x128xbf16>
      %cst_37 = arith.constant dense<0.000000e+00> : vector<64x128xf32>
      %64 = tpu.matmul %62, %63, %cst_37 {dimension_numbers = #tpu.dot_dimension_numbers<[1], [0], [0], [1], [0, 0, 1, 1], [], []>} : vector<64x128xbf16>, vector<128x128xbf16>, vector<64x128xf32> -> vector<64x128xf32>
      %c0_38 = arith.constant 0 : index
      %c0_39 = arith.constant 0 : index
      %65 = vector.load %arg12[%c0_38, %c0_39] : memref<1x128xf32, #tpu.memory_space<vmem>>, vector<1x128xf32>
      %66 = vector.broadcast %65 : vector<1x128xf32> to vector<64x128xf32>
      %67 = arith.addf %64, %66 : vector<64x128xf32>
      %cst_40 = arith.constant 0.000000e+00 : f32
      %68 = vector.broadcast %cst_40 : f32 to vector<64x128xf32>
      %69 = arith.maximumf %67, %68 : vector<64x128xf32>
      %c0_41 = arith.constant 0 : index
      %c0_42 = arith.constant 0 : index
      %70 = vector.load %arg13[%c0_41, %c0_42] : memref<64x128xf32, #tpu.memory_space<vmem>>, vector<64x128xf32>
      tpu.vector_store %arg13[%c0_41, %c0_42], %69 {strides = array<i32>} : memref<64x128xf32, #tpu.memory_space<vmem>>, vector<64x128xf32>,
    } else {
    }
    return
  }
  func.func @transform_0(%arg0: i32) -> (i32, i32) {
    %c0_i32 = arith.constant 0 : i32
    %c0_i32_0 = arith.constant 0 : i32
    %c0_i32_1 = arith.constant 0 : i32
    return %c0_i32, %c0_i32_0 : i32, i32
  }
  func.func @transform_1(%arg0: i32) -> (i32, i32) {
    %c0_i32 = arith.constant 0 : i32
    %c0_i32_0 = arith.constant 0 : i32
    return %arg0, %c0_i32 : i32, i32
  }
  func.func @transform_2(%arg0: i32) -> (i32, i32) {
    %c0_i32 = arith.constant 0 : i32
    %c0_i32_0 = arith.constant 0 : i32
    return %arg0, %c0_i32 : i32, i32
  }
  func.func @transform_3(%arg0: i32) -> (i32, i32) {
    %c0_i32 = arith.constant 0 : i32
    %c0_i32_0 = arith.constant 0 : i32
    return %c0_i32, %arg0 : i32, i32
  }
  func.func @transform_4(%arg0: i32) -> (i32, i32) {
    %c0_i32 = arith.constant 0 : i32
    %c0_i32_0 = arith.constant 0 : i32
    %c0_i32_1 = arith.constant 0 : i32
    return %c0_i32, %c0_i32_0 : i32, i32
  }
  func.func @transform_5(%arg0: i32) -> (i32, i32) {
    %c0_i32 = arith.constant 0 : i32
    %c0_i32_0 = arith.constant 0 : i32
    %c0_i32_1 = arith.constant 0 : i32
    return %c0_i32, %c0_i32_0 : i32, i32
  }
  func.func @transform_6(%arg0: i32) -> (i32, i32) {
    %c0_i32 = arith.constant 0 : i32
    %c0_i32_0 = arith.constant 0 : i32
    %c0_i32_1 = arith.constant 0 : i32
    return %c0_i32, %c0_i32_0 : i32, i32
  }
  func.func @transform_7(%arg0: i32) -> (i32, i32) {
    %c0_i32 = arith.constant 0 : i32
    %c0_i32_0 = arith.constant 0 : i32
    %c0_i32_1 = arith.constant 0 : i32
    return %c0_i32, %c0_i32_0 : i32, i32
  }
  func.func @transform_8(%arg0: i32) -> (i32, i32) {
    %c0_i32 = arith.constant 0 : i32
    %c0_i32_0 = arith.constant 0 : i32
    %c0_i32_1 = arith.constant 0 : i32
    return %c0_i32, %c0_i32_0 : i32, i32
  }
  func.func @transform_9(%arg0: i32) -> (i32, i32) {
    %c0_i32 = arith.constant 0 : i32
    %c0_i32_0 = arith.constant 0 : i32
    %c0_i32_1 = arith.constant 0 : i32
    return %c0_i32, %c0_i32_0 : i32, i32
  }
  func.func @transform_10(%arg0: i32) -> (i32, i32) {
    %c0_i32 = arith.constant 0 : i32
    %c0_i32_0 = arith.constant 0 : i32
    %c0_i32_1 = arith.constant 0 : i32
    return %c0_i32, %c0_i32_0 : i32, i32
  }
  func.func @transform_11(%arg0: i32) -> (i32, i32) {
    %c0_i32 = arith.constant 0 : i32
    %c0_i32_0 = arith.constant 0 : i32
    %c0_i32_1 = arith.constant 0 : i32
    return %c0_i32, %c0_i32_0 : i32, i32
  }
  func.func @transform_12(%arg0: i32) -> (i32, i32) {
    %c0_i32 = arith.constant 0 : i32
    %c0_i32_0 = arith.constant 0 : i32
    %c0_i32_1 = arith.constant 0 : i32
    return %c0_i32, %c0_i32_0 : i32, i32
  }
}

module attributes {stable_mosaic.version = 11 : i64} {
  func.func @graphprop_kernel(%arg0: i32, %arg1: memref<64x128xbf16, #tpu.memory_space<vmem>>, %arg2: memref<256x1xi32, #tpu.memory_space<vmem>>, %arg3: memref<256x1xi32, #tpu.memory_space<vmem>>, %arg4: memref<1x256xi32, #tpu.memory_space<vmem>>, %arg5: memref<256x128xbf16, #tpu.memory_space<vmem>>, %arg6: memref<1x128xf32, #tpu.memory_space<vmem>>, %arg7: memref<128x128xbf16, #tpu.memory_space<vmem>>, %arg8: memref<1x128xf32, #tpu.memory_space<vmem>>, %arg9: memref<256x128xbf16, #tpu.memory_space<vmem>>, %arg10: memref<1x128xf32, #tpu.memory_space<vmem>>, %arg11: memref<128x128xbf16, #tpu.memory_space<vmem>>, %arg12: memref<1x128xf32, #tpu.memory_space<vmem>>, %arg13: memref<64x128xf32, #tpu.memory_space<vmem>>, %arg14: memref<64x128xf32, #tpu.memory_space<vmem>>) attributes {dimension_semantics = [#tpu.dimension_semantics<arbitrary>], iteration_bounds = array<i64: 3>, scalar_prefetch = 0 : i64, scratch_operands = 1 : i64, tpu.core_type = #tpu.core_type<tc>, window_params = [{pipeline_mode = #tpu.pipeline_mode<synchronous>, transform_indices = @transform_0, window_bounds = array<i64: 64, 128>}, {transform_indices = @transform_1, window_bounds = array<i64: 256, 1>}, {transform_indices = @transform_2, window_bounds = array<i64: 256, 1>}, {transform_indices = @transform_3, window_bounds = array<i64: 1, 256>}, {pipeline_mode = #tpu.pipeline_mode<synchronous>, transform_indices = @transform_4, window_bounds = array<i64: 256, 128>}, {pipeline_mode = #tpu.pipeline_mode<synchronous>, transform_indices = @transform_5, window_bounds = array<i64: 1, 128>}, {pipeline_mode = #tpu.pipeline_mode<synchronous>, transform_indices = @transform_6, window_bounds = array<i64: 128, 128>}, {pipeline_mode = #tpu.pipeline_mode<synchronous>, transform_indices = @transform_7, window_bounds = array<i64: 1, 128>}, {pipeline_mode = #tpu.pipeline_mode<synchronous>, transform_indices = @transform_8, window_bounds = array<i64: 256, 128>}, {pipeline_mode = #tpu.pipeline_mode<synchronous>, transform_indices = @transform_9, window_bounds = array<i64: 1, 128>}, {pipeline_mode = #tpu.pipeline_mode<synchronous>, transform_indices = @transform_10, window_bounds = array<i64: 128, 128>}, {pipeline_mode = #tpu.pipeline_mode<synchronous>, transform_indices = @transform_11, window_bounds = array<i64: 1, 128>}, {pipeline_mode = #tpu.pipeline_mode<synchronous>, transform_indices = @transform_12, window_bounds = array<i64: 64, 128>}]} {
    %c0_i32 = arith.constant 0 : i32
    %0 = arith.cmpi eq, %arg0, %c0_i32 : i32
    %1 = arith.extui %0 : i1 to i32
    %c0_i32_0 = arith.constant 0 : i32
    %2 = arith.cmpi ne, %1, %c0_i32_0 : i32
    scf.if %2 {
      %cst_27 = arith.constant 0.000000e+00 : f32
      %52 = vector.broadcast %cst_27 : f32 to vector<64x128xf32>
      %c0_28 = arith.constant 0 : index
      %c0_29 = arith.constant 0 : index
      %53 = vector.load %arg14[%c0_28, %c0_29] : memref<64x128xf32, #tpu.memory_space<vmem>>, vector<64x128xf32>
      tpu.vector_store %arg14[%c0_28, %c0_29], %52 {strides = array<i32>} : memref<64x128xf32, #tpu.memory_space<vmem>>, vector<64x128xf32>,
    } else {
    }
    %c0 = arith.constant 0 : index
    %c0_1 = arith.constant 0 : index
    %3 = vector.load %arg1[%c0, %c0_1] : memref<64x128xbf16, #tpu.memory_space<vmem>>, vector<64x128xbf16>
    %c0_2 = arith.constant 0 : index
    %c0_3 = arith.constant 0 : index
    %4 = vector.load %arg2[%c0_2, %c0_3] : memref<256x1xi32, #tpu.memory_space<vmem>>, vector<256x1xi32>
    %c0_4 = arith.constant 0 : index
    %c0_5 = arith.constant 0 : index
    %5 = vector.load %arg3[%c0_4, %c0_5] : memref<256x1xi32, #tpu.memory_space<vmem>>, vector<256x1xi32>
    %c0_6 = arith.constant 0 : index
    %c0_7 = arith.constant 0 : index
    %6 = vector.load %arg4[%c0_6, %c0_7] : memref<1x256xi32, #tpu.memory_space<vmem>>, vector<1x256xi32>
    %7 = tpu.iota {dimensions = array<i32: 1>} : vector<256x64xi32>
    %8 = vector.broadcast %4 : vector<256x1xi32> to vector<256x64xi32>
    %9 = arith.cmpi eq, %7, %8 : vector<256x64xi32>
    %10 = arith.extui %9 : vector<256x64xi1> to vector<256x64xi32>
    %11 = arith.sitofp %10 : vector<256x64xi32> to vector<256x64xf32>
    %12 = arith.truncf %11 : vector<256x64xf32> to vector<256x64xbf16>
    %13 = vector.broadcast %5 : vector<256x1xi32> to vector<256x64xi32>
    %14 = arith.cmpi eq, %7, %13 : vector<256x64xi32>
    %15 = arith.extui %14 : vector<256x64xi1> to vector<256x64xi32>
    %16 = arith.sitofp %15 : vector<256x64xi32> to vector<256x64xf32>
    %17 = arith.truncf %16 : vector<256x64xf32> to vector<256x64xbf16>
    %18 = tpu.iota {dimensions = array<i32: 0>} : vector<64x256xi32>
    %19 = vector.broadcast %6 : vector<1x256xi32> to vector<64x256xi32>
    %20 = arith.cmpi eq, %18, %19 : vector<64x256xi32>
    %21 = arith.extui %20 : vector<64x256xi1> to vector<64x256xi32>
    %22 = arith.sitofp %21 : vector<64x256xi32> to vector<64x256xf32>
    %23 = arith.truncf %22 : vector<64x256xf32> to vector<64x256xbf16>
    %cst = arith.constant dense<0.000000e+00> : vector<256x128xf32>
    %24 = tpu.matmul %12, %3, %cst {dimension_numbers = #tpu.dot_dimension_numbers<[1], [0], [0], [1], [0, 0, 1, 1], [], []>} : vector<256x64xbf16>, vector<64x128xbf16>, vector<256x128xf32> -> vector<256x128xf32>
    %25 = arith.truncf %24 : vector<256x128xf32> to vector<256x128xbf16>
    %cst_8 = arith.constant dense<0.000000e+00> : vector<256x128xf32>
    %26 = tpu.matmul %17, %3, %cst_8 {dimension_numbers = #tpu.dot_dimension_numbers<[1], [0], [0], [1], [0, 0, 1, 1], [], []>} : vector<256x64xbf16>, vector<64x128xbf16>, vector<256x128xf32> -> vector<256x128xf32>
    %27 = arith.truncf %26 : vector<256x128xf32> to vector<256x128xbf16>
    %28 = tpu.concatenate %25, %27 in 1 : vector<256x128xbf16>, vector<256x128xbf16> -> vector<256x256xbf16>
    %c0_9 = arith.constant 0 : index
    %c0_10 = arith.constant 0 : index
    %29 = vector.load %arg5[%c0_9, %c0_10] : memref<256x128xbf16, #tpu.memory_space<vmem>>, vector<256x128xbf16>
    %cst_11 = arith.constant dense<0.000000e+00> : vector<256x128xf32>
    %30 = tpu.matmul %28, %29, %cst_11 {dimension_numbers = #tpu.dot_dimension_numbers<[1], [0], [0], [1], [0, 0, 1, 1], [], []>} : vector<256x256xbf16>, vector<256x128xbf16>, vector<256x128xf32> -> vector<256x128xf32>
    %c0_12 = arith.constant 0 : index
    %c0_13 = arith.constant 0 : index
    %31 = vector.load %arg6[%c0_12, %c0_13] : memref<1x128xf32, #tpu.memory_space<vmem>>, vector<1x128xf32>
    %32 = vector.broadcast %31 : vector<1x128xf32> to vector<256x128xf32>
    %33 = arith.addf %30, %32 : vector<256x128xf32>
    %cst_14 = arith.constant 0.000000e+00 : f32
    %34 = vector.broadcast %cst_14 : f32 to vector<256x128xf32>
    %35 = arith.maximumf %33, %34 : vector<256x128xf32>
    %36 = arith.truncf %35 : vector<256x128xf32> to vector<256x128xbf16>
    %c0_15 = arith.constant 0 : index
    %c0_16 = arith.constant 0 : index
    %37 = vector.load %arg7[%c0_15, %c0_16] : memref<128x128xbf16, #tpu.memory_space<vmem>>, vector<128x128xbf16>
    %cst_17 = arith.constant dense<0.000000e+00> : vector<256x128xf32>
    %38 = tpu.matmul %36, %37, %cst_17 {dimension_numbers = #tpu.dot_dimension_numbers<[1], [0], [0], [1], [0, 0, 1, 1], [], []>} : vector<256x128xbf16>, vector<128x128xbf16>, vector<256x128xf32> -> vector<256x128xf32>
    %c0_18 = arith.constant 0 : index
    %c0_19 = arith.constant 0 : index
    %39 = vector.load %arg8[%c0_18, %c0_19] : memref<1x128xf32, #tpu.memory_space<vmem>>, vector<1x128xf32>
    %40 = vector.broadcast %39 : vector<1x128xf32> to vector<256x128xf32>
    %41 = arith.addf %38, %40 : vector<256x128xf32>
    %cst_20 = arith.constant 0.000000e+00 : f32
    %42 = vector.broadcast %cst_20 : f32 to vector<256x128xf32>
    %43 = arith.maximumf %41, %42 : vector<256x128xf32>
    %c0_21 = arith.constant 0 : index
    %c0_22 = arith.constant 0 : index
    %44 = vector.load %arg14[%c0_21, %c0_22] : memref<64x128xf32, #tpu.memory_space<vmem>>, vector<64x128xf32>
    %45 = arith.truncf %43 : vector<256x128xf32> to vector<256x128xbf16>
    %cst_23 = arith.constant dense<0.000000e+00> : vector<64x128xf32>
    %46 = tpu.matmul %23, %45, %cst_23 {dimension_numbers = #tpu.dot_dimension_numbers<[1], [0], [0], [1], [0, 0, 1, 1], [], []>} : vector<64x256xbf16>, vector<256x128xbf16>, vector<64x128xf32> -> vector<64x128xf32>
    %47 = arith.addf %44, %46 : vector<64x128xf32>
    %c0_24 = arith.constant 0 : index
    %c0_25 = arith.constant 0 : index
    %48 = vector.load %arg14[%c0_24, %c0_25] : memref<64x128xf32, #tpu.memory_space<vmem>>, vector<64x128xf32>
    tpu.vector_store %arg14[%c0_24, %c0_25], %47 {strides = array<i32>} : memref<64x128xf32, #tpu.memory_space<vmem>>, vector<64x128xf32>,
    %c2_i32 = arith.constant 2 : i32
    %49 = arith.cmpi eq, %arg0, %c2_i32 : i32
    %50 = arith.extui %49 : i1 to i32
    %c0_i32_26 = arith.constant 0 : i32
    %51 = arith.cmpi ne, %50, %c0_i32_26 : i32
    scf.if %51 {
      %c0_27 = arith.constant 0 : index
      %c0_28 = arith.constant 0 : index
      %52 = vector.load %arg14[%c0_27, %c0_28] : memref<64x128xf32, #tpu.memory_space<vmem>>, vector<64x128xf32>
      %53 = arith.truncf %52 : vector<64x128xf32> to vector<64x128xbf16>
      %54 = tpu.concatenate %53, %3 in 1 : vector<64x128xbf16>, vector<64x128xbf16> -> vector<64x256xbf16>
      %c0_29 = arith.constant 0 : index
      %c0_30 = arith.constant 0 : index
      %55 = vector.load %arg9[%c0_29, %c0_30] : memref<256x128xbf16, #tpu.memory_space<vmem>>, vector<256x128xbf16>
      %cst_31 = arith.constant dense<0.000000e+00> : vector<64x128xf32>
      %56 = tpu.matmul %54, %55, %cst_31 {dimension_numbers = #tpu.dot_dimension_numbers<[1], [0], [0], [1], [0, 0, 1, 1], [], []>} : vector<64x256xbf16>, vector<256x128xbf16>, vector<64x128xf32> -> vector<64x128xf32>
      %c0_32 = arith.constant 0 : index
      %c0_33 = arith.constant 0 : index
      %57 = vector.load %arg10[%c0_32, %c0_33] : memref<1x128xf32, #tpu.memory_space<vmem>>, vector<1x128xf32>
      %58 = vector.broadcast %57 : vector<1x128xf32> to vector<64x128xf32>
      %59 = arith.addf %56, %58 : vector<64x128xf32>
      %cst_34 = arith.constant 0.000000e+00 : f32
      %60 = vector.broadcast %cst_34 : f32 to vector<64x128xf32>
      %61 = arith.maximumf %59, %60 : vector<64x128xf32>
      %62 = arith.truncf %61 : vector<64x128xf32> to vector<64x128xbf16>
      %c0_35 = arith.constant 0 : index
      %c0_36 = arith.constant 0 : index
      %63 = vector.load %arg11[%c0_35, %c0_36] : memref<128x128xbf16, #tpu.memory_space<vmem>>, vector<128x128xbf16>
      %cst_37 = arith.constant dense<0.000000e+00> : vector<64x128xf32>
      %64 = tpu.matmul %62, %63, %cst_37 {dimension_numbers = #tpu.dot_dimension_numbers<[1], [0], [0], [1], [0, 0, 1, 1], [], []>} : vector<64x128xbf16>, vector<128x128xbf16>, vector<64x128xf32> -> vector<64x128xf32>
      %c0_38 = arith.constant 0 : index
      %c0_39 = arith.constant 0 : index
      %65 = vector.load %arg12[%c0_38, %c0_39] : memref<1x128xf32, #tpu.memory_space<vmem>>, vector<1x128xf32>
      %66 = vector.broadcast %65 : vector<1x128xf32> to vector<64x128xf32>
      %67 = arith.addf %64, %66 : vector<64x128xf32>
      %cst_40 = arith.constant 0.000000e+00 : f32
      %68 = vector.broadcast %cst_40 : f32 to vector<64x128xf32>
      %69 = arith.maximumf %67, %68 : vector<64x128xf32>
      %c0_41 = arith.constant 0 : index
      %c0_42 = arith.constant 0 : index
      %70 = vector.load %arg13[%c0_41, %c0_42] : memref<64x128xf32, #tpu.memory_space<vmem>>, vector<64x128xf32>
      tpu.vector_store %arg13[%c0_41, %c0_42], %69 {strides = array<i32>} : memref<64x128xf32, #tpu.memory_space<vmem>>, vector<64x128xf32>,
    } else {
    }
    return
  }
  func.func @transform_0(%arg0: i32) -> (i32, i32) {
    %c0_i32 = arith.constant 0 : i32
    %c0_i32_0 = arith.constant 0 : i32
    %c0_i32_1 = arith.constant 0 : i32
    return %c0_i32, %c0_i32_0 : i32, i32
  }
  func.func @transform_1(%arg0: i32) -> (i32, i32) {
    %c0_i32 = arith.constant 0 : i32
    %c0_i32_0 = arith.constant 0 : i32
    return %arg0, %c0_i32 : i32, i32
  }
  func.func @transform_2(%arg0: i32) -> (i32, i32) {
    %c0_i32 = arith.constant 0 : i32
    %c0_i32_0 = arith.constant 0 : i32
    return %arg0, %c0_i32 : i32, i32
  }
  func.func @transform_3(%arg0: i32) -> (i32, i32) {
    %c0_i32 = arith.constant 0 : i32
    %c0_i32_0 = arith.constant 0 : i32
    return %c0_i32, %arg0 : i32, i32
  }
  func.func @transform_4(%arg0: i32) -> (i32, i32) {
    %c0_i32 = arith.constant 0 : i32
    %c0_i32_0 = arith.constant 0 : i32
    %c0_i32_1 = arith.constant 0 : i32
    return %c0_i32, %c0_i32_0 : i32, i32
  }
  func.func @transform_5(%arg0: i32) -> (i32, i32) {
    %c0_i32 = arith.constant 0 : i32
    %c0_i32_0 = arith.constant 0 : i32
    %c0_i32_1 = arith.constant 0 : i32
    return %c0_i32, %c0_i32_0 : i32, i32
  }
  func.func @transform_6(%arg0: i32) -> (i32, i32) {
    %c0_i32 = arith.constant 0 : i32
    %c0_i32_0 = arith.constant 0 : i32
    %c0_i32_1 = arith.constant 0 : i32
    return %c0_i32, %c0_i32_0 : i32, i32
  }
  func.func @transform_7(%arg0: i32) -> (i32, i32) {
    %c0_i32 = arith.constant 0 : i32
    %c0_i32_0 = arith.constant 0 : i32
    %c0_i32_1 = arith.constant 0 : i32
    return %c0_i32, %c0_i32_0 : i32, i32
  }
  func.func @transform_8(%arg0: i32) -> (i32, i32) {
    %c0_i32 = arith.constant 0 : i32
    %c0_i32_0 = arith.constant 0 : i32
    %c0_i32_1 = arith.constant 0 : i32
    return %c0_i32, %c0_i32_0 : i32, i32
  }
  func.func @transform_9(%arg0: i32) -> (i32, i32) {
    %c0_i32 = arith.constant 0 : i32
    %c0_i32_0 = arith.constant 0 : i32
    %c0_i32_1 = arith.constant 0 : i32
    return %c0_i32, %c0_i32_0 : i32, i32
  }
  func.func @transform_10(%arg0: i32) -> (i32, i32) {
    %c0_i32 = arith.constant 0 : i32
    %c0_i32_0 = arith.constant 0 : i32
    %c0_i32_1 = arith.constant 0 : i32
    return %c0_i32, %c0_i32_0 : i32, i32
  }
  func.func @transform_11(%arg0: i32) -> (i32, i32) {
    %c0_i32 = arith.constant 0 : i32
    %c0_i32_0 = arith.constant 0 : i32
    %c0_i32_1 = arith.constant 0 : i32
    return %c0_i32, %c0_i32_0 : i32, i32
  }
  func.func @transform_12(%arg0: i32) -> (i32, i32) {
    %c0_i32 = arith.constant 0 : i32
    %c0_i32_0 = arith.constant 0 : i32
    %c0_i32_1 = arith.constant 0 : i32
    return %c0_i32, %c0_i32_0 : i32, i32
  }
}

</mosaic_0001>

<bundles_post_ra>
// kernel: tpu_custom_call.1
= control target key start
LH: loop header
LB: loop body
LE: loop exit
PB: predicated region body
PF: predicated region fallthrough
CT: control target
= control target key end

     0   :  { %17 = vsyncpa [#allocation4], 0  ;;  %s3469_s21 = smov 0   ;;  %s4137_s0 = inlined_call_operand.vmem [shape: bf16[64,128], index: 0, kind: input, shape index: {}]   ;;  %s4138_s1 = inlined_call_operand.vmem [shape: s32[768,1], index: 1, kind: input, shape index: {}]   ;;  %s4139_s2 = inlined_call_operand.vmem [shape: s32[768,1], index: 2, kind: input, shape index: {}]   ;;  %s4140_s3 = inlined_call_operand.vmem [shape: s32[1,768], index: 3, kind: input, shape index: {}]   ;;  %s4141_s4 = inlined_call_operand.vmem [shape: bf16[256,128], index: 4, kind: input, shape index: {}]   ;;  %s4142_s5 = inlined_call_operand.vmem [shape: f32[1,128], index: 5, kind: input, shape index: {}]   ;;  %s4143_s6 = inlined_call_operand.vmem [shape: bf16[128,128], index: 6, kind: input, shape index: {}]   ;;  %s4144_s7 = inlined_call_operand.vmem [shape: f32[1,128], index: 7, kind: input, shape index: {}]   ;;  %s4145_s8 = inlined_call_operand.vmem [shape: bf16[256,128], index: 8, kind: input, shape index: {}]   ;;  %s4146_s9 = inlined_call_operand.vmem [shape: f32[1,128], index: 9, kind: input, shape index: {}]   ;;  %s4147_s10 = inlined_call_operand.vmem [shape: bf16[128,128], index: 10, kind: input, shape index: {}]   ;;  %s4148_s11 = inlined_call_operand.vmem [shape: f32[1,128], index: 11, kind: input, shape index: {}]   ;;  %s4149_s12 = inlined_call_operand.hbm [shape: f32[64,128], index: 12, kind: output, shape index: {}]  }
   0x1 LB: > { %s3475_s22 = sadd.s32 4294967295, %s3395_s21   ;;  %p2660_p0 = scmp.ge.s32.totalorder %s3395_s21, 1  ;;  %s3395_s21 = sphi %s3469_s21, %s23_s21  }
   0x2   : > { %p380_p1 = scmp.lt.s32.totalorder %s3395_s21, 4 }
   0x4   : > { %p381_p2 = pnand %p2660_p0, %p380_p1 }
   0x5   : > { %s2661_s23 = sshll.u32 (!%p381_p2), %s3475_s22, 5  ;;  %s2665_s24 = sshll.u32 (!%p381_p2), %s3475_s22, 1 }
   0x6   : > { %384 = sbr.rel (%p381_p2) target bundleno = 1696 (0x6a0), region = 68  ;;  %p427_p3 = scmp.lt.s32.totalorder (!%p381_p2), %s2661_s23, 95 }
   0x7   : > { %p439_p4 = scmp.lt.s32.totalorder (!%p381_p2), %s2665_s24, 5  ;;  %p2666_p5 = scmp.ne.s32.totalorder (!%p381_p2), %s3475_s22, 0 }
   0xd   : > { %s4165_s23 = smov (!%p427_p3, %s2661_s23), 95  ;;  %s4167_s24 = smov (!%p439_p4, %s2665_s24), 5 }
   0xe   : > { %s2662_s25 = sshll.u32 %s4165_s23, 3  ;;  %s441_s16 = scalar_lea.vmem %s4140_s3, %s4167_s24  ;;  %v3397_v0 = vmov (!%p2666_p5), 0.0  }
   0xf   : > { %s3486_s28 = scalar_lea.vmem %s4138_s1, %s2662_s25  ;;  %s3491_s13 = scalar_lea.vmem %s4139_s2, %s2662_s25  ;;  %448 = vst [vmem:[#allocation2] sm:$0xff] (!%p2666_p5), %v3397_v0  ;;  %449 = vst [vmem:[#allocation2 + $0x8] sm:$0xff] (!%p2666_p5), %v3397_v0 }
  0x10   : > { %447 = sbr.rel (%p2666_p5) target bundleno = 23 (0x17), region = 72  ;;  %450 = vst [vmem:[#allocation2 + $0x10] sm:$0xff] (!%p2666_p5), %v3397_v0  ;;  %451 = vst [vmem:[#allocation2 + $0x18] sm:$0xff] (!%p2666_p5), %v3397_v0 }
  0x11   : > { %452 = vst [vmem:[#allocation2 + $0x20] sm:$0xff] (!%p2666_p5), %v3397_v0  ;;  %453 = vst [vmem:[#allocation2 + $0x28] sm:$0xff] (!%p2666_p5), %v3397_v0 }
  0x12   : > { %454 = vst [vmem:[#allocation2 + $0x30] sm:$0xff] (!%p2666_p5), %v3397_v0  ;;  %455 = vst [vmem:[#allocation2 + $0x38] sm:$0xff] (!%p2666_p5), %v3397_v0 }
  0x17 PF: > { %v490_v1 = vld [vmem:[%s3486_s28 + $0xd0] sm:$0xff]  ;;  %v488_v2 = vld [vmem:[%s3486_s28 + $0xc0] sm:$0xff]  ;;  %v3398_v3 = vmov 0   ;;  %v491_v4 = vld [vmem:[%s3486_s28 + $0xd8] sm:$0xff]  ;;  %vm1044_vm4 = vcmask 523264   ;;  %p2825_p6 = scmp.ne.s32.totalorder %s3475_s22, 2 }
  0x18   : > { %3306 = vset.pattern.permute.xlu1 %v3398_v3  ;;  %3305 = vset.pattern.permute.xlu0 %v3398_v3  ;;  %v489_v5 = vld [vmem:[%s3486_s28 + $0xc8] sm:$0xff]  ;;  %v492_v7 = vld [vmem:[%s3486_s28 + $0xe0] sm:$0xff]  ;;  %v495_v8 = vld [vmem:[%s3486_s28 + $0xf8] sm:$0xff] }
  0x19   : > { %610 = vperm.xlu1 %3306, %v490_v1   ;;  %604 = vperm.xlu0 %3305, %v488_v2   ;;  %v493_v6 = vld [vmem:[%s3486_s28 + $0xe8] sm:$0xff]  ;;  %v494_v9 = vld [vmem:[%s3486_s28 + $0xf0] sm:$0xff]  ;;  %v496_v11 = vld [vmem:[%s3491_s13] sm:$0xff] }
  0x1a   : > { %v497_v10 = vld [vmem:[%s3491_s13 + $0x8] sm:$0xff]  ;;  %v464_v13 = vld [vmem:[%s3486_s28] sm:$0xff]  ;;  %v499_v14 = vld [vmem:[%s3491_s13 + $0x18] sm:$0xff] }
  0x1b   : > { %v465_v12 = vld [vmem:[%s3486_s28 + $0x8] sm:$0xff]  ;;  %v3514_v15 = vld [vmem:[%s4137_s0] sm:$0xff]   ;;  %v498_v16 = vld [vmem:[%s3491_s13 + $0x10] sm:$0xff] }
  0x1c   : > { %3276 = vmatprep.subr.bf16.mxu1 %v3514_v15  ;;  %v3521_v17 = vld [vmem:[%s4137_s0 + $0x8] sm:$0xff]   ;;  %3124 = vmatprep.subr.bf16.mxu0 %v3514_v15  ;;  %v467_v18 = vld [vmem:[%s3486_s28 + $0x18] sm:$0xff]  ;;  %v466_v19 = vld [vmem:[%s3486_s28 + $0x10] sm:$0xff] }
  0x1d   : > { %613 = vperm.xlu1 %3306, %v491_v4   ;;  %607 = vperm.xlu0 %3305, %v489_v5   ;;  %v3532_v20 = vld [vmem:[%s4137_s0 + $0x10] sm:$0xff]   ;;  %v3538_v21 = vld [vmem:[%s4137_s0 + $0x18] sm:$0xff]   ;;  %v501_v22 = vld [vmem:[%s3491_s13 + $0x28] sm:$0xff] }
  0x1e   : > { %3280 = vmatpush3.bf16.msra.mxu1 %v3514_v15  ;;  %3125 = vmatpush3.bf16.msra.mxu0 %v3514_v15  ;;  %v500_v23 = vld [vmem:[%s3491_s13 + $0x20] sm:$0xff]  ;;  %v469_v24 = vld [vmem:[%s3486_s28 + $0x28] sm:$0xff]  ;;  %v503_v26 = vld [vmem:[%s3491_s13 + $0x38] sm:$0xff] }
  0x1f   : > { %3277 = vmatprep.subr.bf16.mxu1 %v3521_v17  ;;  %3126 = vmatprep.subr.bf16.mxu0 %v3521_v17  ;;  %v468_v25 = vld [vmem:[%s3486_s28 + $0x20] sm:$0xff]  ;;  %v502_v27 = vld [vmem:[%s3491_s13 + $0x30] sm:$0xff]  ;;  %v471_v28 = vld [vmem:[%s3486_s28 + $0x38] sm:$0xff] }
  0x20   : > { %v470_v29 = vld [vmem:[%s3486_s28 + $0x30] sm:$0xff]  ;;  %v505_v30 = vld [vmem:[%s3491_s13 + $0x48] sm:$0xff]  ;;  %v504_v31 = vld [vmem:[%s3491_s13 + $0x40] sm:$0xff] }
  0x21   : > { %619 = vperm.xlu1 %3306, %v493_v6   ;;  %616 = vperm.xlu0 %3305, %v492_v7   ;;  %v473_v32 = vld [vmem:[%s3486_s28 + $0x48] sm:$0xff]  ;;  %v472_v33 = vld [vmem:[%s3486_s28 + $0x40] sm:$0xff]  ;;  %v507_v34 = vld [vmem:[%s3491_s13 + $0x58] sm:$0xff]  ;;  %v529_v6 = vlaneseq }
  0x22   : > { %3281 = vmatpush3.bf16.msra.mxu1 %v3521_v17  ;;  %3127 = vmatpush3.bf16.msra.mxu0 %v3521_v17  ;;  %v506_v35 = vld [vmem:[%s3491_s13 + $0x50] sm:$0xff]  ;;  %v475_v36 = vld [vmem:[%s3486_s28 + $0x58] sm:$0xff]  ;;  %v509_v38 = vld [vmem:[%s3491_s13 + $0x68] sm:$0xff] }
  0x23   : > { %3278 = vmatprep.subr.bf16.mxu1 %v3532_v20  ;;  %3128 = vmatprep.subr.bf16.mxu0 %v3532_v20  ;;  %v474_v37 = vld [vmem:[%s3486_s28 + $0x50] sm:$0xff]  ;;  %v508_v39 = vld [vmem:[%s3491_s13 + $0x60] sm:$0xff]  ;;  %v477_v40 = vld [vmem:[%s3486_s28 + $0x68] sm:$0xff]  ;;  %v3600_v7 = vand.u32 127, %v529_v6 }
  0x24   : > { %v476_v41 = vld [vmem:[%s3486_s28 + $0x60] sm:$0xff]  ;;  %v511_v42 = vld [vmem:[%s3491_s13 + $0x78] sm:$0xff]  ;;  %v510_v43 = vld [vmem:[%s3491_s13 + $0x70] sm:$0xff] }
  0x25   : > { %625 = vperm.xlu1 %3306, %v495_v8   ;;  %622 = vperm.xlu0 %3305, %v494_v9   ;;  %v479_v44 = vld [vmem:[%s3486_s28 + $0x78] sm:$0xff]  ;;  %v478_v45 = vld [vmem:[%s3486_s28 + $0x70] sm:$0xff]  ;;  %v513_v46 = vld [vmem:[%s3491_s13 + $0x88] sm:$0xff] }
  0x26   : > { %3282 = vmatpush3.bf16.msra.mxu1 %v3532_v20  ;;  %3129 = vmatpush3.bf16.msra.mxu0 %v3532_v20  ;;  %v512_v47 = vld [vmem:[%s3491_s13 + $0x80] sm:$0xff]  ;;  %v481_v48 = vld [vmem:[%s3486_s28 + $0x88] sm:$0xff]  ;;  %v515_v50 = vld [vmem:[%s3491_s13 + $0x98] sm:$0xff] }
  0x27   : > { %3279 = vmatprep.subr.bf16.mxu1 %v3538_v21  ;;  %3130 = vmatprep.subr.bf16.mxu0 %v3538_v21  ;;  %v480_v49 = vld [vmem:[%s3486_s28 + $0x80] sm:$0xff]  ;;  %v514_v51 = vld [vmem:[%s3491_s13 + $0x90] sm:$0xff]  ;;  %v483_v52 = vld [vmem:[%s3486_s28 + $0x98] sm:$0xff] }
  0x28   : > { %v482_v53 = vld [vmem:[%s3486_s28 + $0x90] sm:$0xff]  ;;  %v517_v54 = vld [vmem:[%s3491_s13 + $0xa8] sm:$0xff]  ;;  %v516_v55 = vld [vmem:[%s3491_s13 + $0xa0] sm:$0xff] }
  0x29   : > { %743 = vperm.xlu1 %3306, %v497_v10   ;;  %740 = vperm.xlu0 %3305, %v496_v11   ;;  %v485_v56 = vld [vmem:[%s3486_s28 + $0xa8] sm:$0xff]  ;;  %v484_v57 = vld [vmem:[%s3486_s28 + $0xa0] sm:$0xff]  ;;  %v519_v58 = vld [vmem:[%s3491_s13 + $0xb8] sm:$0xff] }
  0x2a   : > { %3283 = vmatpush3.bf16.msra.mxu1 %v3538_v21  ;;  %3131 = vmatpush3.bf16.msra.mxu0 %v3538_v21  ;;  %v518_v59 = vld [vmem:[%s3491_s13 + $0xb0] sm:$0xff]  ;;  %v487_v60 = vld [vmem:[%s3486_s28 + $0xb8] sm:$0xff]  ;;  %v521_v62 = vld [vmem:[%s3491_s13 + $0xc8] sm:$0xff] }
  0x2b   : > { %3164 = vmatprep.subr.bf16.mxu1 %v3514_v15  ;;  %v486_v61 = vld [vmem:[%s3486_s28 + $0xb0] sm:$0xff]  ;;  %v520_v63 = vld [vmem:[%s3491_s13 + $0xc0] sm:$0xff]  ;;  %v523_v0 = vld [vmem:[%s3491_s13 + $0xd8] sm:$0xff] }
  0x2c   : > { %v522_v1 = vld [vmem:[%s3491_s13 + $0xd0] sm:$0xff]  ;;  %v525_v2 = vld [vmem:[%s3491_s13 + $0xe8] sm:$0xff]  ;;  %v524_v3 = vld [vmem:[%s3491_s13 + $0xe0] sm:$0xff] }
  0x2d   : > { %535 = vperm.xlu1 %3306, %v465_v12   ;;  %532 = vperm.xlu0 %3305, %v464_v13   ;;  %v527_v4 = vld [vmem:[%s3491_s13 + $0xf8] sm:$0xff]  ;;  %v526_v5 = vld [vmem:[%s3491_s13 + $0xf0] sm:$0xff]  ;;  %v3311_v10 = vld [vmem:[%s4141_s4 + $0x40] sm:$0xff]   ;;  %v3399_v13 = vmov 0.0  }
  0x2e   : > { %2896 = vmatprep.subr.bf16.mxu0 %v3311_v10 }
  0x31   : > { %749 = vperm.xlu1 %3306, %v499_v14   ;;  %746 = vperm.xlu0 %3305, %v498_v16  }
  0x35   : > { %541 = vperm.xlu1 %3306, %v467_v18   ;;  %538 = vperm.xlu0 %3305, %v466_v19  }
  0x39   : > { %755 = vperm.xlu1 %3306, %v501_v22   ;;  %752 = vperm.xlu0 %3305, %v500_v23  }
  0x3d   : > { %547 = vperm.xlu1 %3306, %v469_v24   ;;  %544 = vperm.xlu0 %3305, %v468_v25  }
  0x41   : > { %761 = vperm.xlu1 %3306, %v503_v26   ;;  %758 = vperm.xlu0 %3305, %v502_v27  }
  0x45   : > { %553 = vperm.xlu1 %3306, %v471_v28   ;;  %550 = vperm.xlu0 %3305, %v470_v29  }
  0x49   : > { %767 = vperm.xlu1 %3306, %v505_v30   ;;  %764 = vperm.xlu0 %3305, %v504_v31  }
  0x4d   : > { %559 = vperm.xlu1 %3306, %v473_v32   ;;  %556 = vperm.xlu0 %3305, %v472_v33  }
  0x51   : > { %773 = vperm.xlu1 %3306, %v507_v34   ;;  %770 = vperm.xlu0 %3305, %v506_v35  }
  0x55   : > { %565 = vperm.xlu1 %3306, %v475_v36   ;;  %562 = vperm.xlu0 %3305, %v474_v37  }
  0x59   : > { %779 = vperm.xlu1 %3306, %v509_v38   ;;  %776 = vperm.xlu0 %3305, %v508_v39  }
  0x5d   : > { %571 = vperm.xlu1 %3306, %v477_v40   ;;  %568 = vperm.xlu0 %3305, %v476_v41  }
  0x61   : > { %785 = vperm.xlu1 %3306, %v511_v42   ;;  %782 = vperm.xlu0 %3305, %v510_v43  }
  0x65   : > { %577 = vperm.xlu1 %3306, %v479_v44   ;;  %574 = vperm.xlu0 %3305, %v478_v45  }
  0x69   : > { %791 = vperm.xlu1 %3306, %v513_v46   ;;  %788 = vperm.xlu0 %3305, %v512_v47  }
  0x6d   : > { %583 = vperm.xlu1 %3306, %v481_v48   ;;  %580 = vperm.xlu0 %3305, %v480_v49  }
  0x71   : > { %797 = vperm.xlu1 %3306, %v515_v50   ;;  %794 = vperm.xlu0 %3305, %v514_v51  }
  0x75   : > { %589 = vperm.xlu1 %3306, %v483_v52   ;;  %586 = vperm.xlu0 %3305, %v482_v53   ;;  %v3312_v53 = vld [vmem:[%s4141_s4] sm:$0xff]  }
  0x79   : > { %803 = vperm.xlu1 %3306, %v517_v54   ;;  %800 = vperm.xlu0 %3305, %v516_v55   ;;  %v3313_v55 = vld [vmem:[%s4141_s4 + $0x48] sm:$0xff]  }
  0x7d   : > { %595 = vperm.xlu1 %3306, %v485_v56   ;;  %592 = vperm.xlu0 %3305, %v484_v57  }
  0x81   : > { %809 = vperm.xlu1 %3306, %v519_v58   ;;  %806 = vperm.xlu0 %3305, %v518_v59  }
  0x85   : > { %601 = vperm.xlu1 %3306, %v487_v60   ;;  %598 = vperm.xlu0 %3305, %v486_v61   ;;  %v3314_v60 = vld [vmem:[%s4141_s4 + $0x8] sm:$0xff]  }
  0x89   : > { %815 = vperm.xlu1 %3306, %v521_v62   ;;  %812 = vperm.xlu0 %3305, %v520_v63  }
  0x8d   : > { %821 = vperm.xlu1 %3306, %v523_v0   ;;  %818 = vperm.xlu0 %3305, %v522_v1  }
  0x91   : > { %827 = vperm.xlu1 %3306, %v525_v2   ;;  %824 = vperm.xlu0 %3305, %v524_v3  }
  0x95   : > { %833 = vperm.xlu1 %3306, %v527_v4   ;;  %830 = vperm.xlu0 %3305, %v526_v5  }
  0x98   : > { %v611_v8 = vpop.permute.xlu1 %610  ;;  %v605_v9 = vpop.permute.xlu0 %604 }
  0x99   : > { %vm653_vm0 = vcmp.eq.s32.totalorder %v3600_v7, %v611_v8  ;;  %vm651_vm1 = vcmp.eq.s32.totalorder %v3600_v7, %v605_v9 }
  0x9a   : > { %v2693_v14 = vsel %vm653_vm0, 1.0, %v3399_v13  ;;  %v2691_v16 = vsel %vm651_vm1, 1.0, %v3399_v13 }
  0x9c   : > { %v614_v11 = vpop.permute.xlu1 %613  ;;  %v608_v12 = vpop.permute.xlu0 %607 }
  0x9d   : > { %vm654_vm2 = vcmp.eq.s32.totalorder %v3600_v7, %v614_v11  ;;  %vm652_vm3 = vcmp.eq.s32.totalorder %v3600_v7, %v608_v12 }
  0x9e   : > { %v2694_v18 = vsel %vm654_vm2, 1.0, %v3399_v13  ;;  %v2692_v19 = vsel %vm652_vm3, 1.0, %v3399_v13 }
  0x9f   : > { %v736_v22 = vpack.c.bf16 %v2694_v18, %v2693_v14  ;;  %v735_v23 = vpack.c.bf16 %v2692_v19, %v2691_v16 }
  0xa0   : > { %v620_v24 = vpop.permute.xlu1 %619  ;;  %v617_v25 = vpop.permute.xlu0 %616 }
  0xa1   : > { %vm656_vm5 = vcmp.eq.s32.totalorder %v3600_v7, %v620_v24  ;;  %vm655_vm6 = vcmp.eq.s32.totalorder %v3600_v7, %v617_v25  ;;  %3156 = vmatprep.mubr.msk.bf16.mxu1 %vm1044_vm4, %v735_v23 }
  0xa2   : > { %v2696_v26 = vsel %vm656_vm5, 1.0, %v3399_v13  ;;  %v2695_v27 = vsel %vm655_vm6, 1.0, %v3399_v13  ;;  %3157 = vmatmul.mubr.msk.bf16.vlgmr.msra.gmra.mrb[0].mxu1 %vm1044_vm4, %v736_v22 }
  0xa3   : > { %v737_v28 = vpack.c.bf16 %v2696_v26, %v2695_v27  ;;  %3165 = vmatpush3.bf16.msra.mxu1 %v3514_v15 }
  0xa4   : > { %v626_v29 = vpop.permute.xlu1 %625  ;;  %v623_v30 = vpop.permute.xlu0 %622  ;;  %3166 = vmatprep.subr.bf16.mxu1 %v3521_v17 }
  0xa5   : > { %vm658_vm7 = vcmp.eq.s32.totalorder %v3600_v7, %v626_v29  ;;  %vm657_vm8 = vcmp.eq.s32.totalorder %v3600_v7, %v623_v30  ;;  %3160 = vmatprep.mubr.msk.bf16.mxu1 %vm1044_vm4, %v737_v28 }
  0xa6   : > { %v2698_v31 = vsel %vm658_vm7, 1.0, %v3399_v13  ;;  %v2697_v32 = vsel %vm657_vm8, 1.0, %v3399_v13 }
  0xa7   : > { %v738_v33 = vpack.c.bf16 %v2698_v31, %v2697_v32  ;;  %3167 = vmatpush3.bf16.msra.mxu1 %v3521_v17 }
  0xa8   : > { %v744_v34 = vpop.permute.xlu1 %743  ;;  %v741_v35 = vpop.permute.xlu0 %740  ;;  %3168 = vmatprep.subr.bf16.mxu1 %v3532_v20 }
  0xa9   : > { %vm836_vm9 = vcmp.eq.s32.totalorder %v3600_v7, %v744_v34  ;;  %vm835_vm10 = vcmp.eq.s32.totalorder %v3600_v7, %v741_v35 }
  0xaa   : > { %v2700_v36 = vsel %vm836_vm9, 1.0, %v3399_v13  ;;  %v2699_v37 = vsel %vm835_vm10, 1.0, %v3399_v13  ;;  %3161 = vmatmul.mubr.msk.bf16.gmra.mrb[4].mxu1 %vm1044_vm4, %v738_v33 }
  0xab   : > { %v931_v38 = vpack.c.bf16 %v2700_v36, %v2699_v37  ;;  %3169 = vmatpush3.bf16.msra.mxu1 %v3532_v20 }
  0xac   : > { %v536_v39 = vpop.permute.xlu1 %535  ;;  %v533_v40 = vpop.permute.xlu0 %532  ;;  %3170 = vmatprep.subr.bf16.mxu1 %v3538_v21 }
  0xad   : > { %vm628_vm11 = vcmp.eq.s32.totalorder %v3600_v7, %v536_v39  ;;  %vm627_vm12 = vcmp.eq.s32.totalorder %v3600_v7, %v533_v40  ;;  %3172 = vmatprep.mubr.msk.bf16.mxu1 %vm1044_vm4, %v931_v38 }
  0xae   : > { %v2668_v41 = vsel %vm628_vm11, 1.0, %v3399_v13  ;;  %v2667_v42 = vsel %vm627_vm12, 1.0, %v3399_v13 }
  0xaf   : > { %v723_v43 = vpack.c.bf16 %v2668_v41, %v2667_v42  ;;  %3171 = vmatpush3.bf16.msra.mxu1 %v3538_v21 }
  0xb0   : > { %v750_v44 = vpop.permute.xlu1 %749  ;;  %v747_v45 = vpop.permute.xlu0 %746 }
  0xb1   : > { %vm838_vm13 = vcmp.eq.s32.totalorder %v3600_v7, %v750_v44  ;;  %vm837_vm14 = vcmp.eq.s32.totalorder %v3600_v7, %v747_v45  ;;  %3132 = vmatprep.mubr.msk.bf16.mxu0 %vm1044_vm4, %v723_v43 }
  0xb2   : > { %v2702_v46 = vsel %vm838_vm13, 1.0, %v3399_v13  ;;  %v2701_v47 = vsel %vm837_vm14, 1.0, %v3399_v13 }
  0xb3   : > { %v932_v48 = vpack.c.bf16 %v2702_v46, %v2701_v47 }
  0xb4   : > { %v542_v49 = vpop.permute.xlu1 %541  ;;  %v539_v50 = vpop.permute.xlu0 %538 }
  0xb5   : > { %vm630_vm15 = vcmp.eq.s32.totalorder %v3600_v7, %v542_v49  ;;  %vm629_vm0 = vcmp.eq.s32.totalorder %v3600_v7, %v539_v50  ;;  %3173 = vmatmul.mubr.msk.bf16.vlgmr.msra.gmra.mrb[8].mxu1 %vm1044_vm4, %v932_v48 }
  0xb6   : > { %v2670_v51 = vsel %vm630_vm15, 1.0, %v3399_v13  ;;  %v2669_v52 = vsel %vm629_vm0, 1.0, %v3399_v13 }
  0xb7   : > { %v724_v54 = vpack.c.bf16 %v2670_v51, %v2669_v52 }
  0xb8   : > { %v756_v56 = vpop.permute.xlu1 %755  ;;  %v753_v57 = vpop.permute.xlu0 %752 }
  0xb9   : > { %vm840_vm1 = vcmp.eq.s32.totalorder %v3600_v7, %v756_v56  ;;  %vm839_vm2 = vcmp.eq.s32.totalorder %v3600_v7, %v753_v57  ;;  %3133 = vmatmul.mubr.msk.bf16.vlgmr.msra.gmra.mrb[0].mxu0 %vm1044_vm4, %v724_v54 }
  0xba   : > { %v2704_v58 = vsel %vm840_vm1, 1.0, %v3399_v13  ;;  %v2703_v59 = vsel %vm839_vm2, 1.0, %v3399_v13  ;;  %2897 = vmatpush3.bf16.msra.mxu0 %v3312_v53 }
  0xbb   : > { %v933_v61 = vpack.c.bf16 %v2704_v58, %v2703_v59  ;;  %2898 = vmatprep.subr.bf16.mxu0 %v3313_v55 }
  0xbc   : > { %v548_v62 = vpop.permute.xlu1 %547  ;;  %v545_v63 = vpop.permute.xlu0 %544 }
  0xbd   : > { %vm632_vm3 = vcmp.eq.s32.totalorder %v3600_v7, %v548_v62  ;;  %vm631_vm5 = vcmp.eq.s32.totalorder %v3600_v7, %v545_v63  ;;  %3176 = vmatprep.mubr.msk.bf16.mxu1 %vm1044_vm4, %v933_v61 }
  0xbe   : > { %v2672_v0 = vsel %vm632_vm3, 1.0, %v3399_v13  ;;  %v2671_v1 = vsel %vm631_vm5, 1.0, %v3399_v13  ;;  %2899 = vmatpush3.bf16.msra.mxu0 %v3314_v60 }
  0xbf   : > { %v725_v2 = vpack.c.bf16 %v2672_v0, %v2671_v1 }
  0xc0   : > { %v762_v3 = vpop.permute.xlu1 %761  ;;  %v759_v4 = vpop.permute.xlu0 %758 }
  0xc1   : > { %vm842_vm6 = vcmp.eq.s32.totalorder %v3600_v7, %v762_v3  ;;  %vm841_vm7 = vcmp.eq.s32.totalorder %v3600_v7, %v759_v4  ;;  %3136 = vmatprep.mubr.msk.bf16.mxu0 %vm1044_vm4, %v725_v2 }
  0xc2   : > { %v2706_v5 = vsel %vm842_vm6, 1.0, %v3399_v13  ;;  %v2705_v8 = vsel %vm841_vm7, 1.0, %v3399_v13 }
  0xc3   : > { %v934_v9 = vpack.c.bf16 %v2706_v5, %v2705_v8 }
  0xc4   : > { %v554_v10 = vpop.permute.xlu1 %553  ;;  %v551_v11 = vpop.permute.xlu0 %550 }
  0xc5   : > { %vm634_vm8 = vcmp.eq.s32.totalorder %v3600_v7, %v554_v10  ;;  %vm633_vm9 = vcmp.eq.s32.totalorder %v3600_v7, %v551_v11  ;;  %3177 = vmatmul.mubr.msk.bf16.gmra.mrb[12].mxu1 %vm1044_vm4, %v934_v9 }
  0xc6   : > { %v2674_v12 = vsel %vm634_vm8, 1.0, %v3399_v13  ;;  %v2673_v14 = vsel %vm633_vm9, 1.0, %v3399_v13 }
  0xc7   : > { %v726_v16 = vpack.c.bf16 %v2674_v12, %v2673_v14 }
  0xc8   : > { %v768_v18 = vpop.permute.xlu1 %767  ;;  %v765_v19 = vpop.permute.xlu0 %764 }
  0xc9   : > { %vm844_vm10 = vcmp.eq.s32.totalorder %v3600_v7, %v768_v18  ;;  %vm843_vm11 = vcmp.eq.s32.totalorder %v3600_v7, %v765_v19  ;;  %3137 = vmatmul.mubr.msk.bf16.gmra.mrb[4].mxu0 %vm1044_vm4, %v726_v16 }
  0xca   : > { %v2708_v22 = vsel %vm844_vm10, 1.0, %v3399_v13  ;;  %v2707_v23 = vsel %vm843_vm11, 1.0, %v3399_v13 }
  0xcb   : > { %v935_v24 = vpack.c.bf16 %v2708_v22, %v2707_v23  ;;  %v3315_v22 = vld [vmem:[%s4141_s4 + $0x50] sm:$0xff]  }
  0xcc   : > { %v560_v25 = vpop.permute.xlu1 %559  ;;  %v557_v26 = vpop.permute.xlu0 %556  ;;  %2900 = vmatprep.subr.bf16.mxu0 %v3315_v22 }
  0xcd   : > { %vm636_vm12 = vcmp.eq.s32.totalorder %v3600_v7, %v560_v25  ;;  %vm635_vm13 = vcmp.eq.s32.totalorder %v3600_v7, %v557_v26  ;;  %3180 = vmatprep.mubr.msk.bf16.mxu1 %vm1044_vm4, %v935_v24  ;;  %v3316_v26 = vld [vmem:[%s4141_s4 + $0x10] sm:$0xff]  }
  0xce   : > { %v2676_v27 = vsel %vm636_vm12, 1.0, %v3399_v13  ;;  %v2675_v28 = vsel %vm635_vm13, 1.0, %v3399_v13  ;;  %2901 = vmatpush3.bf16.msra.mxu0 %v3316_v26 }
  0xcf   : > { %v727_v29 = vpack.c.bf16 %v2676_v27, %v2675_v28  ;;  %v3317_v27 = vld [vmem:[%s4141_s4 + $0x58] sm:$0xff]  }
  0xd0   : > { %v774_v30 = vpop.permute.xlu1 %773  ;;  %v771_v31 = vpop.permute.xlu0 %770  ;;  %2902 = vmatprep.subr.bf16.mxu0 %v3317_v27 }
  0xd1   : > { %vm846_vm14 = vcmp.eq.s32.totalorder %v3600_v7, %v774_v30  ;;  %vm845_vm15 = vcmp.eq.s32.totalorder %v3600_v7, %v771_v31  ;;  %3140 = vmatprep.mubr.msk.bf16.mxu0 %vm1044_vm4, %v727_v29 }
  0xd2   : > { %v2710_v32 = vsel %vm846_vm14, 1.0, %v3399_v13  ;;  %v2709_v33 = vsel %vm845_vm15, 1.0, %v3399_v13 }
  0xd3   : > { %v936_v34 = vpack.c.bf16 %v2710_v32, %v2709_v33  ;;  %v3318_v33 = vld [vmem:[%s4141_s4 + $0x18] sm:$0xff]  }
  0xd4   : > { %v566_v35 = vpop.permute.xlu1 %565  ;;  %v563_v36 = vpop.permute.xlu0 %562  ;;  %2903 = vmatpush3.bf16.msra.mxu0 %v3318_v33 }
  0xd5   : > { %vm638_vm0 = vcmp.eq.s32.totalorder %v3600_v7, %v566_v35  ;;  %vm637_vm1 = vcmp.eq.s32.totalorder %v3600_v7, %v563_v36  ;;  %3181 = vmatmul.mubr.msk.bf16.gmra.mrb[16].mxu1 %vm1044_vm4, %v936_v34 }
  0xd6   : > { %v2678_v37 = vsel %vm638_vm0, 1.0, %v3399_v13  ;;  %v2677_v38 = vsel %vm637_vm1, 1.0, %v3399_v13 }
  0xd7   : > { %v728_v39 = vpack.c.bf16 %v2678_v37, %v2677_v38 }
  0xd8   : > { %v780_v40 = vpop.permute.xlu1 %779  ;;  %v777_v41 = vpop.permute.xlu0 %776 }
  0xd9   : > { %vm848_vm2 = vcmp.eq.s32.totalorder %v3600_v7, %v780_v40  ;;  %vm847_vm3 = vcmp.eq.s32.totalorder %v3600_v7, %v777_v41  ;;  %3141 = vmatmul.mubr.msk.bf16.gmra.mrb[8].mxu0 %vm1044_vm4, %v728_v39  ;;  %v3319_v39 = vld [vmem:[%s4141_s4 + $0x60] sm:$0xff]   ;;  %v3321_v41 = vld [vmem:[%s4141_s4 + $0x68] sm:$0xff]  }
  0xda   : > { %v2712_v42 = vsel %vm848_vm2, 1.0, %v3399_v13  ;;  %v2711_v43 = vsel %vm847_vm3, 1.0, %v3399_v13  ;;  %v3320_v40 = vld [vmem:[%s4141_s4 + $0x20] sm:$0xff]   ;;  %2904 = vmatprep.subr.bf16.mxu0 %v3319_v39  ;;  %v3329_v39 = vld [vmem:[%s4143_s6 + $0x10] sm:$0xff]  }
  0xdb   : > { %v937_v44 = vpack.c.bf16 %v2712_v42, %v2711_v43  ;;  %2905 = vmatpush3.bf16.msra.mxu0 %v3320_v40 }
  0xdc   : > { %v572_v45 = vpop.permute.xlu1 %571  ;;  %v569_v46 = vpop.permute.xlu0 %568  ;;  %2906 = vmatprep.subr.bf16.mxu0 %v3321_v41 }
  0xdd   : > { %vm640_vm5 = vcmp.eq.s32.totalorder %v3600_v7, %v572_v45  ;;  %vm639_vm6 = vcmp.eq.s32.totalorder %v3600_v7, %v569_v46  ;;  %3184 = vmatprep.mubr.msk.bf16.mxu1 %vm1044_vm4, %v937_v44  ;;  %v3322_v45 = vld [vmem:[%s4141_s4 + $0x28] sm:$0xff]  }
  0xde   : > { %v2680_v47 = vsel %vm640_vm5, 1.0, %v3399_v13  ;;  %v2679_v48 = vsel %vm639_vm6, 1.0, %v3399_v13 }
  0xdf   : > { %v729_v49 = vpack.c.bf16 %v2680_v47, %v2679_v48  ;;  %2907 = vmatpush3.bf16.msra.mxu0 %v3322_v45 }
  0xe0   : > { %v786_v50 = vpop.permute.xlu1 %785  ;;  %v783_v51 = vpop.permute.xlu0 %782 }
  0xe1   : > { %vm850_vm7 = vcmp.eq.s32.totalorder %v3600_v7, %v786_v50  ;;  %vm849_vm8 = vcmp.eq.s32.totalorder %v3600_v7, %v783_v51  ;;  %3144 = vmatprep.mubr.msk.bf16.mxu0 %vm1044_vm4, %v729_v49 }
  0xe2   : > { %v2714_v52 = vsel %vm850_vm7, 1.0, %v3399_v13  ;;  %v2713_v53 = vsel %vm849_vm8, 1.0, %v3399_v13 }
  0xe3   : > { %v938_v54 = vpack.c.bf16 %v2714_v52, %v2713_v53  ;;  %v3323_v53 = vld [vmem:[%s4141_s4 + $0x70] sm:$0xff]  }
  0xe4   : > { %v578_v55 = vpop.permute.xlu1 %577  ;;  %v575_v56 = vpop.permute.xlu0 %574  ;;  %2908 = vmatprep.subr.bf16.mxu0 %v3323_v53 }
  0xe5   : > { %vm642_vm9 = vcmp.eq.s32.totalorder %v3600_v7, %v578_v55  ;;  %vm641_vm10 = vcmp.eq.s32.totalorder %v3600_v7, %v575_v56  ;;  %3185 = vmatmul.mubr.msk.bf16.gmra.mrb[20].mxu1 %vm1044_vm4, %v938_v54  ;;  %v3324_v54 = vld [vmem:[%s4141_s4 + $0x30] sm:$0xff]  }
  0xe6   : > { %v2682_v57 = vsel %vm642_vm9, 1.0, %v3399_v13  ;;  %v2681_v58 = vsel %vm641_vm10, 1.0, %v3399_v13  ;;  %2909 = vmatpush3.bf16.msra.mxu0 %v3324_v54 }
  0xe7   : > { %v730_v59 = vpack.c.bf16 %v2682_v57, %v2681_v58 }
  0xe8   : > { %v792_v60 = vpop.permute.xlu1 %791  ;;  %v789_v61 = vpop.permute.xlu0 %788 }
  0xe9   : > { %vm852_vm11 = vcmp.eq.s32.totalorder %v3600_v7, %v792_v60  ;;  %vm851_vm12 = vcmp.eq.s32.totalorder %v3600_v7, %v789_v61  ;;  %3145 = vmatmul.mubr.msk.bf16.gmra.mrb[12].mxu0 %vm1044_vm4, %v730_v59  ;;  %v3325_v60 = vld [vmem:[%s4141_s4 + $0x78] sm:$0xff]  }
  0xea   : > { %v2716_v62 = vsel %vm852_vm11, 1.0, %v3399_v13  ;;  %v2715_v63 = vsel %vm851_vm12, 1.0, %v3399_v13  ;;  %v3326_v61 = vld [vmem:[%s4141_s4 + $0x38] sm:$0xff]   ;;  %2910 = vmatprep.subr.bf16.mxu0 %v3325_v60 }
  0xeb   : > { %v939_v0 = vpack.c.bf16 %v2716_v62, %v2715_v63  ;;  %2911 = vmatpush3.bf16.msra.mxu0 %v3326_v61 }
  0xec   : > { %v584_v1 = vpop.permute.xlu1 %583  ;;  %v581_v2 = vpop.permute.xlu0 %580 }
  0xed   : > { %vm644_vm13 = vcmp.eq.s32.totalorder %v3600_v7, %v584_v1  ;;  %vm643_vm14 = vcmp.eq.s32.totalorder %v3600_v7, %v581_v2  ;;  %3188 = vmatprep.mubr.msk.bf16.mxu1 %vm1044_vm4, %v939_v0 }
  0xee   : > { %v2684_v3 = vsel %vm644_vm13, 1.0, %v3399_v13  ;;  %v2683_v4 = vsel %vm643_vm14, 1.0, %v3399_v13 }
  0xef   : > { %v731_v5 = vpack.c.bf16 %v2684_v3, %v2683_v4 }
  0xf0   : > { %v798_v8 = vpop.permute.xlu1 %797  ;;  %v795_v9 = vpop.permute.xlu0 %794 }
  0xf1   : > { %vm854_vm15 = vcmp.eq.s32.totalorder %v3600_v7, %v798_v8  ;;  %vm853_vm0 = vcmp.eq.s32.totalorder %v3600_v7, %v795_v9  ;;  %3148 = vmatprep.mubr.msk.bf16.mxu0 %vm1044_vm4, %v731_v5 }
  0xf2   : > { %v2718_v10 = vsel %vm854_vm15, 1.0, %v3399_v13  ;;  %v2717_v11 = vsel %vm853_vm0, 1.0, %v3399_v13 }
  0xf3   : > { %v940_v12 = vpack.c.bf16 %v2718_v10, %v2717_v11 }
  0xf4   : > { %v590_v14 = vpop.permute.xlu1 %589  ;;  %v587_v16 = vpop.permute.xlu0 %586 }
  0xf5   : > { %vm646_vm1 = vcmp.eq.s32.totalorder %v3600_v7, %v590_v14  ;;  %vm645_vm2 = vcmp.eq.s32.totalorder %v3600_v7, %v587_v16  ;;  %3189 = vmatmul.mubr.msk.bf16.gmra.mrb[24].mxu1 %vm1044_vm4, %v940_v12 }
  0xf6   : > { %v2686_v18 = vsel %vm646_vm1, 1.0, %v3399_v13  ;;  %v2685_v19 = vsel %vm645_vm2, 1.0, %v3399_v13 }
  0xf7   : > { %v732_v23 = vpack.c.bf16 %v2686_v18, %v2685_v19 }
  0xf8   : > { %v804_v24 = vpop.permute.xlu1 %803  ;;  %v801_v25 = vpop.permute.xlu0 %800 }
  0xf9   : > { %vm856_vm3 = vcmp.eq.s32.totalorder %v3600_v7, %v804_v24  ;;  %vm855_vm5 = vcmp.eq.s32.totalorder %v3600_v7, %v801_v25  ;;  %3149 = vmatmul.mubr.msk.bf16.gmra.mrb[16].mxu0 %vm1044_vm4, %v732_v23 }
  0xfa   : > { %v2720_v28 = vsel %vm856_vm3, 1.0, %v3399_v13  ;;  %v2719_v29 = vsel %vm855_vm5, 1.0, %v3399_v13 }
  0xfb   : > { %v941_v30 = vpack.c.bf16 %v2720_v28, %v2719_v29 }
  0xfc   : > { %v596_v31 = vpop.permute.xlu1 %595  ;;  %v593_v32 = vpop.permute.xlu0 %592 }
  0xfd   : > { %vm648_vm6 = vcmp.eq.s32.totalorder %v3600_v7, %v596_v31  ;;  %vm647_vm7 = vcmp.eq.s32.totalorder %v3600_v7, %v593_v32  ;;  %3192 = vmatprep.mubr.msk.bf16.mxu1 %vm1044_vm4, %v941_v30  ;;  %v3327_v31 = vld [vmem:[%s4143_s6] sm:$0xff]   ;;  %v3328_v32 = vld [vmem:[%s4143_s6 + $0x8] sm:$0xff]  }
  0xfe   : > { %v2688_v34 = vsel %vm648_vm6, 1.0, %v3399_v13  ;;  %v2687_v35 = vsel %vm647_vm7, 1.0, %v3399_v13  ;;  %3204 = vmatprep.subr.bf16.mxu1 %v3327_v31 }
  0xff   : > { %v733_v36 = vpack.c.bf16 %v2688_v34, %v2687_v35  ;;  %3205 = vmatpush3.bf16.msra.mxu1 %v3327_v31 }
 0x100   : > { %v810_v37 = vpop.permute.xlu1 %809  ;;  %v807_v38 = vpop.permute.xlu0 %806  ;;  %3206 = vmatprep.subr.bf16.mxu1 %v3328_v32 }
 0x101   : > { %vm858_vm8 = vcmp.eq.s32.totalorder %v3600_v7, %v810_v37  ;;  %vm857_vm9 = vcmp.eq.s32.totalorder %v3600_v7, %v807_v38  ;;  %3152 = vmatprep.mubr.msk.bf16.mxu0 %vm1044_vm4, %v733_v36 }
 0x102   : > { %v2722_v42 = vsel %vm858_vm8, 1.0, %v3399_v13  ;;  %v2721_v43 = vsel %vm857_vm9, 1.0, %v3399_v13 }
 0x103   : > { %v942_v44 = vpack.c.bf16 %v2722_v42, %v2721_v43  ;;  %3207 = vmatpush3.bf16.msra.mxu1 %v3328_v32 }
 0x104   : > { %v602_v46 = vpop.permute.xlu1 %601  ;;  %v599_v47 = vpop.permute.xlu0 %598  ;;  %3208 = vmatprep.subr.bf16.mxu1 %v3329_v39 }
 0x105   : > { %vm650_vm10 = vcmp.eq.s32.totalorder %v3600_v7, %v602_v46  ;;  %vm649_vm11 = vcmp.eq.s32.totalorder %v3600_v7, %v599_v47  ;;  %3193 = vmatmul.mubr.msk.bf16.gmra.mrb[28].mxu1 %vm1044_vm4, %v942_v44 }
 0x106   : > { %v2690_v48 = vsel %vm650_vm10, 1.0, %v3399_v13  ;;  %v2689_v49 = vsel %vm649_vm11, 1.0, %v3399_v13 }
 0x107   : > { %v734_v50 = vpack.c.bf16 %v2690_v48, %v2689_v49  ;;  %3209 = vmatpush3.bf16.msra.mxu1 %v3329_v39 }
 0x108   : > { %v816_v51 = vpop.permute.xlu1 %815  ;;  %v813_v52 = vpop.permute.xlu0 %812 }
 0x109   : > { %vm860_vm12 = vcmp.eq.s32.totalorder %v3600_v7, %v816_v51  ;;  %vm859_vm13 = vcmp.eq.s32.totalorder %v3600_v7, %v813_v52  ;;  %3153 = vmatmul.mubr.msk.bf16.gmra.mrb[20].mxu0 %vm1044_vm4, %v734_v50 }
 0x10a   : > { %v2724_v55 = vsel %vm860_vm12, 1.0, %v3399_v13  ;;  %v2723_v56 = vsel %vm859_vm13, 1.0, %v3399_v13 }
 0x10b   : > { %v943_v57 = vpack.c.bf16 %v2724_v55, %v2723_v56 }
 0x10c   : > { %v822_v58 = vpop.permute.xlu1 %821  ;;  %v819_v59 = vpop.permute.xlu0 %818 }
 0x10d   : > { %vm862_vm14 = vcmp.eq.s32.totalorder %v3600_v7, %v822_v58  ;;  %vm861_vm15 = vcmp.eq.s32.totalorder %v3600_v7, %v819_v59  ;;  %3196 = vmatprep.mubr.msk.bf16.mxu1 %vm1044_vm4, %v943_v57 }
 0x10e   : > { %v2726_v62 = vsel %vm862_vm14, 1.0, %v3399_v13  ;;  %v2725_v63 = vsel %vm861_vm15, 1.0, %v3399_v13 }
 0x10f   : > { %v944_v0 = vpack.c.bf16 %v2726_v62, %v2725_v63 }
 0x110   : > { %v828_v1 = vpop.permute.xlu1 %827  ;;  %v825_v2 = vpop.permute.xlu0 %824 }
 0x111   : > { %vm864_vm0 = vcmp.eq.s32.totalorder %v3600_v7, %v828_v1  ;;  %vm863_vm1 = vcmp.eq.s32.totalorder %v3600_v7, %v825_v2  ;;  %3197 = vmatmul.mubr.msk.bf16.gmra.mrb[32].mxu1 %vm1044_vm4, %v944_v0 }
 0x112   : > { %v2728_v3 = vsel %vm864_vm0, 1.0, %v3399_v13  ;;  %v2727_v4 = vsel %vm863_vm1, 1.0, %v3399_v13 }
 0x113   : > { %v945_v5 = vpack.c.bf16 %v2728_v3, %v2727_v4 }
 0x114   : > { %v834_v8 = vpop.permute.xlu1 %833  ;;  %v831_v9 = vpop.permute.xlu0 %830 }
 0x115   : > { %vm866_vm2 = vcmp.eq.s32.totalorder %v3600_v7, %v834_v8  ;;  %vm865_vm3 = vcmp.eq.s32.totalorder %v3600_v7, %v831_v9  ;;  %3200 = vmatprep.mubr.msk.bf16.mxu1 %vm1044_vm4, %v945_v5 }
 0x116   : > { %v2730_v10 = vsel %vm866_vm2, 1.0, %v3399_v13  ;;  %v2729_v11 = vsel %vm865_vm3, 1.0, %v3399_v13 }
 0x117   : > { %v946_v12 = vpack.c.bf16 %v2730_v10, %v2729_v11 }
 0x119   : > { %3201 = vmatmul.mubr.msk.bf16.gmra.mrb[36].mxu1 %vm1044_vm4, %v946_v12 }
 0x175   : > { %v3817_v14 = vpop.f32.mrb[0].mxu1 }
 0x176   : > { %v3819_v16 = vpop.f32.mrb[1].mxu1 }
 0x177   : > { %v3821_v18 = vpop.f32.mrb[2].mxu1 }
 0x178   : > { %v1267_v19 = vpack.c.bf16 %v3821_v18, %v3817_v14  ;;  %v3825_v22 = vpop.f32.mrb[3].mxu1 }
 0x179   : > { %v1266_v7 = vpack.c.bf16 %v3825_v22, %v3819_v16  ;;  %v3880_v22 = vld [vmem:[%s4142_s5] ss:$0 sm:$0xff] }
 0x17d   : > { %v3829_v23 = vpop.f32.mrb[4].mxu1 }
 0x17e   : > { %v3831_v13 = vpop.f32.mrb[5].mxu1 }
 0x17f   : > { %v3833_v24 = vpop.f32.mrb[6].mxu1 }
 0x180   : > { %v1269_v25 = vpack.c.bf16 %v3833_v24, %v3829_v23  ;;  %v3837_v26 = vpop.f32.mrb[7].mxu1 }
 0x181   : > { %v1268_v27 = vpack.c.bf16 %v3837_v26, %v3831_v13 }
 0x188   : > { %v3174_v28 = vpop.f32.mrb[8].mxu1 }
 0x189   : > { %v1352_v29 = vpop.f32.mrb[9].mxu1 }
 0x18a   : > { %v3175_v30 = vpop.f32.mrb[10].mxu1 }
 0x18b   : > { %v1480_v33 = vpack.c.bf16 %v3175_v30, %v3174_v28  ;;  %v1355_v34 = vpop.f32.mrb[11].mxu1 }
 0x18c   : > { %v1479_v35 = vpack.c.bf16 %v1355_v34, %v1352_v29  ;;  %v3134_v36 = vpop.f32.mrb[0].mxu0 }
 0x18d   : > { %v1127_v37 = vpop.f32.mrb[1].mxu0 }
 0x18e   : > { %v3135_v38 = vpop.f32.mrb[2].mxu0  ;;  %1662 = vmatprep.mubr.bf16.mxu0 %v1479_v35 }
 0x18f   : > { %v1255_v40 = vpack.c.bf16 %v3135_v38, %v3134_v36  ;;  %v1130_v41 = vpop.f32.mrb[3].mxu0 }
 0x190   : > { %v1254_v42 = vpack.c.bf16 %v1130_v41, %v1127_v37 }
 0x192   : > { %1663 = vmatmul.mubr.bf16.vlgmr.msra.gmra.mrb[24].mxu0 %v1254_v42 }
 0x193   : > { %1670 = vmatprep.mubr.bf16.mxu0 %v1480_v33 }
 0x198   : > { %v3178_v43 = vpop.f32.mrb[12].mxu1 }
 0x199   : > { %v1368_v44 = vpop.f32.mrb[13].mxu1 }
 0x19a   : > { %v3179_v45 = vpop.f32.mrb[14].mxu1  ;;  %1671 = vmatmul.mubr.bf16.gmra.mrb[28].mxu0 %v1255_v40 }
 0x19b   : > { %v1482_v46 = vpack.c.bf16 %v3179_v45, %v3178_v43  ;;  %v1371_v47 = vpop.f32.mrb[15].mxu1 }
 0x19c   : > { %v1481_v48 = vpack.c.bf16 %v1371_v47, %v1368_v44  ;;  %v3138_v49 = vpop.f32.mrb[4].mxu0 }
 0x19d   : > { %v1143_v50 = vpop.f32.mrb[5].mxu0 }
 0x19e   : > { %v3139_v51 = vpop.f32.mrb[6].mxu0  ;;  %1678 = vmatprep.mubr.bf16.mxu0 %v1481_v48 }
 0x19f   : > { %v1257_v52 = vpack.c.bf16 %v3139_v51, %v3138_v49  ;;  %v1146_v53 = vpop.f32.mrb[7].mxu0 }
 0x1a0   : > { %v1256_v54 = vpack.c.bf16 %v1146_v53, %v1143_v50 }
 0x1a2   : > { %1679 = vmatmul.mubr.bf16.gmra.mrb[32].mxu0 %v1256_v54 }
 0x1a3   : > { %1686 = vmatprep.mubr.bf16.mxu0 %v1482_v46 }
 0x1a8   : > { %v3182_v55 = vpop.f32.mrb[16].mxu1 }
 0x1a9   : > { %v1384_v56 = vpop.f32.mrb[17].mxu1 }
 0x1aa   : > { %v3183_v57 = vpop.f32.mrb[18].mxu1  ;;  %1687 = vmatmul.mubr.bf16.gmra.mrb[36].mxu0 %v1257_v52 }
 0x1ab   : > { %v1484_v58 = vpack.c.bf16 %v3183_v57, %v3182_v55  ;;  %v1387_v59 = vpop.f32.mrb[19].mxu1 }
 0x1ac   : > { %v1483_v60 = vpack.c.bf16 %v1387_v59, %v1384_v56  ;;  %v3142_v61 = vpop.f32.mrb[8].mxu0  ;;  %v3330_v56 = vld [vmem:[%s4143_s6 + $0x18] sm:$0xff]  }
 0x1ad   : > { %v1159_v62 = vpop.f32.mrb[9].mxu0  ;;  %3210 = vmatprep.subr.bf16.mxu1 %v3330_v56 }
 0x1ae   : > { %v3143_v63 = vpop.f32.mrb[10].mxu0  ;;  %1694 = vmatprep.mubr.bf16.mxu0 %v1483_v60  ;;  %3211 = vmatpush3.bf16.msra.mxu1 %v3330_v56 }
 0x1af   : > { %v1259_v0 = vpack.c.bf16 %v3143_v63, %v3142_v61  ;;  %v1162_v1 = vpop.f32.mrb[11].mxu0 }
 0x1b0   : > { %v1258_v2 = vpack.c.bf16 %v1162_v1, %v1159_v62  ;;  %v3331_v62 = vld [vmem:[%s4143_s6 + $0x20] sm:$0xff]  }
 0x1b1   : > { %3212 = vmatprep.subr.bf16.mxu1 %v3331_v62 }
 0x1b2   : > { %1695 = vmatmul.mubr.bf16.gmra.mrb[40].mxu0 %v1258_v2  ;;  %3213 = vmatpush3.bf16.msra.mxu1 %v3331_v62 }
 0x1b3   : > { %1702 = vmatprep.mubr.bf16.mxu0 %v1484_v58 }
 0x1b8   : > { %v3186_v3 = vpop.f32.mrb[20].mxu1 }
 0x1b9   : > { %v1400_v4 = vpop.f32.mrb[21].mxu1 }
 0x1ba   : > { %v3187_v5 = vpop.f32.mrb[22].mxu1  ;;  %1703 = vmatmul.mubr.bf16.gmra.mrb[44].mxu0 %v1259_v0  ;;  %v3332_v0 = vld [vmem:[%s4143_s6 + $0x28] sm:$0xff]  }
 0x1bb   : > { %v1486_v8 = vpack.c.bf16 %v3187_v5, %v3186_v3  ;;  %v1403_v9 = vpop.f32.mrb[23].mxu1  ;;  %3214 = vmatprep.subr.bf16.mxu1 %v3332_v0 }
 0x1bc   : > { %v1485_v10 = vpack.c.bf16 %v1403_v9, %v1400_v4  ;;  %v3146_v11 = vpop.f32.mrb[12].mxu0  ;;  %3215 = vmatpush3.bf16.msra.mxu1 %v3332_v0 }
 0x1bd   : > { %v1175_v12 = vpop.f32.mrb[13].mxu0 }
 0x1be   : > { %v3147_v28 = vpop.f32.mrb[14].mxu0  ;;  %1710 = vmatprep.mubr.bf16.mxu0 %v1485_v10  ;;  %v3334_v10 = vld [vmem:[%s4143_s6 + $0x38] sm:$0xff]  }
 0x1bf   : > { %v1261_v29 = vpack.c.bf16 %v3147_v28, %v3146_v11  ;;  %v1178_v30 = vpop.f32.mrb[15].mxu0 }
 0x1c0   : > { %v1260_v31 = vpack.c.bf16 %v1178_v30, %v1175_v12 }
 0x1c2   : > { %1711 = vmatmul.mubr.bf16.gmra.mrb[48].mxu0 %v1260_v31 }
 0x1c3   : > { %1718 = vmatprep.mubr.bf16.mxu0 %v1486_v8  ;;  %v3333_v8 = vld [vmem:[%s4143_s6 + $0x30] sm:$0xff]  }
 0x1c4   : > { %3216 = vmatprep.subr.bf16.mxu1 %v3333_v8 }
 0x1c5   : > { %3217 = vmatpush3.bf16.msra.mxu1 %v3333_v8 }
 0x1c6   : > { %3218 = vmatprep.subr.bf16.mxu1 %v3334_v10 }
 0x1c8   : > { %v3190_v32 = vpop.f32.mrb[24].mxu1 }
 0x1c9   : > { %v1416_v33 = vpop.f32.mrb[25].mxu1  ;;  %3219 = vmatpush3.bf16.msra.mxu1 %v3334_v10 }
 0x1ca   : > { %v3191_v34 = vpop.f32.mrb[26].mxu1  ;;  %1719 = vmatmul.mubr.bf16.gmra.mrb[52].mxu0 %v1261_v29 }
 0x1cb   : > { %v1488_v35 = vpack.c.bf16 %v3191_v34, %v3190_v32  ;;  %v1419_v36 = vpop.f32.mrb[27].mxu1 }
 0x1cc   : > { %v1487_v37 = vpack.c.bf16 %v1419_v36, %v1416_v33  ;;  %v3150_v38 = vpop.f32.mrb[16].mxu0 }
 0x1cd   : > { %v1191_v39 = vpop.f32.mrb[17].mxu0 }
 0x1ce   : > { %v3151_v40 = vpop.f32.mrb[18].mxu0  ;;  %1726 = vmatprep.mubr.bf16.mxu0 %v1487_v37 }
 0x1cf   : > { %v1263_v41 = vpack.c.bf16 %v3151_v40, %v3150_v38  ;;  %v1194_v42 = vpop.f32.mrb[19].mxu0 }
 0x1d0   : > { %v1262_v43 = vpack.c.bf16 %v1194_v42, %v1191_v39 }
 0x1d2   : > { %1727 = vmatmul.mubr.bf16.gmra.mrb[56].mxu0 %v1262_v43 }
 0x1d3   : > { %1734 = vmatprep.mubr.bf16.mxu0 %v1488_v35 }
 0x1d8   : > { %v3194_v44 = vpop.f32.mrb[28].mxu1 }
 0x1d9   : > { %v1432_v45 = vpop.f32.mrb[29].mxu1 }
 0x1da   : > { %v3195_v46 = vpop.f32.mrb[30].mxu1  ;;  %1735 = vmatmul.mubr.bf16.gmra.mrb[60].mxu0 %v1263_v41 }
 0x1db   : > { %v1490_v47 = vpack.c.bf16 %v3195_v46, %v3194_v44  ;;  %v1435_v48 = vpop.f32.mrb[31].mxu1 }
 0x1dc   : > { %v1489_v49 = vpack.c.bf16 %v1435_v48, %v1432_v45  ;;  %v3154_v50 = vpop.f32.mrb[20].mxu0 }
 0x1dd   : > { %v1207_v51 = vpop.f32.mrb[21].mxu0 }
 0x1de   : > { %v3155_v52 = vpop.f32.mrb[22].mxu0  ;;  %1742 = vmatprep.mubr.bf16.mxu0 %v1489_v49 }
 0x1df   : > { %v1265_v53 = vpack.c.bf16 %v3155_v52, %v3154_v50  ;;  %v1210_v54 = vpop.f32.mrb[23].mxu0 }
 0x1e0   : > { %v1264_v55 = vpack.c.bf16 %v1210_v54, %v1207_v51 }
 0x1e2   : > { %1743 = vmatmul.mubr.bf16.gmra.mrb[64].mxu0 %v1264_v55 }
 0x1e3   : > { %1750 = vmatprep.mubr.bf16.mxu0 %v1490_v47 }
 0x1e4   : > { %v3198_v57 = vpop.f32.mrb[32].mxu1 }
 0x1e5   : > { %v1448_v58 = vpop.f32.mrb[33].mxu1 }
 0x1e6   : > { %v3199_v59 = vpop.f32.mrb[34].mxu1 }
 0x1e7   : > { %v1492_v60 = vpack.c.bf16 %v3199_v59, %v3198_v57  ;;  %v1451_v61 = vpop.f32.mrb[35].mxu1 }
 0x1e8   : > { %v1491_v63 = vpack.c.bf16 %v1451_v61, %v1448_v58 }
 0x1ea   : > { %1751 = vmatmul.mubr.bf16.gmra.mrb[68].mxu0 %v1265_v53 }
 0x1eb   : > { %1758 = vmatprep.mubr.bf16.mxu0 %v1491_v63 }
 0x1ec   : > { %v3202_v1 = vpop.f32.mrb[36].mxu1 }
 0x1ed   : > { %v1464_v2 = vpop.f32.mrb[37].mxu1 }
 0x1ee   : > { %v3203_v3 = vpop.f32.mrb[38].mxu1 }
 0x1ef   : > { %v1494_v4 = vpack.c.bf16 %v3203_v3, %v3202_v1  ;;  %v1467_v5 = vpop.f32.mrb[39].mxu1 }
 0x1f0   : > { %v1493_v9 = vpack.c.bf16 %v1467_v5, %v1464_v2 }
 0x1f2   : > { %1759 = vmatmul.mubr.bf16.gmra.mrb[72].mxu0 %v1266_v7 }
 0x1f3   : > { %1766 = vmatprep.mubr.bf16.mxu0 %v1492_v60 }
 0x1fa   : > { %1767 = vmatmul.mubr.bf16.gmra.mrb[76].mxu0 %v1267_v19 }
 0x1fb   : > { %1774 = vmatprep.mubr.bf16.mxu0 %v1493_v9 }
 0x202   : > { %1775 = vmatmul.mubr.bf16.gmra.mrb[80].mxu0 %v1268_v27 }
 0x203   : > { %1782 = vmatprep.mubr.bf16.mxu0 %v1494_v4 }
 0x20a   : > { %1783 = vmatmul.mubr.bf16.gmra.mrb[84].mxu0 %v1269_v25 }
 0x20b   : > { %2391 = vmatprep.mubr.bf16.mxu0 (!%p2825_p6), %v3514_v15  ;;  %v3340_v15 = vld [vmem:[%s4145_s8 + $0x10] sm:$0xff] (!%p2825_p6)  }
 0x265   : > { %v2912_v16 = vpop.f32.mrb[24].mxu0 }
 0x266   : > { %v2913_v7 = vpop.f32.mrb[25].mxu0 }
 0x267   : > { %v2914_v11 = vadd.f32 %v2913_v7, %v2912_v16  ;;  %v2915_v14 = vpop.f32.mrb[26].mxu0 }
 0x268   : > { %v2916_v18 = vpop.f32.mrb[27].mxu0 }
 0x269   : > { %v1665_v19 = vadd.f32 %v2914_v11, %v3880_v22  ;;  %v2917_v12 = vadd.f32 %v2916_v18, %v2915_v14 }
 0x26b   : > { %v1668_v13 = vadd.f32 %v2917_v12, %v3880_v22  ;;  %v1791_v26 = vmax.f32 %v1665_v19, 0.0 }
 0x26d   : > { %v1792_v27 = vmax.f32 %v1668_v13, 0.0  ;;  %v2918_v28 = vpop.f32.mrb[28].mxu0 }
 0x26e   : > { %v2919_v23 = vpop.f32.mrb[29].mxu0 }
 0x26f   : > { %v2920_v24 = vadd.f32 %v2919_v23, %v2918_v28  ;;  %v2921_v25 = vpop.f32.mrb[30].mxu0  ;;  %v1823_v29 = vpack.c.bf16 %v1792_v27, %v1791_v26 }
 0x270   : > { %v2922_v30 = vpop.f32.mrb[31].mxu0 }
 0x271   : > { %v1673_v31 = vadd.f32 %v2920_v24, %v3880_v22  ;;  %v2923_v32 = vadd.f32 %v2922_v30, %v2921_v25  ;;  %3220 = vmatprep.mubr.bf16.mxu1 %v1823_v29 }
 0x273   : > { %v1676_v33 = vadd.f32 %v2923_v32, %v3880_v22  ;;  %v1793_v34 = vmax.f32 %v1673_v31, 0.0 }
 0x275   : > { %v1794_v35 = vmax.f32 %v1676_v33, 0.0  ;;  %v2924_v36 = vpop.f32.mrb[32].mxu0 }
 0x276   : > { %v2925_v37 = vpop.f32.mrb[33].mxu0 }
 0x277   : > { %v1824_v38 = vpack.c.bf16 %v1794_v35, %v1793_v34  ;;  %v2926_v39 = vadd.f32 %v2925_v37, %v2924_v36  ;;  %v2927_v40 = vpop.f32.mrb[34].mxu0 }
 0x278   : > { %v2928_v41 = vpop.f32.mrb[35].mxu0 }
 0x279   : > { %v1681_v42 = vadd.f32 %v2926_v39, %v3880_v22  ;;  %v2929_v43 = vadd.f32 %v2928_v41, %v2927_v40  ;;  %3221 = vmatmul.mubr.bf16.vlgmr.msra.gmra.mrb[40].mxu1 %v1824_v38 }
 0x27b   : > { %v1684_v44 = vadd.f32 %v2929_v43, %v3880_v22  ;;  %v1795_v45 = vmax.f32 %v1681_v42, 0.0 }
 0x27d   : > { %v1796_v46 = vmax.f32 %v1684_v44, 0.0  ;;  %v2930_v47 = vpop.f32.mrb[36].mxu0 }
 0x27e   : > { %v2931_v48 = vpop.f32.mrb[37].mxu0 }
 0x27f   : > { %v2932_v49 = vadd.f32 %v2931_v48, %v2930_v47  ;;  %v2933_v50 = vpop.f32.mrb[38].mxu0  ;;  %v1825_v51 = vpack.c.bf16 %v1796_v46, %v1795_v45 }
 0x280   : > { %v2934_v52 = vpop.f32.mrb[39].mxu0 }
 0x281   : > { %v1689_v53 = vadd.f32 %v2932_v49, %v3880_v22  ;;  %v2935_v54 = vadd.f32 %v2934_v52, %v2933_v50  ;;  %3224 = vmatprep.mubr.bf16.mxu1 %v1825_v51 }
 0x283   : > { %v1692_v55 = vadd.f32 %v2935_v54, %v3880_v22  ;;  %v1797_v56 = vmax.f32 %v1689_v53, 0.0 }
 0x285   : > { %v1798_v57 = vmax.f32 %v1692_v55, 0.0  ;;  %v2936_v58 = vpop.f32.mrb[40].mxu0 }
 0x286   : > { %v2937_v59 = vpop.f32.mrb[41].mxu0 }
 0x287   : > { %v2938_v60 = vadd.f32 %v2937_v59, %v2936_v58  ;;  %v2939_v61 = vpop.f32.mrb[42].mxu0  ;;  %v1826_v62 = vpack.c.bf16 %v1798_v57, %v1797_v56 }
 0x288   : > { %v2940_v63 = vpop.f32.mrb[43].mxu0 }
 0x289   : > { %v1697_v0 = vadd.f32 %v2938_v60, %v3880_v22  ;;  %v2941_v1 = vadd.f32 %v2940_v63, %v2939_v61  ;;  %3225 = vmatmul.mubr.bf16.gmra.mrb[44].mxu1 %v1826_v62 }
 0x28b   : > { %v1700_v2 = vadd.f32 %v2941_v1, %v3880_v22  ;;  %v1799_v3 = vmax.f32 %v1697_v0, 0.0 }
 0x28d   : > { %v1800_v4 = vmax.f32 %v1700_v2, 0.0  ;;  %v2942_v5 = vpop.f32.mrb[44].mxu0 }
 0x28e   : > { %v2943_v8 = vpop.f32.mrb[45].mxu0 }
 0x28f   : > { %v2944_v9 = vadd.f32 %v2943_v8, %v2942_v5  ;;  %v2945_v10 = vpop.f32.mrb[46].mxu0  ;;  %v1827_v16 = vpack.c.bf16 %v1800_v4, %v1799_v3 }
 0x290   : > { %v2946_v7 = vpop.f32.mrb[47].mxu0 }
 0x291   : > { %v1705_v11 = vadd.f32 %v2944_v9, %v3880_v22  ;;  %v2947_v14 = vadd.f32 %v2946_v7, %v2945_v10  ;;  %3228 = vmatprep.mubr.bf16.mxu1 %v1827_v16 }
 0x293   : > { %v1708_v18 = vadd.f32 %v2947_v14, %v3880_v22  ;;  %v1801_v19 = vmax.f32 %v1705_v11, 0.0 }
 0x295   : > { %v1802_v12 = vmax.f32 %v1708_v18, 0.0  ;;  %v2948_v13 = vpop.f32.mrb[48].mxu0 }
 0x296   : > { %v2949_v26 = vpop.f32.mrb[49].mxu0 }
 0x297   : > { %v2950_v27 = vadd.f32 %v2949_v26, %v2948_v13  ;;  %v2951_v28 = vpop.f32.mrb[50].mxu0  ;;  %v1828_v23 = vpack.c.bf16 %v1802_v12, %v1801_v19 }
 0x298   : > { %v2952_v24 = vpop.f32.mrb[51].mxu0 }
 0x299   : > { %v1713_v25 = vadd.f32 %v2950_v27, %v3880_v22  ;;  %v2953_v29 = vadd.f32 %v2952_v24, %v2951_v28  ;;  %3229 = vmatmul.mubr.bf16.gmra.mrb[48].mxu1 %v1828_v23 }
 0x29b   : > { %v1716_v30 = vadd.f32 %v2953_v29, %v3880_v22  ;;  %v1803_v31 = vmax.f32 %v1713_v25, 0.0 }
 0x29d   : > { %v1804_v32 = vmax.f32 %v1716_v30, 0.0  ;;  %v2954_v33 = vpop.f32.mrb[52].mxu0 }
 0x29e   : > { %v2955_v34 = vpop.f32.mrb[53].mxu0 }
 0x29f   : > { %v2956_v35 = vadd.f32 %v2955_v34, %v2954_v33  ;;  %v2957_v36 = vpop.f32.mrb[54].mxu0  ;;  %v1829_v37 = vpack.c.bf16 %v1804_v32, %v1803_v31 }
 0x2a0   : > { %v2958_v38 = vpop.f32.mrb[55].mxu0 }
 0x2a1   : > { %v1721_v39 = vadd.f32 %v2956_v35, %v3880_v22  ;;  %v2959_v40 = vadd.f32 %v2958_v38, %v2957_v36  ;;  %3232 = vmatprep.mubr.bf16.mxu1 %v1829_v37 }
 0x2a3   : > { %v1724_v41 = vadd.f32 %v2959_v40, %v3880_v22  ;;  %v1805_v42 = vmax.f32 %v1721_v39, 0.0 }
 0x2a5   : > { %v1806_v43 = vmax.f32 %v1724_v41, 0.0  ;;  %v2960_v44 = vpop.f32.mrb[56].mxu0 }
 0x2a6   : > { %v2961_v45 = vpop.f32.mrb[57].mxu0 }
 0x2a7   : > { %v2962_v46 = vadd.f32 %v2961_v45, %v2960_v44  ;;  %v2963_v47 = vpop.f32.mrb[58].mxu0  ;;  %v1830_v48 = vpack.c.bf16 %v1806_v43, %v1805_v42 }
 0x2a8   : > { %v2964_v49 = vpop.f32.mrb[59].mxu0 }
 0x2a9   : > { %v1729_v50 = vadd.f32 %v2962_v46, %v3880_v22  ;;  %v2965_v51 = vadd.f32 %v2964_v49, %v2963_v47  ;;  %3233 = vmatmul.mubr.bf16.gmra.mrb[52].mxu1 %v1830_v48 }
 0x2ab   : > { %v1732_v52 = vadd.f32 %v2965_v51, %v3880_v22  ;;  %v1807_v53 = vmax.f32 %v1729_v50, 0.0 }
 0x2ad   : > { %v1808_v54 = vmax.f32 %v1732_v52, 0.0  ;;  %v2966_v55 = vpop.f32.mrb[60].mxu0 }
 0x2ae   : > { %v2967_v56 = vpop.f32.mrb[61].mxu0 }
 0x2af   : > { %v2968_v57 = vadd.f32 %v2967_v56, %v2966_v55  ;;  %v2969_v58 = vpop.f32.mrb[62].mxu0  ;;  %v1831_v59 = vpack.c.bf16 %v1808_v54, %v1807_v53 }
 0x2b0   : > { %v2970_v60 = vpop.f32.mrb[63].mxu0 }
 0x2b1   : > { %v1737_v61 = vadd.f32 %v2968_v57, %v3880_v22  ;;  %v2971_v62 = vadd.f32 %v2970_v60, %v2969_v58  ;;  %3236 = vmatprep.mubr.bf16.mxu1 %v1831_v59 }
 0x2b3   : > { %v1740_v63 = vadd.f32 %v2971_v62, %v3880_v22  ;;  %v1809_v0 = vmax.f32 %v1737_v61, 0.0 }
 0x2b5   : > { %v1810_v1 = vmax.f32 %v1740_v63, 0.0  ;;  %v2972_v2 = vpop.f32.mrb[64].mxu0 }
 0x2b6   : > { %v2973_v3 = vpop.f32.mrb[65].mxu0 }
 0x2b7   : > { %v2974_v4 = vadd.f32 %v2973_v3, %v2972_v2  ;;  %v2975_v5 = vpop.f32.mrb[66].mxu0  ;;  %v1832_v8 = vpack.c.bf16 %v1810_v1, %v1809_v0 }
 0x2b8   : > { %v2976_v9 = vpop.f32.mrb[67].mxu0 }
 0x2b9   : > { %v1745_v10 = vadd.f32 %v2974_v4, %v3880_v22  ;;  %v2977_v16 = vadd.f32 %v2976_v9, %v2975_v5  ;;  %3237 = vmatmul.mubr.bf16.gmra.mrb[56].mxu1 %v1832_v8 }
 0x2bb   : > { %v1748_v7 = vadd.f32 %v2977_v16, %v3880_v22  ;;  %v1811_v11 = vmax.f32 %v1745_v10, 0.0 }
 0x2bd   : > { %v1812_v14 = vmax.f32 %v1748_v7, 0.0  ;;  %v2978_v18 = vpop.f32.mrb[68].mxu0 }
 0x2be   : > { %v2979_v19 = vpop.f32.mrb[69].mxu0 }
 0x2bf   : > { %v2980_v12 = vadd.f32 %v2979_v19, %v2978_v18  ;;  %v2981_v13 = vpop.f32.mrb[70].mxu0  ;;  %v1833_v26 = vpack.c.bf16 %v1812_v14, %v1811_v11  ;;  %v948_v11 = vshrl.u32 %v529_v6, 7  ;;  %v528_v18 = vld [vmem:[%s441_s16] sm:$0x3] }
 0x2c0   : > { %v2982_v27 = vpop.f32.mrb[71].mxu0 }
 0x2c1   : > { %v1753_v28 = vadd.f32 %v2980_v12, %v3880_v22  ;;  %v2983_v23 = vadd.f32 %v2982_v27, %v2981_v13  ;;  %3240 = vmatprep.mubr.bf16.mxu1 %v1833_v26  ;;  %v962_v14 = vsub.s32 1, %v948_v11  ;;  %v958_v19 = vsub.s32 0, %v948_v11  ;;  %v3923_v26 = vld [vmem:[%s4144_s7] ss:$0 sm:$0xff] }
 0x2c2   : > { %v949_v12 = vadd.s32 8, %v948_v11 }
 0x2c3   : > { %v1756_v24 = vadd.f32 %v2983_v23, %v3880_v22  ;;  %v1813_v25 = vmax.f32 %v1753_v28, 0.0  ;;  %v963_v13 = vrot.slane %v528_v18, %v962_v14  ;;  %v3400_v23 = vmov 1.0|1.0  }
 0x2c5   : > { %v1814_v29 = vmax.f32 %v1756_v24, 0.0  ;;  %v2984_v30 = vpop.f32.mrb[72].mxu0  ;;  %vm965_vm4 = vcmp.eq.s32.totalorder %v948_v11, %v963_v13  ;;  %vm967_vm5 = vcmp.eq.s32.totalorder %v949_v12, %v963_v13  ;;  %v2103_v24 = vld [vmem:[#allocation2] sm:$0xff] }
 0x2c6   : > { %v2985_v31 = vpop.f32.mrb[73].mxu0  ;;  %vm2809_vm7 = vmpackc.low %vm967_vm5, %vm965_vm4 }
 0x2c7   : > { %v2986_v32 = vadd.f32 %v2985_v31, %v2984_v30  ;;  %v2987_v33 = vpop.f32.mrb[74].mxu0  ;;  %v1834_v34 = vpack.c.bf16 %v1814_v29, %v1813_v25  ;;  %v950_v30 = vadd.s32 16, %v948_v11  ;;  %v951_v31 = vadd.s32 24, %v948_v11 }
 0x2c8   : > { %v2988_v35 = vpop.f32.mrb[75].mxu0 }
 0x2c9   : > { %v1761_v36 = vadd.f32 %v2986_v32, %v3880_v22  ;;  %v2989_v37 = vadd.f32 %v2988_v35, %v2987_v33  ;;  %3241 = vmatmul.mubr.bf16.gmra.mrb[60].mxu1 %v1834_v34  ;;  %vm969_vm10 = vcmp.eq.s32.totalorder %v950_v30, %v963_v13  ;;  %vm971_vm11 = vcmp.eq.s32.totalorder %v951_v31, %v963_v13 }
 0x2ca   : > { %vm3934_vm12 = vmpackc.low %vm971_vm11, %vm969_vm10 }
 0x2cb   : > { %v1764_v38 = vadd.f32 %v2989_v37, %v3880_v22  ;;  %v1815_v39 = vmax.f32 %v1761_v36, 0.0 }
 0x2cd   : > { %v1816_v40 = vmax.f32 %v1764_v38, 0.0  ;;  %v2990_v41 = vpop.f32.mrb[76].mxu0 }
 0x2ce   : > { %v2991_v42 = vpop.f32.mrb[77].mxu0 }
 0x2cf   : > { %v2992_v43 = vadd.f32 %v2991_v42, %v2990_v41  ;;  %v2993_v44 = vpop.f32.mrb[78].mxu0  ;;  %v1835_v45 = vpack.c.bf16 %v1816_v40, %v1815_v39 }
 0x2d0   : > { %v2994_v46 = vpop.f32.mrb[79].mxu0 }
 0x2d1   : > { %v1769_v47 = vadd.f32 %v2992_v43, %v3880_v22  ;;  %v2995_v48 = vadd.f32 %v2994_v46, %v2993_v44  ;;  %3244 = vmatprep.mubr.bf16.mxu1 %v1835_v45  ;;  %v952_v43 = vadd.s32 32, %v948_v11  ;;  %v953_v44 = vadd.s32 40, %v948_v11 }
 0x2d3   : > { %v1772_v49 = vadd.f32 %v2995_v48, %v3880_v22  ;;  %v1817_v50 = vmax.f32 %v1769_v47, 0.0  ;;  %vm973_vm0 = vcmp.eq.s32.totalorder %v952_v43, %v963_v13  ;;  %vm975_vm1 = vcmp.eq.s32.totalorder %v953_v44, %v963_v13 }
 0x2d4   : > { %vm3946_vm4 = vmpackc.low %vm975_vm1, %vm973_vm0 }
 0x2d5   : > { %v1818_v51 = vmax.f32 %v1772_v49, 0.0  ;;  %v2996_v52 = vpop.f32.mrb[80].mxu0 }
 0x2d6   : > { %v2997_v53 = vpop.f32.mrb[81].mxu0 }
 0x2d7   : > { %v2998_v54 = vadd.f32 %v2997_v53, %v2996_v52  ;;  %v2999_v55 = vpop.f32.mrb[82].mxu0  ;;  %v1836_v56 = vpack.c.bf16 %v1818_v51, %v1817_v50  ;;  %v954_v52 = vadd.s32 48, %v948_v11  ;;  %v955_v53 = vadd.s32 56, %v948_v11 }
 0x2d8   : > { %v3000_v57 = vpop.f32.mrb[83].mxu0 }
 0x2d9   : > { %v1777_v58 = vadd.f32 %v2998_v54, %v3880_v22  ;;  %v3001_v59 = vadd.f32 %v3000_v57, %v2999_v55  ;;  %3245 = vmatmul.mubr.bf16.gmra.mrb[64].mxu1 %v1836_v56 }
 0x2db   : > { %v1780_v60 = vadd.f32 %v3001_v59, %v3880_v22  ;;  %v1819_v61 = vmax.f32 %v1777_v58, 0.0 }
 0x2dd   : > { %v1820_v62 = vmax.f32 %v1780_v60, 0.0  ;;  %v3002_v63 = vpop.f32.mrb[84].mxu0 }
 0x2de   : > { %v3003_v0 = vpop.f32.mrb[85].mxu0 }
 0x2df   : > { %v3004_v1 = vadd.f32 %v3003_v0, %v3002_v63  ;;  %v3005_v2 = vpop.f32.mrb[86].mxu0  ;;  %v1837_v3 = vpack.c.bf16 %v1820_v62, %v1819_v61 }
 0x2e0   : > { %v3006_v4 = vpop.f32.mrb[87].mxu0 }
 0x2e1   : > { %v1785_v5 = vadd.f32 %v3004_v1, %v3880_v22  ;;  %v3007_v8 = vadd.f32 %v3006_v4, %v3005_v2  ;;  %3248 = vmatprep.mubr.bf16.mxu1 %v1837_v3 }
 0x2e3   : > { %v1788_v9 = vadd.f32 %v3007_v8, %v3880_v22  ;;  %v1821_v10 = vmax.f32 %v1785_v5, 0.0  ;;  %v959_v22 = vrot.slane %v528_v18, %v958_v19 }
 0x2e5   : > { %v1822_v16 = vmax.f32 %v1788_v9, 0.0  ;;  %vm966_vm6 = vcmp.eq.s32.totalorder %v949_v12, %v959_v22  ;;  %vm964_vm8 = vcmp.eq.s32.totalorder %v948_v11, %v959_v22  ;;  %vm968_vm13 = vcmp.eq.s32.totalorder %v950_v30, %v959_v22 }
 0x2e6   : > { %vm3927_vm9 = vmpackc.low %vm966_vm6, %vm964_vm8  ;;  %vm970_vm14 = vcmp.eq.s32.totalorder %v951_v31, %v959_v22  ;;  %vm972_vm2 = vcmp.eq.s32.totalorder %v952_v43, %v959_v22  ;;  %vm974_vm3 = vcmp.eq.s32.totalorder %v953_v44, %v959_v22  ;;  %vm977_vm6 = vcmp.eq.s32.totalorder %v954_v52, %v963_v13 }
 0x2e7   : > { %v1838_v7 = vpack.c.bf16 %v1822_v16, %v1821_v10  ;;  %vm3938_vm15 = vmpackc.low %vm970_vm14, %vm968_vm13  ;;  %vm976_vm10 = vcmp.eq.s32.totalorder %v954_v52, %v959_v22  ;;  %vm978_vm11 = vcmp.eq.s32.totalorder %v955_v53, %v959_v22 }
 0x2e8   : > { %vm3950_vm5 = vmpackc.low %vm974_vm3, %vm972_vm2 }
 0x2e9   : > { %3249 = vmatmul.mubr.bf16.gmra.mrb[68].mxu1 %v1838_v7  ;;  %vm3962_vm13 = vmpackc.low %vm978_vm11, %vm976_vm10 }
 0x2ea   : > { %2810 = vmatprep.mubr.msk.bf16.mxu1 %vm2809_vm7, %v3400_v23  ;;  %vm979_vm7 = vcmp.eq.s32.totalorder %v955_v53, %v963_v13 }
 0x2eb   : > { %vm3958_vm8 = vmpackc.low %vm979_vm7, %vm977_vm6 }
 0x34c   : > { %v3222_v27 = vpop.f32.mrb[40].mxu1 }
 0x34d   : > { %v1953_v6 = vadd.f32 %v3222_v27, %v3923_v26  ;;  %v1944_v28 = vpop.f32.mrb[41].mxu1 }
 0x34e   : > { %v1945_v25 = vadd.f32 %v3923_v26, %v1944_v28  ;;  %v3223_v29 = vpop.f32.mrb[42].mxu1 }
 0x34f   : > { %v1956_v32 = vadd.f32 %v3223_v29, %v3923_v26  ;;  %v1947_v33 = vpop.f32.mrb[43].mxu1  ;;  %v2073_v35 = vmax.f32 %v1953_v6, 0.0 }
 0x350   : > { %v1948_v34 = vadd.f32 %v3923_v26, %v1947_v33  ;;  %v2071_v38 = vmax.f32 %v1945_v25, 0.0 }
 0x351   : > { %v2074_v36 = vmax.f32 %v1956_v32, 0.0 }
 0x352   : > { %v2072_v39 = vmax.f32 %v1948_v34, 0.0 }
 0x353   : > { %v3942_v41 = vpack.c.bf16 %v2074_v36, %v2073_v35 }
 0x354   : > { %v3944_v42 = vpack.c.bf16 %v2072_v39, %v2071_v38 }
 0x35c   : > { %v3226_v47 = vpop.f32.mrb[44].mxu1 }
 0x35d   : > { %v1969_v48 = vadd.f32 %v3226_v47, %v3923_v26  ;;  %v1960_v49 = vpop.f32.mrb[45].mxu1 }
 0x35e   : > { %v1961_v50 = vadd.f32 %v3923_v26, %v1960_v49  ;;  %v3227_v51 = vpop.f32.mrb[46].mxu1 }
 0x35f   : > { %v1972_v54 = vadd.f32 %v3227_v51, %v3923_v26  ;;  %v1963_v55 = vpop.f32.mrb[47].mxu1  ;;  %v2077_v57 = vmax.f32 %v1969_v48, 0.0 }
 0x360   : > { %v1964_v56 = vadd.f32 %v3923_v26, %v1963_v55  ;;  %v2075_v60 = vmax.f32 %v1961_v50, 0.0 }
 0x361   : > { %v2078_v58 = vmax.f32 %v1972_v54, 0.0 }
 0x362   : > { %v2076_v61 = vmax.f32 %v1964_v56, 0.0 }
 0x363   : > { %v3966_v63 = vpack.c.bf16 %v2078_v58, %v2077_v57 }
 0x364   : > { %v2113_v0 = vpack.c.bf16 %v2076_v61, %v2075_v60 }
 0x36c   : > { %v3230_v1 = vpop.f32.mrb[48].mxu1 }
 0x36d   : > { %v1985_v2 = vadd.f32 %v3230_v1, %v3923_v26  ;;  %v1976_v3 = vpop.f32.mrb[49].mxu1 }
 0x36e   : > { %v1977_v4 = vadd.f32 %v3923_v26, %v1976_v3  ;;  %v3231_v5 = vpop.f32.mrb[50].mxu1 }
 0x36f   : > { %v1988_v8 = vadd.f32 %v3231_v5, %v3923_v26  ;;  %v1979_v9 = vpop.f32.mrb[51].mxu1  ;;  %v2081_v16 = vmax.f32 %v1985_v2, 0.0 }
 0x370   : > { %v1980_v10 = vadd.f32 %v3923_v26, %v1979_v9  ;;  %v2079_v11 = vmax.f32 %v1977_v4, 0.0 }
 0x371   : > { %v2082_v7 = vmax.f32 %v1988_v8, 0.0 }
 0x372   : > { %v2080_v14 = vmax.f32 %v1980_v10, 0.0 }
 0x373   : > { %v3972_v18 = vpack.c.bf16 %v2082_v7, %v2081_v16 }
 0x374   : > { %v3974_v19 = vpack.c.bf16 %v2080_v14, %v2079_v11 }
 0x37c   : > { %v3234_v12 = vpop.f32.mrb[52].mxu1 }
 0x37d   : > { %v2001_v13 = vadd.f32 %v3234_v12, %v3923_v26  ;;  %v1992_v22 = vpop.f32.mrb[53].mxu1 }
 0x37e   : > { %v1993_v27 = vadd.f32 %v3923_v26, %v1992_v22  ;;  %v3235_v6 = vpop.f32.mrb[54].mxu1 }
 0x37f   : > { %v2004_v28 = vadd.f32 %v3235_v6, %v3923_v26  ;;  %v1995_v25 = vpop.f32.mrb[55].mxu1  ;;  %v2085_v30 = vmax.f32 %v2001_v13, 0.0 }
 0x380   : > { %v1996_v29 = vadd.f32 %v3923_v26, %v1995_v25  ;;  %v2083_v32 = vmax.f32 %v1993_v27, 0.0 }
 0x381   : > { %v2086_v31 = vmax.f32 %v2004_v28, 0.0 }
 0x382   : > { %v2084_v33 = vmax.f32 %v1996_v29, 0.0 }
 0x383   : > { %v3980_v34 = vpack.c.bf16 %v2086_v31, %v2085_v30 }
 0x384   : > { %v3982_v35 = vpack.c.bf16 %v2084_v33, %v2083_v32 }
 0x38c   : > { %v3238_v36 = vpop.f32.mrb[56].mxu1 }
 0x38d   : > { %v2017_v38 = vadd.f32 %v3238_v36, %v3923_v26  ;;  %v2008_v39 = vpop.f32.mrb[57].mxu1 }
 0x38e   : > { %v2009_v43 = vadd.f32 %v3923_v26, %v2008_v39  ;;  %v3239_v44 = vpop.f32.mrb[58].mxu1 }
 0x38f   : > { %v2020_v47 = vadd.f32 %v3239_v44, %v3923_v26  ;;  %v2011_v48 = vpop.f32.mrb[59].mxu1  ;;  %v2089_v50 = vmax.f32 %v2017_v38, 0.0 }
 0x390   : > { %v2012_v49 = vadd.f32 %v3923_v26, %v2011_v48  ;;  %v2087_v52 = vmax.f32 %v2009_v43, 0.0 }
 0x391   : > { %v2090_v51 = vmax.f32 %v2020_v47, 0.0 }
 0x392   : > { %v2088_v53 = vmax.f32 %v2012_v49, 0.0 }
 0x393   : > { %v2120_v54 = vpack.c.bf16 %v2090_v51, %v2089_v50 }
 0x394   : > { %v2119_v55 = vpack.c.bf16 %v2088_v53, %v2087_v52  ;;  %v2105_v52 = vld [vmem:[#allocation2 + $0x10] sm:$0xff] }
 0x396   : > { %3032 = vmatprep.subr.bf16.mxu1 %v2119_v55  ;;  %v2106_v55 = vld [vmem:[#allocation2 + $0x18] sm:$0xff] }
 0x397   : > { %3033 = vmatpush3.bf16.msra.mxu1 %v3944_v42 }
 0x398   : > { %3034 = vmatprep.subr.bf16.mxu1 %v2120_v54 }
 0x39b   : > { %3035 = vmatpush3.bf16.msra.mxu1 %v3942_v41 }
 0x39c   : > { %v3242_v56 = vpop.f32.mrb[60].mxu1 }
 0x39d   : > { %v2033_v57 = vadd.f32 %v3242_v56, %v3923_v26  ;;  %v2024_v58 = vpop.f32.mrb[61].mxu1 }
 0x39e   : > { %v2025_v60 = vadd.f32 %v3923_v26, %v2024_v58  ;;  %v3243_v61 = vpop.f32.mrb[62].mxu1 }
 0x39f   : > { %v2036_v1 = vadd.f32 %v3243_v61, %v3923_v26  ;;  %v2027_v2 = vpop.f32.mrb[63].mxu1  ;;  %v2093_v4 = vmax.f32 %v2033_v57, 0.0 }
 0x3a0   : > { %v2028_v3 = vadd.f32 %v3923_v26, %v2027_v2  ;;  %v2091_v8 = vmax.f32 %v2025_v60, 0.0  ;;  %v2107_v60 = vld [vmem:[#allocation2 + $0x20] sm:$0xff] }
 0x3a1   : > { %v2094_v5 = vmax.f32 %v2036_v1, 0.0 }
 0x3a2   : > { %v2092_v9 = vmax.f32 %v2028_v3, 0.0  ;;  %v2108_v3 = vld [vmem:[#allocation2 + $0x28] sm:$0xff] }
 0x3a3   : > { %v2122_v42 = vpack.c.bf16 %v2094_v5, %v2093_v4 }
 0x3a4   : > { %v2121_v10 = vpack.c.bf16 %v2092_v9, %v2091_v8 }
 0x3a6   : > { %3036 = vmatprep.subr.bf16.mxu1 %v2121_v10  ;;  %v2109_v10 = vld [vmem:[#allocation2 + $0x30] sm:$0xff] }
 0x3a7   : > { %3037 = vmatpush3.bf16.msra.mxu1 %v2113_v0 }
 0x3a8   : > { %3038 = vmatprep.subr.bf16.mxu1 %v2122_v42 }
 0x3ab   : > { %3039 = vmatpush3.bf16.msra.mxu1 %v3966_v63 }
 0x3ac   : > { %v3246_v41 = vpop.f32.mrb[64].mxu1 }
 0x3ad   : > { %v2049_v16 = vadd.f32 %v3246_v41, %v3923_v26  ;;  %v2040_v7 = vpop.f32.mrb[65].mxu1 }
 0x3ae   : > { %v2041_v11 = vadd.f32 %v3923_v26, %v2040_v7  ;;  %v3247_v14 = vpop.f32.mrb[66].mxu1 }
 0x3af   : > { %v2052_v12 = vadd.f32 %v3247_v14, %v3923_v26  ;;  %v2043_v13 = vpop.f32.mrb[67].mxu1  ;;  %v2097_v27 = vmax.f32 %v2049_v16, 0.0 }
 0x3b0   : > { %v2044_v22 = vadd.f32 %v3923_v26, %v2043_v13  ;;  %v2095_v28 = vmax.f32 %v2041_v11, 0.0  ;;  %v2110_v11 = vld [vmem:[#allocation2 + $0x38] sm:$0xff] }
 0x3b1   : > { %v2098_v6 = vmax.f32 %v2052_v12, 0.0 }
 0x3b2   : > { %v2096_v25 = vmax.f32 %v2044_v22, 0.0 }
 0x3b3   : > { %v2124_v0 = vpack.c.bf16 %v2098_v6, %v2097_v27  ;;  %v3335_v27 = vld [vmem:[%s4145_s8 + $0x40] sm:$0xff] (!%p2825_p6)  }
 0x3b4   : > { %v2123_v29 = vpack.c.bf16 %v2096_v25, %v2095_v28  ;;  %v3336_v6 = vld [vmem:[%s4145_s8] sm:$0xff] (!%p2825_p6)   ;;  %3072 = vmatprep.subr.bf16.mxu0 (!%p2825_p6), %v3335_v27  ;;  %v3337_v28 = vld [vmem:[%s4145_s8 + $0x48] sm:$0xff] (!%p2825_p6)  }
 0x3b5   : > { %3073 = vmatpush3.bf16.msra.mxu0 (!%p2825_p6), %v3336_v6  ;;  %v3338_v25 = vld [vmem:[%s4145_s8 + $0x8] sm:$0xff] (!%p2825_p6)  }
 0x3b6   : > { %3040 = vmatprep.subr.bf16.mxu1 %v2123_v29  ;;  %3074 = vmatprep.subr.bf16.mxu0 (!%p2825_p6), %v3337_v28  ;;  %v3341_v29 = vld [vmem:[%s4145_s8 + $0x58] sm:$0xff] (!%p2825_p6)  }
 0x3b7   : > { %3041 = vmatpush3.bf16.msra.mxu1 %v3974_v19 }
 0x3b8   : > { %3042 = vmatprep.subr.bf16.mxu1 %v2124_v0  ;;  %v3339_v0 = vld [vmem:[%s4145_s8 + $0x50] sm:$0xff] (!%p2825_p6)  }
 0x3b9   : > { %3075 = vmatpush3.bf16.msra.mxu0 (!%p2825_p6), %v3338_v25 }
 0x3ba   : > { %3076 = vmatprep.subr.bf16.mxu0 (!%p2825_p6), %v3339_v0 }
 0x3bb   : > { %3043 = vmatpush3.bf16.msra.mxu1 %v3972_v18 }
 0x3bc   : > { %v3250_v63 = vpop.f32.mrb[68].mxu1 }
 0x3bd   : > { %v2065_v30 = vadd.f32 %v3250_v63, %v3923_v26  ;;  %v2056_v31 = vpop.f32.mrb[69].mxu1  ;;  %3077 = vmatpush3.bf16.msra.mxu0 (!%p2825_p6), %v3340_v15  ;;  %v3342_v63 = vld [vmem:[%s4145_s8 + $0x18] sm:$0xff] (!%p2825_p6)  }
 0x3be   : > { %v2057_v32 = vadd.f32 %v3923_v26, %v2056_v31  ;;  %v3251_v33 = vpop.f32.mrb[70].mxu1  ;;  %3078 = vmatprep.subr.bf16.mxu0 (!%p2825_p6), %v3341_v29  ;;  %v3344_v31 = vld [vmem:[%s4145_s8 + $0x20] sm:$0xff] (!%p2825_p6)  }
 0x3bf   : > { %v2068_v36 = vadd.f32 %v3251_v33, %v3923_v26  ;;  %v2059_v38 = vpop.f32.mrb[71].mxu1  ;;  %v2101_v43 = vmax.f32 %v2065_v30, 0.0  ;;  %v3343_v30 = vld [vmem:[%s4145_s8 + $0x60] sm:$0xff] (!%p2825_p6)   ;;  %v3346_v33 = vld [vmem:[%s4145_s8 + $0x28] sm:$0xff] (!%p2825_p6)  }
 0x3c0   : > { %v2060_v39 = vadd.f32 %v3923_v26, %v2059_v38  ;;  %v2099_v47 = vmax.f32 %v2057_v32, 0.0  ;;  %v3345_v32 = vld [vmem:[%s4145_s8 + $0x68] sm:$0xff] (!%p2825_p6)   ;;  %v3351_v38 = vld [vmem:[%s4147_s10] sm:$0xff] (!%p2825_p6)  }
 0x3c1   : > { %v2102_v44 = vmax.f32 %v2068_v36, 0.0  ;;  %3079 = vmatpush3.bf16.msra.mxu0 (!%p2825_p6), %v3342_v63  ;;  %v3347_v36 = vld [vmem:[%s4145_s8 + $0x70] sm:$0xff] (!%p2825_p6)  }
 0x3c2   : > { %v2100_v48 = vmax.f32 %v2060_v39, 0.0  ;;  %3080 = vmatprep.subr.bf16.mxu0 (!%p2825_p6), %v3343_v30  ;;  %v3352_v39 = vld [vmem:[%s4147_s10 + $0x8] sm:$0xff] (!%p2825_p6)  }
 0x3c3   : > { %v2126_v19 = vpack.c.bf16 %v2102_v44, %v2101_v43  ;;  %v3348_v43 = vld [vmem:[%s4145_s8 + $0x30] sm:$0xff] (!%p2825_p6)  }
 0x3c4   : > { %v2125_v49 = vpack.c.bf16 %v2100_v48, %v2099_v47  ;;  %v3353_v44 = vld [vmem:[%s4147_s10 + $0x10] sm:$0xff] (!%p2825_p6)   ;;  %v3349_v47 = vld [vmem:[%s4145_s8 + $0x78] sm:$0xff] (!%p2825_p6)  }
 0x3c5   : > { %3081 = vmatpush3.bf16.msra.mxu0 (!%p2825_p6), %v3344_v31  ;;  %v3350_v48 = vld [vmem:[%s4145_s8 + $0x38] sm:$0xff] (!%p2825_p6)  }
 0x3c6   : > { %3044 = vmatprep.subr.bf16.mxu1 %v2125_v49  ;;  %3082 = vmatprep.subr.bf16.mxu0 (!%p2825_p6), %v3345_v32 }
 0x3c7   : > { %3045 = vmatpush3.bf16.msra.mxu1 %v3982_v35 }
 0x3c8   : > { %3046 = vmatprep.subr.bf16.mxu1 %v2126_v19 }
 0x3c9   : > { %3083 = vmatpush3.bf16.msra.mxu0 (!%p2825_p6), %v3346_v33 }
 0x3ca   : > { %3084 = vmatprep.subr.bf16.mxu0 (!%p2825_p6), %v3347_v36 }
 0x3cb   : > { %3047 = vmatpush3.bf16.msra.mxu1 %v3980_v34  ;;  %v2104_v34 = vld [vmem:[#allocation2 + $0x8] sm:$0xff] }
 0x3cc   : > { %3252 = vmatprep.subr.bf16.mxu1 (!%p2825_p6), %v3351_v38 }
 0x3cd   : > { %3085 = vmatpush3.bf16.msra.mxu0 (!%p2825_p6), %v3348_v43 }
 0x3ce   : > { %2812 = vmatmul.mubr.msk.bf16.vlgmr.msra.gmra.mrb[72].mxu1 %vm3927_vm9, %v3400_v23  ;;  %3086 = vmatprep.subr.bf16.mxu0 (!%p2825_p6), %v3349_v47  ;;  %v2843_v47 = vld [vmem:[%s4148_s11] ss:$0 sm:$0xff] (!%p2825_p6) }
 0x3cf   : > { %2814 = vmatprep.mubr.msk.bf16.mxu1 %vm3934_vm12, %v3400_v23  ;;  %3253 = vmatpush3.bf16.msra.mxu1 (!%p2825_p6), %v3351_v38 }
 0x3d0   : > { %3254 = vmatprep.subr.bf16.mxu1 (!%p2825_p6), %v3352_v39 }
 0x3d1   : > { %3087 = vmatpush3.bf16.msra.mxu0 (!%p2825_p6), %v3350_v48 }
 0x3d3   : > { %3255 = vmatpush3.bf16.msra.mxu1 (!%p2825_p6), %v3352_v39 }
 0x3d4   : > { %3256 = vmatprep.subr.bf16.mxu1 (!%p2825_p6), %v3353_v44 }
 0x3d6   : > { %2816 = vmatmul.mubr.msk.bf16.gmra.mrb[76].mxu1 %vm3938_vm15, %v3400_v23 }
 0x3d7   : > { %2818 = vmatprep.mubr.msk.bf16.mxu1 %vm3946_vm4, %v3400_v23  ;;  %3257 = vmatpush3.bf16.msra.mxu1 (!%p2825_p6), %v3353_v44 }
 0x3de   : > { %2820 = vmatmul.mubr.msk.bf16.gmra.mrb[80].mxu1 %vm3950_vm5, %v3400_v23 }
 0x3df   : > { %2822 = vmatprep.mubr.msk.bf16.mxu1 %vm3958_vm8, %v3400_v23 }
 0x3e6   : > { %2824 = vmatmul.mubr.msk.bf16.gmra.mrb[84].mxu1 %vm3962_vm13, %v3400_v23 }
 0x4a1   : > { %v3048_v26 = vpop.f32.mrb[72].mxu1 }
 0x4a2   : > { %v3049_v37 = vpop.f32.mrb[73].mxu1 }
 0x4a3   : > { %v3050_v40 = vadd.f32 %v3049_v37, %v3048_v26  ;;  %v3051_v18 = vpop.f32.mrb[74].mxu1 }
 0x4a4   : > { %v3052_v45 = vpop.f32.mrb[75].mxu1 }
 0x4a5   : > { %v2192_v35 = vadd.f32 %v3050_v40, %v2103_v24  ;;  %v3053_v50 = vadd.f32 %v3052_v45, %v3051_v18 }
 0x4a7   : > { %2200 = vst [vmem:[#allocation2] sm:$0xff] %v2192_v35  ;;  %v2193_v46 = vadd.f32 %v3053_v50, %v2104_v34 }
 0x4a9   : > { %2201 = vst [vmem:[#allocation2 + $0x8] sm:$0xff] %v2193_v46  ;;  %v3054_v51 = vpop.f32.mrb[76].mxu1 }
 0x4aa   : > { %v3055_v59 = vpop.f32.mrb[77].mxu1 }
 0x4ab   : > { %v3056_v53 = vadd.f32 %v3055_v59, %v3054_v51  ;;  %v3057_v54 = vpop.f32.mrb[78].mxu1  ;;  %v3357_v51 = vld [vmem:[%s4147_s10 + $0x30] sm:$0xff] (!%p2825_p6)  }
 0x4ac   : > { %v3058_v62 = vpop.f32.mrb[79].mxu1 }
 0x4ad   : > { %v2194_v23 = vadd.f32 %v3056_v53, %v2105_v52  ;;  %v3059_v56 = vadd.f32 %v3058_v62, %v3057_v54  ;;  %v3358_v52 = vld [vmem:[%s4147_s10 + $0x38] sm:$0xff] (!%p2825_p6)   ;;  %v2826_v54 = vld [vmem:[%s4146_s9] ss:$0 sm:$0xff] (!%p2825_p6) }
 0x4ae   : > { %v2212_v19 = vld [vmem:[#allocation2] sm:$0xff] (!%p2825_p6) }
 0x4af   : > { %2202 = vst [vmem:[#allocation2 + $0x10] sm:$0xff] %v2194_v23  ;;  %v2195_v57 = vadd.f32 %v3059_v56, %v2106_v55 }
 0x4b0   : > { %v2213_v49 = vld [vmem:[#allocation2 + $0x8] sm:$0xff] (!%p2825_p6) }
 0x4b1   : > { %2203 = vst [vmem:[#allocation2 + $0x18] sm:$0xff] %v2195_v57  ;;  %v3060_v58 = vpop.f32.mrb[80].mxu1  ;;  %v2220_v26 = vpack.c.bf16 (!%p2825_p6), %v2213_v49, %v2212_v19 }
 0x4b2   : > { %v3061_v61 = vpop.f32.mrb[81].mxu1 }
 0x4b3   : > { %v3062_v1 = vadd.f32 %v3061_v61, %v3060_v58  ;;  %v3063_v2 = vpop.f32.mrb[82].mxu1  ;;  %2392 = vmatmul.mubr.bf16.vlgmr.msra.gmra.mrb[0].mxu0 (!%p2825_p6), %v2220_v26 }
 0x4b4   : > { %v3064_v4 = vpop.f32.mrb[83].mxu1  ;;  %2399 = vmatprep.mubr.bf16.mxu0 (!%p2825_p6), %v3521_v17  ;;  %v3354_v17 = vld [vmem:[%s4147_s10 + $0x18] sm:$0xff] (!%p2825_p6)  }
 0x4b5   : > { %v2196_v5 = vadd.f32 %v3062_v1, %v2107_v60  ;;  %v3065_v8 = vadd.f32 %v3064_v4, %v3063_v2  ;;  %3258 = vmatprep.subr.bf16.mxu1 (!%p2825_p6), %v3354_v17 }
 0x4b6   : > { %v2214_v24 = vld [vmem:[#allocation2 + $0x10] sm:$0xff] (!%p2825_p6)  ;;  %3259 = vmatpush3.bf16.msra.mxu1 (!%p2825_p6), %v3354_v17 }
 0x4b7   : > { %2204 = vst [vmem:[#allocation2 + $0x20] sm:$0xff] %v2196_v5  ;;  %v2197_v9 = vadd.f32 %v3065_v8, %v2108_v3 }
 0x4b8   : > { %v2215_v37 = vld [vmem:[#allocation2 + $0x18] sm:$0xff] (!%p2825_p6) }
 0x4b9   : > { %2205 = vst [vmem:[#allocation2 + $0x28] sm:$0xff] %v2197_v9  ;;  %v3066_v42 = vpop.f32.mrb[84].mxu1  ;;  %v2221_v40 = vpack.c.bf16 (!%p2825_p6), %v2215_v37, %v2214_v24 }
 0x4ba   : > { %v3067_v41 = vpop.f32.mrb[85].mxu1 }
 0x4bb   : > { %v3068_v16 = vadd.f32 %v3067_v41, %v3066_v42  ;;  %v3069_v7 = vpop.f32.mrb[86].mxu1  ;;  %2211 = sbr.rel (%p2825_p6) target bundleno = 1670 (0x686), region = 76  ;;  %2400 = vmatmul.mubr.bf16.gmra.mrb[4].mxu0 (!%p2825_p6), %v2221_v40 }
 0x4bc   : > { %v3070_v14 = vpop.f32.mrb[87].mxu1  ;;  %2407 = vmatprep.mubr.bf16.mxu0 (!%p2825_p6), %v3532_v20  ;;  %v3355_v20 = vld [vmem:[%s4147_s10 + $0x20] sm:$0xff] (!%p2825_p6)  }
 0x4bd   : > { %v2198_v12 = vadd.f32 %v3068_v16, %v2109_v10  ;;  %v3071_v13 = vadd.f32 %v3070_v14, %v3069_v7  ;;  %3260 = vmatprep.subr.bf16.mxu1 (!%p2825_p6), %v3355_v20 }
 0x4be   : > { %v2216_v18 = vld [vmem:[#allocation2 + $0x20] sm:$0xff] (!%p2825_p6)  ;;  %3261 = vmatpush3.bf16.msra.mxu1 (!%p2825_p6), %v3355_v20 }
 0x4bf   : > { %2206 = vst [vmem:[#allocation2 + $0x30] sm:$0xff] %v2198_v12  ;;  %v2199_v22 = vadd.f32 %v3071_v13, %v2110_v11 }
 0x4c0   : > { %v2217_v34 = vld [vmem:[#allocation2 + $0x28] sm:$0xff] (!%p2825_p6) }
 0x4c1   : > { %2207 = vst [vmem:[#allocation2 + $0x38] sm:$0xff] %v2199_v22  ;;  %v2222_v45 = vpack.c.bf16 (!%p2825_p6), %v2217_v34, %v2216_v18 }
 0x4c3   : > { %2408 = vmatmul.mubr.bf16.gmra.mrb[8].mxu0 %v2222_v45 }
 0x4c4   : > { %2415 = vmatprep.mubr.bf16.mxu0 %v3538_v21  ;;  %v3356_v21 = vld [vmem:[%s4147_s10 + $0x28] sm:$0xff]  }
 0x4c5   : > { %3262 = vmatprep.subr.bf16.mxu1 %v3356_v21 }
 0x4c6   : > { %v2218_v35 = vld [vmem:[#allocation2 + $0x30] sm:$0xff]  ;;  %3263 = vmatpush3.bf16.msra.mxu1 %v3356_v21 }
 0x4c7   : > { %3264 = vmatprep.subr.bf16.mxu1 %v3357_v51 }
 0x4c8   : > { %v2219_v50 = vld [vmem:[#allocation2 + $0x38] sm:$0xff] }
 0x4c9   : > { %v2223_v46 = vpack.c.bf16 %v2219_v50, %v2218_v35 }
 0x4ca   : > { %3265 = vmatpush3.bf16.msra.mxu1 %v3357_v51 }
 0x4cb   : > { %2416 = vmatmul.mubr.bf16.gmra.mrb[12].mxu0 %v2223_v46  ;;  %3266 = vmatprep.subr.bf16.mxu1 %v3358_v52 }
 0x4ce   : > { %3267 = vmatpush3.bf16.msra.mxu1 %v3358_v52 }
 0x586   : > { %v3088_v59 = vpop.f32.mrb[0].mxu0 }
 0x587   : > { %v3089_v53 = vpop.f32.mrb[1].mxu0 }
 0x588   : > { %v3090_v55 = vadd.f32 %v3089_v53, %v3088_v59  ;;  %v3091_v62 = vpop.f32.mrb[2].mxu0 }
 0x589   : > { %v3092_v23 = vpop.f32.mrb[3].mxu0 }
 0x58a   : > { %v3093_v56 = vadd.f32 %v3092_v23, %v3091_v62  ;;  %v2394_v57 = vadd.f32 %v3090_v55, %v2826_v54 }
 0x58c   : > { %v2397_v58 = vadd.f32 %v3093_v56, %v2826_v54  ;;  %v2424_v61 = vmax.f32 %v2394_v57, 0.0 }
 0x58e   : > { %v3094_v60 = vpop.f32.mrb[4].mxu0  ;;  %v2425_v1 = vmax.f32 %v2397_v58, 0.0 }
 0x58f   : > { %v3095_v2 = vpop.f32.mrb[5].mxu0 }
 0x590   : > { %v3096_v3 = vadd.f32 %v3095_v2, %v3094_v60  ;;  %v3097_v4 = vpop.f32.mrb[6].mxu0  ;;  %v2432_v5 = vpack.c.bf16 %v2425_v1, %v2424_v61 }
 0x591   : > { %v3098_v8 = vpop.f32.mrb[7].mxu0 }
 0x592   : > { %v2402_v9 = vadd.f32 %v3096_v3, %v2826_v54  ;;  %v3099_v42 = vadd.f32 %v3098_v8, %v3097_v4  ;;  %3268 = vmatprep.mubr.bf16.mxu1 %v2432_v5 }
 0x594   : > { %v2405_v10 = vadd.f32 %v3099_v42, %v2826_v54  ;;  %v2426_v41 = vmax.f32 %v2402_v9, 0.0 }
 0x596   : > { %v2427_v16 = vmax.f32 %v2405_v10, 0.0  ;;  %v3100_v7 = vpop.f32.mrb[8].mxu0 }
 0x597   : > { %v3101_v11 = vpop.f32.mrb[9].mxu0 }
 0x598   : > { %v3102_v14 = vadd.f32 %v3101_v11, %v3100_v7  ;;  %v3103_v12 = vpop.f32.mrb[10].mxu0  ;;  %v2433_v13 = vpack.c.bf16 %v2427_v16, %v2426_v41 }
 0x599   : > { %v3104_v22 = vpop.f32.mrb[11].mxu0 }
 0x59a   : > { %v2410_v27 = vadd.f32 %v3102_v14, %v2826_v54  ;;  %v3105_v6 = vadd.f32 %v3104_v22, %v3103_v12  ;;  %3269 = vmatmul.mubr.bf16.vlgmr.msra.gmra.mrb[0].mxu1 %v2433_v13 }
 0x59c   : > { %v2413_v28 = vadd.f32 %v3105_v6, %v2826_v54  ;;  %v2428_v25 = vmax.f32 %v2410_v27, 0.0 }
 0x59e   : > { %v2429_v0 = vmax.f32 %v2413_v28, 0.0  ;;  %v3106_v15 = vpop.f32.mrb[12].mxu0 }
 0x59f   : > { %v3107_v29 = vpop.f32.mrb[13].mxu0 }
 0x5a0   : > { %v3108_v63 = vadd.f32 %v3107_v29, %v3106_v15  ;;  %v3109_v30 = vpop.f32.mrb[14].mxu0  ;;  %v2434_v31 = vpack.c.bf16 %v2429_v0, %v2428_v25 }
 0x5a1   : > { %v3110_v32 = vpop.f32.mrb[15].mxu0 }
 0x5a2   : > { %v2418_v33 = vadd.f32 %v3108_v63, %v2826_v54  ;;  %v3111_v36 = vadd.f32 %v3110_v32, %v3109_v30  ;;  %3272 = vmatprep.mubr.bf16.mxu1 %v2434_v31 }
 0x5a4   : > { %v2421_v38 = vadd.f32 %v3111_v36, %v2826_v54  ;;  %v2430_v39 = vmax.f32 %v2418_v33, 0.0 }
 0x5a6   : > { %v2431_v43 = vmax.f32 %v2421_v38, 0.0 }
 0x5a8   : > { %v2435_v44 = vpack.c.bf16 %v2431_v43, %v2430_v39 }
 0x5aa   : > { %3273 = vmatmul.mubr.bf16.gmra.mrb[4].mxu1 %v2435_v44 }
 0x66d   : > { %v3270_v48 = vpop.f32.mrb[0].mxu1 }
 0x66e   : > { %v2550_v19 = vadd.f32 %v3270_v48, %v2843_v47  ;;  %v2541_v49 = vpop.f32.mrb[1].mxu1 }
 0x66f   : > { %v2542_v26 = vadd.f32 %v2843_v47, %v2541_v49  ;;  %v3271_v24 = vpop.f32.mrb[2].mxu1 }
 0x670   : > { %v2574_v37 = vmax.f32 %v2550_v19, 0.0  ;;  %v2553_v40 = vadd.f32 %v3271_v24, %v2843_v47  ;;  %v2544_v18 = vpop.f32.mrb[3].mxu1 }
 0x671   : > { %v2572_v34 = vmax.f32 %v2542_v26, 0.0  ;;  %v2545_v45 = vadd.f32 %v2843_v47, %v2544_v18 }
 0x672   : > { %2582 = vst [vmem:[#allocation3 + $0x10] sm:$0xff] %v2574_v37  ;;  %v2575_v35 = vmax.f32 %v2553_v40, 0.0 }
 0x673   : > { %2580 = vst [vmem:[#allocation3] sm:$0xff] %v2572_v34  ;;  %v2573_v50 = vmax.f32 %v2545_v45, 0.0 }
 0x674   : > { %2583 = vst [vmem:[#allocation3 + $0x18] sm:$0xff] %v2575_v35 }
 0x675   : > { %2581 = vst [vmem:[#allocation3 + $0x8] sm:$0xff] %v2573_v50 }
 0x67d   : > { %v3274_v46 = vpop.f32.mrb[4].mxu1 }
 0x67e   : > { %v2566_v17 = vadd.f32 %v3274_v46, %v2843_v47  ;;  %v2557_v20 = vpop.f32.mrb[5].mxu1 }
 0x67f   : > { %v2558_v21 = vadd.f32 %v2843_v47, %v2557_v20  ;;  %v3275_v51 = vpop.f32.mrb[6].mxu1 }
 0x680   : > { %v2578_v52 = vmax.f32 %v2566_v17, 0.0  ;;  %v2569_v59 = vadd.f32 %v3275_v51, %v2843_v47  ;;  %v2560_v53 = vpop.f32.mrb[7].mxu1 }
 0x681   : > { %v2576_v54 = vmax.f32 %v2558_v21, 0.0  ;;  %v2561_v55 = vadd.f32 %v2843_v47, %v2560_v53 }
 0x682   : > { %2586 = vst [vmem:[#allocation3 + $0x30] sm:$0xff] %v2578_v52  ;;  %v2579_v62 = vmax.f32 %v2569_v59, 0.0 }
 0x683   : > { %2584 = vst [vmem:[#allocation3 + $0x20] sm:$0xff] %v2576_v54  ;;  %v2577_v23 = vmax.f32 %v2561_v55, 0.0 }
 0x684   : > { %2587 = vst [vmem:[#allocation3 + $0x38] sm:$0xff] %v2579_v62 }
 0x685   : > { %2585 = vst [vmem:[#allocation3 + $0x28] sm:$0xff] %v2577_v23 }
 0x686 PF: > { %p3288_p7 = scmp.eq.s32.totalorder %s3475_s22, 2  ;;  %s3401_s28 = smov [#allocation3]  }
 0x687   : > { %s2594_s29 = sshll.u32 %s3401_s28, 4  ;;  %s2595_s29 = int_to_ptr.vmem [resolvable:$true] %s2594_s29 }
 0x688   : > { %s3359_s30 = scalar_lea.vmem %s2595_s29, 1024  ;;  %p3366_p11 = scmp.lt.s32.totalorder %s2595_s29, %s2595_s29 }
 0x689   : > { %p3360_p8 = scmp.ne.s32.totalorder %s2595_s29, %s3359_s30  ;;  %p3367_p12 = scmp.lt.s32.totalorder %s3359_s30, %s3359_s30 }
 0x68b   : > { %p3361_p9 = pnand %p3360_p8, %p3288_p7  ;;  %p3368_p13 = por %p3367_p12, %p3366_p11 }
 0x68d   : > { %p3362_p10 = pneg %p3361_p9 }
 0x68f   : > { %p3369_p0 = pnand %p3368_p13, %p3362_p10 }
 0x691   : > { %3372 = shalt.err (!%p3369_p0)
}
 0x692   : > { %s3373_s15 = scalar_lea.hbm %s4149_s12, 1024 }
 0x693   : > { %p3374_p1 = scmp.ne.s32.totalorder %s4149_s12, %s3373_s15  ;;  %p3379_p4 = scmp.lt.u32.totalorder %s3373_s15, %s4149_s12 }
 0x695   : > { %p3375_p2 = pnand %p3374_p1, %p3288_p7 }
 0x697   : > { %p3376_p3 = pneg %p3375_p2 }
 0x699   : > { %p3381_p5 = pnand %p3379_p4, %p3376_p3 }
 0x69b   : > { %3384 = shalt.err (!%p3381_p5)
}
 0x69c   : > { %s3402_s23 = smov 128   ;;  %s3403_s25 = smov 8  }
 0x69d   : > { %3285 = dma.vmem_to_hbm [thread:$0]  (%p3288_p7), %s2595_s29, 1024, %s4149_s12, [#allocation4], %s3402_s23, %s3402_s23, %s3403_s25  }
 0x69e   : > { %3390 = dma.done.wait (%p3288_p7), [#allocation4], 1024  }
 0x69f   : > { %3392 = vsyncadd (%p3288_p7), [#allocation4], 4294966272 }
 0x6a0 PF: > { %s23_s21 = sadd.s32 1, %s3395_s21  }
 0x6a1   : > { %p20_p6 = scmp.ge.s32.totalorder %s23_s21, 5  }
 0x6a3   :  { %22 = sbr.rel (!%p20_p6) target bundleno = 1 (0x1), region = 109 }
 0x6aa   :  { %2610 = vsyncpa [#allocation4], 1 }
 0x6ab   :  { %2612 = vsyncpa [#allocation4 + $0x1], 1 }

// kernel: tpu_custom_call.1
= control target key start
LH: loop header
LB: loop body
LE: loop exit
PB: predicated region body
PF: predicated region fallthrough
CT: control target
= control target key end

     0   :  { %17 = vsyncpa [#allocation4], 0  ;;  %s3469_s21 = smov 0   ;;  %s4137_s0 = inlined_call_operand.vmem [shape: bf16[64,128], index: 0, kind: input, shape index: {}]   ;;  %s4138_s1 = inlined_call_operand.vmem [shape: s32[768,1], index: 1, kind: input, shape index: {}]   ;;  %s4139_s2 = inlined_call_operand.vmem [shape: s32[768,1], index: 2, kind: input, shape index: {}]   ;;  %s4140_s3 = inlined_call_operand.vmem [shape: s32[1,768], index: 3, kind: input, shape index: {}]   ;;  %s4141_s4 = inlined_call_operand.vmem [shape: bf16[256,128], index: 4, kind: input, shape index: {}]   ;;  %s4142_s5 = inlined_call_operand.vmem [shape: f32[1,128], index: 5, kind: input, shape index: {}]   ;;  %s4143_s6 = inlined_call_operand.vmem [shape: bf16[128,128], index: 6, kind: input, shape index: {}]   ;;  %s4144_s7 = inlined_call_operand.vmem [shape: f32[1,128], index: 7, kind: input, shape index: {}]   ;;  %s4145_s8 = inlined_call_operand.vmem [shape: bf16[256,128], index: 8, kind: input, shape index: {}]   ;;  %s4146_s9 = inlined_call_operand.vmem [shape: f32[1,128], index: 9, kind: input, shape index: {}]   ;;  %s4147_s10 = inlined_call_operand.vmem [shape: bf16[128,128], index: 10, kind: input, shape index: {}]   ;;  %s4148_s11 = inlined_call_operand.vmem [shape: f32[1,128], index: 11, kind: input, shape index: {}]   ;;  %s4149_s12 = inlined_call_operand.hbm [shape: f32[64,128], index: 12, kind: output, shape index: {}]  }
   0x1 LB: > { %s3475_s22 = sadd.s32 4294967295, %s3395_s21   ;;  %p2660_p0 = scmp.ge.s32.totalorder %s3395_s21, 1  ;;  %s3395_s21 = sphi %s3469_s21, %s23_s21  }
   0x2   : > { %p380_p1 = scmp.lt.s32.totalorder %s3395_s21, 4 }
   0x4   : > { %p381_p2 = pnand %p2660_p0, %p380_p1 }
   0x5   : > { %s2661_s23 = sshll.u32 (!%p381_p2), %s3475_s22, 5  ;;  %s2665_s24 = sshll.u32 (!%p381_p2), %s3475_s22, 1 }
   0x6   : > { %384 = sbr.rel (%p381_p2) target bundleno = 1696 (0x6a0), region = 68  ;;  %p427_p3 = scmp.lt.s32.totalorder (!%p381_p2), %s2661_s23, 95 }
   0x7   : > { %p439_p4 = scmp.lt.s32.totalorder (!%p381_p2), %s2665_s24, 5  ;;  %p2666_p5 = scmp.ne.s32.totalorder (!%p381_p2), %s3475_s22, 0 }
   0xd   : > { %s4165_s23 = smov (!%p427_p3, %s2661_s23), 95  ;;  %s4167_s24 = smov (!%p439_p4, %s2665_s24), 5 }
   0xe   : > { %s2662_s25 = sshll.u32 %s4165_s23, 3  ;;  %s441_s16 = scalar_lea.vmem %s4140_s3, %s4167_s24  ;;  %v3397_v0 = vmov (!%p2666_p5), 0.0  }
   0xf   : > { %s3486_s28 = scalar_lea.vmem %s4138_s1, %s2662_s25  ;;  %s3491_s13 = scalar_lea.vmem %s4139_s2, %s2662_s25  ;;  %448 = vst [vmem:[#allocation2] sm:$0xff] (!%p2666_p5), %v3397_v0  ;;  %449 = vst [vmem:[#allocation2 + $0x8] sm:$0xff] (!%p2666_p5), %v3397_v0 }
  0x10   : > { %447 = sbr.rel (%p2666_p5) target bundleno = 23 (0x17), region = 72  ;;  %450 = vst [vmem:[#allocation2 + $0x10] sm:$0xff] (!%p2666_p5), %v3397_v0  ;;  %451 = vst [vmem:[#allocation2 + $0x18] sm:$0xff] (!%p2666_p5), %v3397_v0 }
  0x11   : > { %452 = vst [vmem:[#allocation2 + $0x20] sm:$0xff] (!%p2666_p5), %v3397_v0  ;;  %453 = vst [vmem:[#allocation2 + $0x28] sm:$0xff] (!%p2666_p5), %v3397_v0 }
  0x12   : > { %454 = vst [vmem:[#allocation2 + $0x30] sm:$0xff] (!%p2666_p5), %v3397_v0  ;;  %455 = vst [vmem:[#allocation2 + $0x38] sm:$0xff] (!%p2666_p5), %v3397_v0 }
  0x17 PF: > { %v490_v1 = vld [vmem:[%s3486_s28 + $0xd0] sm:$0xff]  ;;  %v488_v2 = vld [vmem:[%s3486_s28 + $0xc0] sm:$0xff]  ;;  %v3398_v3 = vmov 0   ;;  %v491_v4 = vld [vmem:[%s3486_s28 + $0xd8] sm:$0xff]  ;;  %vm1044_vm4 = vcmask 523264   ;;  %p2825_p6 = scmp.ne.s32.totalorder %s3475_s22, 2 }
  0x18   : > { %3306 = vset.pattern.permute.xlu1 %v3398_v3  ;;  %3305 = vset.pattern.permute.xlu0 %v3398_v3  ;;  %v489_v5 = vld [vmem:[%s3486_s28 + $0xc8] sm:$0xff]  ;;  %v492_v7 = vld [vmem:[%s3486_s28 + $0xe0] sm:$0xff]  ;;  %v495_v8 = vld [vmem:[%s3486_s28 + $0xf8] sm:$0xff] }
  0x19   : > { %610 = vperm.xlu1 %3306, %v490_v1   ;;  %604 = vperm.xlu0 %3305, %v488_v2   ;;  %v493_v6 = vld [vmem:[%s3486_s28 + $0xe8] sm:$0xff]  ;;  %v494_v9 = vld [vmem:[%s3486_s28 + $0xf0] sm:$0xff]  ;;  %v496_v11 = vld [vmem:[%s3491_s13] sm:$0xff] }
  0x1a   : > { %v497_v10 = vld [vmem:[%s3491_s13 + $0x8] sm:$0xff]  ;;  %v464_v13 = vld [vmem:[%s3486_s28] sm:$0xff]  ;;  %v499_v14 = vld [vmem:[%s3491_s13 + $0x18] sm:$0xff] }
  0x1b   : > { %v465_v12 = vld [vmem:[%s3486_s28 + $0x8] sm:$0xff]  ;;  %v3514_v15 = vld [vmem:[%s4137_s0] sm:$0xff]   ;;  %v498_v16 = vld [vmem:[%s3491_s13 + $0x10] sm:$0xff] }
  0x1c   : > { %3276 = vmatprep.subr.bf16.mxu1 %v3514_v15  ;;  %v3521_v17 = vld [vmem:[%s4137_s0 + $0x8] sm:$0xff]   ;;  %3124 = vmatprep.subr.bf16.mxu0 %v3514_v15  ;;  %v467_v18 = vld [vmem:[%s3486_s28 + $0x18] sm:$0xff]  ;;  %v466_v19 = vld [vmem:[%s3486_s28 + $0x10] sm:$0xff] }
  0x1d   : > { %613 = vperm.xlu1 %3306, %v491_v4   ;;  %607 = vperm.xlu0 %3305, %v489_v5   ;;  %v3532_v20 = vld [vmem:[%s4137_s0 + $0x10] sm:$0xff]   ;;  %v3538_v21 = vld [vmem:[%s4137_s0 + $0x18] sm:$0xff]   ;;  %v501_v22 = vld [vmem:[%s3491_s13 + $0x28] sm:$0xff] }
  0x1e   : > { %3280 = vmatpush3.bf16.msra.mxu1 %v3514_v15  ;;  %3125 = vmatpush3.bf16.msra.mxu0 %v3514_v15  ;;  %v500_v23 = vld [vmem:[%s3491_s13 + $0x20] sm:$0xff]  ;;  %v469_v24 = vld [vmem:[%s3486_s28 + $0x28] sm:$0xff]  ;;  %v503_v26 = vld [vmem:[%s3491_s13 + $0x38] sm:$0xff] }
  0x1f   : > { %3277 = vmatprep.subr.bf16.mxu1 %v3521_v17  ;;  %3126 = vmatprep.subr.bf16.mxu0 %v3521_v17  ;;  %v468_v25 = vld [vmem:[%s3486_s28 + $0x20] sm:$0xff]  ;;  %v502_v27 = vld [vmem:[%s3491_s13 + $0x30] sm:$0xff]  ;;  %v471_v28 = vld [vmem:[%s3486_s28 + $0x38] sm:$0xff] }
  0x20   : > { %v470_v29 = vld [vmem:[%s3486_s28 + $0x30] sm:$0xff]  ;;  %v505_v30 = vld [vmem:[%s3491_s13 + $0x48] sm:$0xff]  ;;  %v504_v31 = vld [vmem:[%s3491_s13 + $0x40] sm:$0xff] }
  0x21   : > { %619 = vperm.xlu1 %3306, %v493_v6   ;;  %616 = vperm.xlu0 %3305, %v492_v7   ;;  %v473_v32 = vld [vmem:[%s3486_s28 + $0x48] sm:$0xff]  ;;  %v472_v33 = vld [vmem:[%s3486_s28 + $0x40] sm:$0xff]  ;;  %v507_v34 = vld [vmem:[%s3491_s13 + $0x58] sm:$0xff]  ;;  %v529_v6 = vlaneseq }
  0x22   : > { %3281 = vmatpush3.bf16.msra.mxu1 %v3521_v17  ;;  %3127 = vmatpush3.bf16.msra.mxu0 %v3521_v17  ;;  %v506_v35 = vld [vmem:[%s3491_s13 + $0x50] sm:$0xff]  ;;  %v475_v36 = vld [vmem:[%s3486_s28 + $0x58] sm:$0xff]  ;;  %v509_v38 = vld [vmem:[%s3491_s13 + $0x68] sm:$0xff] }
  0x23   : > { %3278 = vmatprep.subr.bf16.mxu1 %v3532_v20  ;;  %3128 = vmatprep.subr.bf16.mxu0 %v3532_v20  ;;  %v474_v37 = vld [vmem:[%s3486_s28 + $0x50] sm:$0xff]  ;;  %v508_v39 = vld [vmem:[%s3491_s13 + $0x60] sm:$0xff]  ;;  %v477_v40 = vld [vmem:[%s3486_s28 + $0x68] sm:$0xff]  ;;  %v3600_v7 = vand.u32 127, %v529_v6 }
  0x24   : > { %v476_v41 = vld [vmem:[%s3486_s28 + $0x60] sm:$0xff]  ;;  %v511_v42 = vld [vmem:[%s3491_s13 + $0x78] sm:$0xff]  ;;  %v510_v43 = vld [vmem:[%s3491_s13 + $0x70] sm:$0xff] }
  0x25   : > { %625 = vperm.xlu1 %3306, %v495_v8   ;;  %622 = vperm.xlu0 %3305, %v494_v9   ;;  %v479_v44 = vld [vmem:[%s3486_s28 + $0x78] sm:$0xff]  ;;  %v478_v45 = vld [vmem:[%s3486_s28 + $0x70] sm:$0xff]  ;;  %v513_v46 = vld [vmem:[%s3491_s13 + $0x88] sm:$0xff] }
  0x26   : > { %3282 = vmatpush3.bf16.msra.mxu1 %v3532_v20  ;;  %3129 = vmatpush3.bf16.msra.mxu0 %v3532_v20  ;;  %v512_v47 = vld [vmem:[%s3491_s13 + $0x80] sm:$0xff]  ;;  %v481_v48 = vld [vmem:[%s3486_s28 + $0x88] sm:$0xff]  ;;  %v515_v50 = vld [vmem:[%s3491_s13 + $0x98] sm:$0xff] }
  0x27   : > { %3279 = vmatprep.subr.bf16.mxu1 %v3538_v21  ;;  %3130 = vmatprep.subr.bf16.mxu0 %v3538_v21  ;;  %v480_v49 = vld [vmem:[%s3486_s28 + $0x80] sm:$0xff]  ;;  %v514_v51 = vld [vmem:[%s3491_s13 + $0x90] sm:$0xff]  ;;  %v483_v52 = vld [vmem:[%s3486_s28 + $0x98] sm:$0xff] }
  0x28   : > { %v482_v53 = vld [vmem:[%s3486_s28 + $0x90] sm:$0xff]  ;;  %v517_v54 = vld [vmem:[%s3491_s13 + $0xa8] sm:$0xff]  ;;  %v516_v55 = vld [vmem:[%s3491_s13 + $0xa0] sm:$0xff] }
  0x29   : > { %743 = vperm.xlu1 %3306, %v497_v10   ;;  %740 = vperm.xlu0 %3305, %v496_v11   ;;  %v485_v56 = vld [vmem:[%s3486_s28 + $0xa8] sm:$0xff]  ;;  %v484_v57 = vld [vmem:[%s3486_s28 + $0xa0] sm:$0xff]  ;;  %v519_v58 = vld [vmem:[%s3491_s13 + $0xb8] sm:$0xff] }
  0x2a   : > { %3283 = vmatpush3.bf16.msra.mxu1 %v3538_v21  ;;  %3131 = vmatpush3.bf16.msra.mxu0 %v3538_v21  ;;  %v518_v59 = vld [vmem:[%s3491_s13 + $0xb0] sm:$0xff]  ;;  %v487_v60 = vld [vmem:[%s3486_s28 + $0xb8] sm:$0xff]  ;;  %v521_v62 = vld [vmem:[%s3491_s13 + $0xc8] sm:$0xff] }
  0x2b   : > { %3164 = vmatprep.subr.bf16.mxu1 %v3514_v15  ;;  %v486_v61 = vld [vmem:[%s3486_s28 + $0xb0] sm:$0xff]  ;;  %v520_v63 = vld [vmem:[%s3491_s13 + $0xc0] sm:$0xff]  ;;  %v523_v0 = vld [vmem:[%s3491_s13 + $0xd8] sm:$0xff] }
  0x2c   : > { %v522_v1 = vld [vmem:[%s3491_s13 + $0xd0] sm:$0xff]  ;;  %v525_v2 = vld [vmem:[%s3491_s13 + $0xe8] sm:$0xff]  ;;  %v524_v3 = vld [vmem:[%s3491_s13 + $0xe0] sm:$0xff] }
  0x2d   : > { %535 = vperm.xlu1 %3306, %v465_v12   ;;  %532 = vperm.xlu0 %3305, %v464_v13   ;;  %v527_v4 = vld [vmem:[%s3491_s13 + $0xf8] sm:$0xff]  ;;  %v526_v5 = vld [vmem:[%s3491_s13 + $0xf0] sm:$0xff]  ;;  %v3311_v10 = vld [vmem:[%s4141_s4 + $0x40] sm:$0xff]   ;;  %v3399_v13 = vmov 0.0  }
  0x2e   : > { %2896 = vmatprep.subr.bf16.mxu0 %v3311_v10 }
  0x31   : > { %749 = vperm.xlu1 %3306, %v499_v14   ;;  %746 = vperm.xlu0 %3305, %v498_v16  }
  0x35   : > { %541 = vperm.xlu1 %3306, %v467_v18   ;;  %538 = vperm.xlu0 %3305, %v466_v19  }
  0x39   : > { %755 = vperm.xlu1 %3306, %v501_v22   ;;  %752 = vperm.xlu0 %3305, %v500_v23  }
  0x3d   : > { %547 = vperm.xlu1 %3306, %v469_v24   ;;  %544 = vperm.xlu0 %3305, %v468_v25  }
  0x41   : > { %761 = vperm.xlu1 %3306, %v503_v26   ;;  %758 = vperm.xlu0 %3305, %v502_v27  }
  0x45   : > { %553 = vperm.xlu1 %3306, %v471_v28   ;;  %550 = vperm.xlu0 %3305, %v470_v29  }
  0x49   : > { %767 = vperm.xlu1 %3306, %v505_v30   ;;  %764 = vperm.xlu0 %3305, %v504_v31  }
  0x4d   : > { %559 = vperm.xlu1 %3306, %v473_v32   ;;  %556 = vperm.xlu0 %3305, %v472_v33  }
  0x51   : > { %773 = vperm.xlu1 %3306, %v507_v34   ;;  %770 = vperm.xlu0 %3305, %v506_v35  }
  0x55   : > { %565 = vperm.xlu1 %3306, %v475_v36   ;;  %562 = vperm.xlu0 %3305, %v474_v37  }
  0x59   : > { %779 = vperm.xlu1 %3306, %v509_v38   ;;  %776 = vperm.xlu0 %3305, %v508_v39  }
  0x5d   : > { %571 = vperm.xlu1 %3306, %v477_v40   ;;  %568 = vperm.xlu0 %3305, %v476_v41  }
  0x61   : > { %785 = vperm.xlu1 %3306, %v511_v42   ;;  %782 = vperm.xlu0 %3305, %v510_v43  }
  0x65   : > { %577 = vperm.xlu1 %3306, %v479_v44   ;;  %574 = vperm.xlu0 %3305, %v478_v45  }
  0x69   : > { %791 = vperm.xlu1 %3306, %v513_v46   ;;  %788 = vperm.xlu0 %3305, %v512_v47  }
  0x6d   : > { %583 = vperm.xlu1 %3306, %v481_v48   ;;  %580 = vperm.xlu0 %3305, %v480_v49  }
  0x71   : > { %797 = vperm.xlu1 %3306, %v515_v50   ;;  %794 = vperm.xlu0 %3305, %v514_v51  }
  0x75   : > { %589 = vperm.xlu1 %3306, %v483_v52   ;;  %586 = vperm.xlu0 %3305, %v482_v53   ;;  %v3312_v53 = vld [vmem:[%s4141_s4] sm:$0xff]  }
  0x79   : > { %803 = vperm.xlu1 %3306, %v517_v54   ;;  %800 = vperm.xlu0 %3305, %v516_v55   ;;  %v3313_v55 = vld [vmem:[%s4141_s4 + $0x48] sm:$0xff]  }
  0x7d   : > { %595 = vperm.xlu1 %3306, %v485_v56   ;;  %592 = vperm.xlu0 %3305, %v484_v57  }
  0x81   : > { %809 = vperm.xlu1 %3306, %v519_v58   ;;  %806 = vperm.xlu0 %3305, %v518_v59  }
  0x85   : > { %601 = vperm.xlu1 %3306, %v487_v60   ;;  %598 = vperm.xlu0 %3305, %v486_v61   ;;  %v3314_v60 = vld [vmem:[%s4141_s4 + $0x8] sm:$0xff]  }
  0x89   : > { %815 = vperm.xlu1 %3306, %v521_v62   ;;  %812 = vperm.xlu0 %3305, %v520_v63  }
  0x8d   : > { %821 = vperm.xlu1 %3306, %v523_v0   ;;  %818 = vperm.xlu0 %3305, %v522_v1  }
  0x91   : > { %827 = vperm.xlu1 %3306, %v525_v2   ;;  %824 = vperm.xlu0 %3305, %v524_v3  }
  0x95   : > { %833 = vperm.xlu1 %3306, %v527_v4   ;;  %830 = vperm.xlu0 %3305, %v526_v5  }
  0x98   : > { %v611_v8 = vpop.permute.xlu1 %610  ;;  %v605_v9 = vpop.permute.xlu0 %604 }
  0x99   : > { %vm653_vm0 = vcmp.eq.s32.totalorder %v3600_v7, %v611_v8  ;;  %vm651_vm1 = vcmp.eq.s32.totalorder %v3600_v7, %v605_v9 }
  0x9a   : > { %v2693_v14 = vsel %vm653_vm0, 1.0, %v3399_v13  ;;  %v2691_v16 = vsel %vm651_vm1, 1.0, %v3399_v13 }
  0x9c   : > { %v614_v11 = vpop.permute.xlu1 %613  ;;  %v608_v12 = vpop.permute.xlu0 %607 }
  0x9d   : > { %vm654_vm2 = vcmp.eq.s32.totalorder %v3600_v7, %v614_v11  ;;  %vm652_vm3 = vcmp.eq.s32.totalorder %v3600_v7, %v608_v12 }
  0x9e   : > { %v2694_v18 = vsel %vm654_vm2, 1.0, %v3399_v13  ;;  %v2692_v19 = vsel %vm652_vm3, 1.0, %v3399_v13 }
  0x9f   : > { %v736_v22 = vpack.c.bf16 %v2694_v18, %v2693_v14  ;;  %v735_v23 = vpack.c.bf16 %v2692_v19, %v2691_v16 }
  0xa0   : > { %v620_v24 = vpop.permute.xlu1 %619  ;;  %v617_v25 = vpop.permute.xlu0 %616 }
  0xa1   : > { %vm656_vm5 = vcmp.eq.s32.totalorder %v3600_v7, %v620_v24  ;;  %vm655_vm6 = vcmp.eq.s32.totalorder %v3600_v7, %v617_v25  ;;  %3156 = vmatprep.mubr.msk.bf16.mxu1 %vm1044_vm4, %v735_v23 }
  0xa2   : > { %v2696_v26 = vsel %vm656_vm5, 1.0, %v3399_v13  ;;  %v2695_v27 = vsel %vm655_vm6, 1.0, %v3399_v13  ;;  %3157 = vmatmul.mubr.msk.bf16.vlgmr.msra.gmra.mrb[0].mxu1 %vm1044_vm4, %v736_v22 }
  0xa3   : > { %v737_v28 = vpack.c.bf16 %v2696_v26, %v2695_v27  ;;  %3165 = vmatpush3.bf16.msra.mxu1 %v3514_v15 }
  0xa4   : > { %v626_v29 = vpop.permute.xlu1 %625  ;;  %v623_v30 = vpop.permute.xlu0 %622  ;;  %3166 = vmatprep.subr.bf16.mxu1 %v3521_v17 }
  0xa5   : > { %vm658_vm7 = vcmp.eq.s32.totalorder %v3600_v7, %v626_v29  ;;  %vm657_vm8 = vcmp.eq.s32.totalorder %v3600_v7, %v623_v30  ;;  %3160 = vmatprep.mubr.msk.bf16.mxu1 %vm1044_vm4, %v737_v28 }
  0xa6   : > { %v2698_v31 = vsel %vm658_vm7, 1.0, %v3399_v13  ;;  %v2697_v32 = vsel %vm657_vm8, 1.0, %v3399_v13 }
  0xa7   : > { %v738_v33 = vpack.c.bf16 %v2698_v31, %v2697_v32  ;;  %3167 = vmatpush3.bf16.msra.mxu1 %v3521_v17 }
  0xa8   : > { %v744_v34 = vpop.permute.xlu1 %743  ;;  %v741_v35 = vpop.permute.xlu0 %740  ;;  %3168 = vmatprep.subr.bf16.mxu1 %v3532_v20 }
  0xa9   : > { %vm836_vm9 = vcmp.eq.s32.totalorder %v3600_v7, %v744_v34  ;;  %vm835_vm10 = vcmp.eq.s32.totalorder %v3600_v7, %v741_v35 }
  0xaa   : > { %v2700_v36 = vsel %vm836_vm9, 1.0, %v3399_v13  ;;  %v2699_v37 = vsel %vm835_vm10, 1.0, %v3399_v13  ;;  %3161 = vmatmul.mubr.msk.bf16.gmra.mrb[4].mxu1 %vm1044_vm4, %v738_v33 }
  0xab   : > { %v931_v38 = vpack.c.bf16 %v2700_v36, %v2699_v37  ;;  %3169 = vmatpush3.bf16.msra.mxu1 %v3532_v20 }
  0xac   : > { %v536_v39 = vpop.permute.xlu1 %535  ;;  %v533_v40 = vpop.permute.xlu0 %532  ;;  %3170 = vmatprep.subr.bf16.mxu1 %v3538_v21 }
  0xad   : > { %vm628_vm11 = vcmp.eq.s32.totalorder %v3600_v7, %v536_v39  ;;  %vm627_vm12 = vcmp.eq.s32.totalorder %v3600_v7, %v533_v40  ;;  %3172 = vmatprep.mubr.msk.bf16.mxu1 %vm1044_vm4, %v931_v38 }
  0xae   : > { %v2668_v41 = vsel %vm628_vm11, 1.0, %v3399_v13  ;;  %v2667_v42 = vsel %vm627_vm12, 1.0, %v3399_v13 }
  0xaf   : > { %v723_v43 = vpack.c.bf16 %v2668_v41, %v2667_v42  ;;  %3171 = vmatpush3.bf16.msra.mxu1 %v3538_v21 }
  0xb0   : > { %v750_v44 = vpop.permute.xlu1 %749  ;;  %v747_v45 = vpop.permute.xlu0 %746 }
  0xb1   : > { %vm838_vm13 = vcmp.eq.s32.totalorder %v3600_v7, %v750_v44  ;;  %vm837_vm14 = vcmp.eq.s32.totalorder %v3600_v7, %v747_v45  ;;  %3132 = vmatprep.mubr.msk.bf16.mxu0 %vm1044_vm4, %v723_v43 }
  0xb2   : > { %v2702_v46 = vsel %vm838_vm13, 1.0, %v3399_v13  ;;  %v2701_v47 = vsel %vm837_vm14, 1.0, %v3399_v13 }
  0xb3   : > { %v932_v48 = vpack.c.bf16 %v2702_v46, %v2701_v47 }
  0xb4   : > { %v542_v49 = vpop.permute.xlu1 %541  ;;  %v539_v50 = vpop.permute.xlu0 %538 }
  0xb5   : > { %vm630_vm15 = vcmp.eq.s32.totalorder %v3600_v7, %v542_v49  ;;  %vm629_vm0 = vcmp.eq.s32.totalorder %v3600_v7, %v539_v50  ;;  %3173 = vmatmul.mubr.msk.bf16.vlgmr.msra.gmra.mrb[8].mxu1 %vm1044_vm4, %v932_v48 }
  0xb6   : > { %v2670_v51 = vsel %vm630_vm15, 1.0, %v3399_v13  ;;  %v2669_v52 = vsel %vm629_vm0, 1.0, %v3399_v13 }
  0xb7   : > { %v724_v54 = vpack.c.bf16 %v2670_v51, %v2669_v52 }
  0xb8   : > { %v756_v56 = vpop.permute.xlu1 %755  ;;  %v753_v57 = vpop.permute.xlu0 %752 }
  0xb9   : > { %vm840_vm1 = vcmp.eq.s32.totalorder %v3600_v7, %v756_v56  ;;  %vm839_vm2 = vcmp.eq.s32.totalorder %v3600_v7, %v753_v57  ;;  %3133 = vmatmul.mubr.msk.bf16.vlgmr.msra.gmra.mrb[0].mxu0 %vm1044_vm4, %v724_v54 }
  0xba   : > { %v2704_v58 = vsel %vm840_vm1, 1.0, %v3399_v13  ;;  %v2703_v59 = vsel %vm839_vm2, 1.0, %v3399_v13  ;;  %2897 = vmatpush3.bf16.msra.mxu0 %v3312_v53 }
  0xbb   : > { %v933_v61 = vpack.c.bf16 %v2704_v58, %v2703_v59  ;;  %2898 = vmatprep.subr.bf16.mxu0 %v3313_v55 }
  0xbc   : > { %v548_v62 = vpop.permute.xlu1 %547  ;;  %v545_v63 = vpop.permute.xlu0 %544 }
  0xbd   : > { %vm632_vm3 = vcmp.eq.s32.totalorder %v3600_v7, %v548_v62  ;;  %vm631_vm5 = vcmp.eq.s32.totalorder %v3600_v7, %v545_v63  ;;  %3176 = vmatprep.mubr.msk.bf16.mxu1 %vm1044_vm4, %v933_v61 }
  0xbe   : > { %v2672_v0 = vsel %vm632_vm3, 1.0, %v3399_v13  ;;  %v2671_v1 = vsel %vm631_vm5, 1.0, %v3399_v13  ;;  %2899 = vmatpush3.bf16.msra.mxu0 %v3314_v60 }
  0xbf   : > { %v725_v2 = vpack.c.bf16 %v2672_v0, %v2671_v1 }
  0xc0   : > { %v762_v3 = vpop.permute.xlu1 %761  ;;  %v759_v4 = vpop.permute.xlu0 %758 }
  0xc1   : > { %vm842_vm6 = vcmp.eq.s32.totalorder %v3600_v7, %v762_v3  ;;  %vm841_vm7 = vcmp.eq.s32.totalorder %v3600_v7, %v759_v4  ;;  %3136 = vmatprep.mubr.msk.bf16.mxu0 %vm1044_vm4, %v725_v2 }
  0xc2   : > { %v2706_v5 = vsel %vm842_vm6, 1.0, %v3399_v13  ;;  %v2705_v8 = vsel %vm841_vm7, 1.0, %v3399_v13 }
  0xc3   : > { %v934_v9 = vpack.c.bf16 %v2706_v5, %v2705_v8 }
  0xc4   : > { %v554_v10 = vpop.permute.xlu1 %553  ;;  %v551_v11 = vpop.permute.xlu0 %550 }
  0xc5   : > { %vm634_vm8 = vcmp.eq.s32.totalorder %v3600_v7, %v554_v10  ;;  %vm633_vm9 = vcmp.eq.s32.totalorder %v3600_v7, %v551_v11  ;;  %3177 = vmatmul.mubr.msk.bf16.gmra.mrb[12].mxu1 %vm1044_vm4, %v934_v9 }
  0xc6   : > { %v2674_v12 = vsel %vm634_vm8, 1.0, %v3399_v13  ;;  %v2673_v14 = vsel %vm633_vm9, 1.0, %v3399_v13 }
  0xc7   : > { %v726_v16 = vpack.c.bf16 %v2674_v12, %v2673_v14 }
  0xc8   : > { %v768_v18 = vpop.permute.xlu1 %767  ;;  %v765_v19 = vpop.permute.xlu0 %764 }
  0xc9   : > { %vm844_vm10 = vcmp.eq.s32.totalorder %v3600_v7, %v768_v18  ;;  %vm843_vm11 = vcmp.eq.s32.totalorder %v3600_v7, %v765_v19  ;;  %3137 = vmatmul.mubr.msk.bf16.gmra.mrb[4].mxu0 %vm1044_vm4, %v726_v16 }
  0xca   : > { %v2708_v22 = vsel %vm844_vm10, 1.0, %v3399_v13  ;;  %v2707_v23 = vsel %vm843_vm11, 1.0, %v3399_v13 }
  0xcb   : > { %v935_v24 = vpack.c.bf16 %v2708_v22, %v2707_v23  ;;  %v3315_v22 = vld [vmem:[%s4141_s4 + $0x50] sm:$0xff]  }
  0xcc   : > { %v560_v25 = vpop.permute.xlu1 %559  ;;  %v557_v26 = vpop.permute.xlu0 %556  ;;  %2900 = vmatprep.subr.bf16.mxu0 %v3315_v22 }
  0xcd   : > { %vm636_vm12 = vcmp.eq.s32.totalorder %v3600_v7, %v560_v25  ;;  %vm635_vm13 = vcmp.eq.s32.totalorder %v3600_v7, %v557_v26  ;;  %3180 = vmatprep.mubr.msk.bf16.mxu1 %vm1044_vm4, %v935_v24  ;;  %v3316_v26 = vld [vmem:[%s4141_s4 + $0x10] sm:$0xff]  }
  0xce   : > { %v2676_v27 = vsel %vm636_vm12, 1.0, %v3399_v13  ;;  %v2675_v28 = vsel %vm635_vm13, 1.0, %v3399_v13  ;;  %2901 = vmatpush3.bf16.msra.mxu0 %v3316_v26 }
  0xcf   : > { %v727_v29 = vpack.c.bf16 %v2676_v27, %v2675_v28  ;;  %v3317_v27 = vld [vmem:[%s4141_s4 + $0x58] sm:$0xff]  }
  0xd0   : > { %v774_v30 = vpop.permute.xlu1 %773  ;;  %v771_v31 = vpop.permute.xlu0 %770  ;;  %2902 = vmatprep.subr.bf16.mxu0 %v3317_v27 }
  0xd1   : > { %vm846_vm14 = vcmp.eq.s32.totalorder %v3600_v7, %v774_v30  ;;  %vm845_vm15 = vcmp.eq.s32.totalorder %v3600_v7, %v771_v31  ;;  %3140 = vmatprep.mubr.msk.bf16.mxu0 %vm1044_vm4, %v727_v29 }
  0xd2   : > { %v2710_v32 = vsel %vm846_vm14, 1.0, %v3399_v13  ;;  %v2709_v33 = vsel %vm845_vm15, 1.0, %v3399_v13 }
  0xd3   : > { %v936_v34 = vpack.c.bf16 %v2710_v32, %v2709_v33  ;;  %v3318_v33 = vld [vmem:[%s4141_s4 + $0x18] sm:$0xff]  }
  0xd4   : > { %v566_v35 = vpop.permute.xlu1 %565  ;;  %v563_v36 = vpop.permute.xlu0 %562  ;;  %2903 = vmatpush3.bf16.msra.mxu0 %v3318_v33 }
  0xd5   : > { %vm638_vm0 = vcmp.eq.s32.totalorder %v3600_v7, %v566_v35  ;;  %vm637_vm1 = vcmp.eq.s32.totalorder %v3600_v7, %v563_v36  ;;  %3181 = vmatmul.mubr.msk.bf16.gmra.mrb[16].mxu1 %vm1044_vm4, %v936_v34 }
  0xd6   : > { %v2678_v37 = vsel %vm638_vm0, 1.0, %v3399_v13  ;;  %v2677_v38 = vsel %vm637_vm1, 1.0, %v3399_v13 }
  0xd7   : > { %v728_v39 = vpack.c.bf16 %v2678_v37, %v2677_v38 }
  0xd8   : > { %v780_v40 = vpop.permute.xlu1 %779  ;;  %v777_v41 = vpop.permute.xlu0 %776 }
  0xd9   : > { %vm848_vm2 = vcmp.eq.s32.totalorder %v3600_v7, %v780_v40  ;;  %vm847_vm3 = vcmp.eq.s32.totalorder %v3600_v7, %v777_v41  ;;  %3141 = vmatmul.mubr.msk.bf16.gmra.mrb[8].mxu0 %vm1044_vm4, %v728_v39  ;;  %v3319_v39 = vld [vmem:[%s4141_s4 + $0x60] sm:$0xff]   ;;  %v3321_v41 = vld [vmem:[%s4141_s4 + $0x68] sm:$0xff]  }
  0xda   : > { %v2712_v42 = vsel %vm848_vm2, 1.0, %v3399_v13  ;;  %v2711_v43 = vsel %vm847_vm3, 1.0, %v3399_v13  ;;  %v3320_v40 = vld [vmem:[%s4141_s4 + $0x20] sm:$0xff]   ;;  %2904 = vmatprep.subr.bf16.mxu0 %v3319_v39  ;;  %v3329_v39 = vld [vmem:[%s4143_s6 + $0x10] sm:$0xff]  }
  0xdb   : > { %v937_v44 = vpack.c.bf16 %v2712_v42, %v2711_v43  ;;  %2905 = vmatpush3.bf16.msra.mxu0 %v3320_v40 }
  0xdc   : > { %v572_v45 = vpop.permute.xlu1 %571  ;;  %v569_v46 = vpop.permute.xlu0 %568  ;;  %2906 = vmatprep.subr.bf16.mxu0 %v3321_v41 }
  0xdd   : > { %vm640_vm5 = vcmp.eq.s32.totalorder %v3600_v7, %v572_v45  ;;  %vm639_vm6 = vcmp.eq.s32.totalorder %v3600_v7, %v569_v46  ;;  %3184 = vmatprep.mubr.msk.bf16.mxu1 %vm1044_vm4, %v937_v44  ;;  %v3322_v45 = vld [vmem:[%s4141_s4 + $0x28] sm:$0xff]  }
  0xde   : > { %v2680_v47 = vsel %vm640_vm5, 1.0, %v3399_v13  ;;  %v2679_v48 = vsel %vm639_vm6, 1.0, %v3399_v13 }
  0xdf   : > { %v729_v49 = vpack.c.bf16 %v2680_v47, %v2679_v48  ;;  %2907 = vmatpush3.bf16.msra.mxu0 %v3322_v45 }
  0xe0   : > { %v786_v50 = vpop.permute.xlu1 %785  ;;  %v783_v51 = vpop.permute.xlu0 %782 }
  0xe1   : > { %vm850_vm7 = vcmp.eq.s32.totalorder %v3600_v7, %v786_v50  ;;  %vm849_vm8 = vcmp.eq.s32.totalorder %v3600_v7, %v783_v51  ;;  %3144 = vmatprep.mubr.msk.bf16.mxu0 %vm1044_vm4, %v729_v49 }
  0xe2   : > { %v2714_v52 = vsel %vm850_vm7, 1.0, %v3399_v13  ;;  %v2713_v53 = vsel %vm849_vm8, 1.0, %v3399_v13 }
  0xe3   : > { %v938_v54 = vpack.c.bf16 %v2714_v52, %v2713_v53  ;;  %v3323_v53 = vld [vmem:[%s4141_s4 + $0x70] sm:$0xff]  }
  0xe4   : > { %v578_v55 = vpop.permute.xlu1 %577  ;;  %v575_v56 = vpop.permute.xlu0 %574  ;;  %2908 = vmatprep.subr.bf16.mxu0 %v3323_v53 }
  0xe5   : > { %vm642_vm9 = vcmp.eq.s32.totalorder %v3600_v7, %v578_v55  ;;  %vm641_vm10 = vcmp.eq.s32.totalorder %v3600_v7, %v575_v56  ;;  %3185 = vmatmul.mubr.msk.bf16.gmra.mrb[20].mxu1 %vm1044_vm4, %v938_v54  ;;  %v3324_v54 = vld [vmem:[%s4141_s4 + $0x30] sm:$0xff]  }
  0xe6   : > { %v2682_v57 = vsel %vm642_vm9, 1.0, %v3399_v13  ;;  %v2681_v58 = vsel %vm641_vm10, 1.0, %v3399_v13  ;;  %2909 = vmatpush3.bf16.msra.mxu0 %v3324_v54 }
  0xe7   : > { %v730_v59 = vpack.c.bf16 %v2682_v57, %v2681_v58 }
  0xe8   : > { %v792_v60 = vpop.permute.xlu1 %791  ;;  %v789_v61 = vpop.permute.xlu0 %788 }
  0xe9   : > { %vm852_vm11 = vcmp.eq.s32.totalorder %v3600_v7, %v792_v60  ;;  %vm851_vm12 = vcmp.eq.s32.totalorder %v3600_v7, %v789_v61  ;;  %3145 = vmatmul.mubr.msk.bf16.gmra.mrb[12].mxu0 %vm1044_vm4, %v730_v59  ;;  %v3325_v60 = vld [vmem:[%s4141_s4 + $0x78] sm:$0xff]  }
  0xea   : > { %v2716_v62 = vsel %vm852_vm11, 1.0, %v3399_v13  ;;  %v2715_v63 = vsel %vm851_vm12, 1.0, %v3399_v13  ;;  %v3326_v61 = vld [vmem:[%s4141_s4 + $0x38] sm:$0xff]   ;;  %2910 = vmatprep.subr.bf16.mxu0 %v3325_v60 }
  0xeb   : > { %v939_v0 = vpack.c.bf16 %v2716_v62, %v2715_v63  ;;  %2911 = vmatpush3.bf16.msra.mxu0 %v3326_v61 }
  0xec   : > { %v584_v1 = vpop.permute.xlu1 %583  ;;  %v581_v2 = vpop.permute.xlu0 %580 }
  0xed   : > { %vm644_vm13 = vcmp.eq.s32.totalorder %v3600_v7, %v584_v1  ;;  %vm643_vm14 = vcmp.eq.s32.totalorder %v3600_v7, %v581_v2  ;;  %3188 = vmatprep.mubr.msk.bf16.mxu1 %vm1044_vm4, %v939_v0 }
  0xee   : > { %v2684_v3 = vsel %vm644_vm13, 1.0, %v3399_v13  ;;  %v2683_v4 = vsel %vm643_vm14, 1.0, %v3399_v13 }
  0xef   : > { %v731_v5 = vpack.c.bf16 %v2684_v3, %v2683_v4 }
  0xf0   : > { %v798_v8 = vpop.permute.xlu1 %797  ;;  %v795_v9 = vpop.permute.xlu0 %794 }
  0xf1   : > { %vm854_vm15 = vcmp.eq.s32.totalorder %v3600_v7, %v798_v8  ;;  %vm853_vm0 = vcmp.eq.s32.totalorder %v3600_v7, %v795_v9  ;;  %3148 = vmatprep.mubr.msk.bf16.mxu0 %vm1044_vm4, %v731_v5 }
  0xf2   : > { %v2718_v10 = vsel %vm854_vm15, 1.0, %v3399_v13  ;;  %v2717_v11 = vsel %vm853_vm0, 1.0, %v3399_v13 }
  0xf3   : > { %v940_v12 = vpack.c.bf16 %v2718_v10, %v2717_v11 }
  0xf4   : > { %v590_v14 = vpop.permute.xlu1 %589  ;;  %v587_v16 = vpop.permute.xlu0 %586 }
  0xf5   : > { %vm646_vm1 = vcmp.eq.s32.totalorder %v3600_v7, %v590_v14  ;;  %vm645_vm2 = vcmp.eq.s32.totalorder %v3600_v7, %v587_v16  ;;  %3189 = vmatmul.mubr.msk.bf16.gmra.mrb[24].mxu1 %vm1044_vm4, %v940_v12 }
  0xf6   : > { %v2686_v18 = vsel %vm646_vm1, 1.0, %v3399_v13  ;;  %v2685_v19 = vsel %vm645_vm2, 1.0, %v3399_v13 }
  0xf7   : > { %v732_v23 = vpack.c.bf16 %v2686_v18, %v2685_v19 }
  0xf8   : > { %v804_v24 = vpop.permute.xlu1 %803  ;;  %v801_v25 = vpop.permute.xlu0 %800 }
  0xf9   : > { %vm856_vm3 = vcmp.eq.s32.totalorder %v3600_v7, %v804_v24  ;;  %vm855_vm5 = vcmp.eq.s32.totalorder %v3600_v7, %v801_v25  ;;  %3149 = vmatmul.mubr.msk.bf16.gmra.mrb[16].mxu0 %vm1044_vm4, %v732_v23 }
  0xfa   : > { %v2720_v28 = vsel %vm856_vm3, 1.0, %v3399_v13  ;;  %v2719_v29 = vsel %vm855_vm5, 1.0, %v3399_v13 }
  0xfb   : > { %v941_v30 = vpack.c.bf16 %v2720_v28, %v2719_v29 }
  0xfc   : > { %v596_v31 = vpop.permute.xlu1 %595  ;;  %v593_v32 = vpop.permute.xlu0 %592 }
  0xfd   : > { %vm648_vm6 = vcmp.eq.s32.totalorder %v3600_v7, %v596_v31  ;;  %vm647_vm7 = vcmp.eq.s32.totalorder %v3600_v7, %v593_v32  ;;  %3192 = vmatprep.mubr.msk.bf16.mxu1 %vm1044_vm4, %v941_v30  ;;  %v3327_v31 = vld [vmem:[%s4143_s6] sm:$0xff]   ;;  %v3328_v32 = vld [vmem:[%s4143_s6 + $0x8] sm:$0xff]  }
  0xfe   : > { %v2688_v34 = vsel %vm648_vm6, 1.0, %v3399_v13  ;;  %v2687_v35 = vsel %vm647_vm7, 1.0, %v3399_v13  ;;  %3204 = vmatprep.subr.bf16.mxu1 %v3327_v31 }
  0xff   : > { %v733_v36 = vpack.c.bf16 %v2688_v34, %v2687_v35  ;;  %3205 = vmatpush3.bf16.msra.mxu1 %v3327_v31 }
 0x100   : > { %v810_v37 = vpop.permute.xlu1 %809  ;;  %v807_v38 = vpop.permute.xlu0 %806  ;;  %3206 = vmatprep.subr.bf16.mxu1 %v3328_v32 }
 0x101   : > { %vm858_vm8 = vcmp.eq.s32.totalorder %v3600_v7, %v810_v37  ;;  %vm857_vm9 = vcmp.eq.s32.totalorder %v3600_v7, %v807_v38  ;;  %3152 = vmatprep.mubr.msk.bf16.mxu0 %vm1044_vm4, %v733_v36 }
 0x102   : > { %v2722_v42 = vsel %vm858_vm8, 1.0, %v3399_v13  ;;  %v2721_v43 = vsel %vm857_vm9, 1.0, %v3399_v13 }
 0x103   : > { %v942_v44 = vpack.c.bf16 %v2722_v42, %v2721_v43  ;;  %3207 = vmatpush3.bf16.msra.mxu1 %v3328_v32 }
 0x104   : > { %v602_v46 = vpop.permute.xlu1 %601  ;;  %v599_v47 = vpop.permute.xlu0 %598  ;;  %3208 = vmatprep.subr.bf16.mxu1 %v3329_v39 }
 0x105   : > { %vm650_vm10 = vcmp.eq.s32.totalorder %v3600_v7, %v602_v46  ;;  %vm649_vm11 = vcmp.eq.s32.totalorder %v3600_v7, %v599_v47  ;;  %3193 = vmatmul.mubr.msk.bf16.gmra.mrb[28].mxu1 %vm1044_vm4, %v942_v44 }
 0x106   : > { %v2690_v48 = vsel %vm650_vm10, 1.0, %v3399_v13  ;;  %v2689_v49 = vsel %vm649_vm11, 1.0, %v3399_v13 }
 0x107   : > { %v734_v50 = vpack.c.bf16 %v2690_v48, %v2689_v49  ;;  %3209 = vmatpush3.bf16.msra.mxu1 %v3329_v39 }
 0x108   : > { %v816_v51 = vpop.permute.xlu1 %815  ;;  %v813_v52 = vpop.permute.xlu0 %812 }
 0x109   : > { %vm860_vm12 = vcmp.eq.s32.totalorder %v3600_v7, %v816_v51  ;;  %vm859_vm13 = vcmp.eq.s32.totalorder %v3600_v7, %v813_v52  ;;  %3153 = vmatmul.mubr.msk.bf16.gmra.mrb[20].mxu0 %vm1044_vm4, %v734_v50 }
 0x10a   : > { %v2724_v55 = vsel %vm860_vm12, 1.0, %v3399_v13  ;;  %v2723_v56 = vsel %vm859_vm13, 1.0, %v3399_v13 }
 0x10b   : > { %v943_v57 = vpack.c.bf16 %v2724_v55, %v2723_v56 }
 0x10c   : > { %v822_v58 = vpop.permute.xlu1 %821  ;;  %v819_v59 = vpop.permute.xlu0 %818 }
 0x10d   : > { %vm862_vm14 = vcmp.eq.s32.totalorder %v3600_v7, %v822_v58  ;;  %vm861_vm15 = vcmp.eq.s32.totalorder %v3600_v7, %v819_v59  ;;  %3196 = vmatprep.mubr.msk.bf16.mxu1 %vm1044_vm4, %v943_v57 }
 0x10e   : > { %v2726_v62 = vsel %vm862_vm14, 1.0, %v3399_v13  ;;  %v2725_v63 = vsel %vm861_vm15, 1.0, %v3399_v13 }
 0x10f   : > { %v944_v0 = vpack.c.bf16 %v2726_v62, %v2725_v63 }
 0x110   : > { %v828_v1 = vpop.permute.xlu1 %827  ;;  %v825_v2 = vpop.permute.xlu0 %824 }
 0x111   : > { %vm864_vm0 = vcmp.eq.s32.totalorder %v3600_v7, %v828_v1  ;;  %vm863_vm1 = vcmp.eq.s32.totalorder %v3600_v7, %v825_v2  ;;  %3197 = vmatmul.mubr.msk.bf16.gmra.mrb[32].mxu1 %vm1044_vm4, %v944_v0 }
 0x112   : > { %v2728_v3 = vsel %vm864_vm0, 1.0, %v3399_v13  ;;  %v2727_v4 = vsel %vm863_vm1, 1.0, %v3399_v13 }
 0x113   : > { %v945_v5 = vpack.c.bf16 %v2728_v3, %v2727_v4 }
 0x114   : > { %v834_v8 = vpop.permute.xlu1 %833  ;;  %v831_v9 = vpop.permute.xlu0 %830 }
 0x115   : > { %vm866_vm2 = vcmp.eq.s32.totalorder %v3600_v7, %v834_v8  ;;  %vm865_vm3 = vcmp.eq.s32.totalorder %v3600_v7, %v831_v9  ;;  %3200 = vmatprep.mubr.msk.bf16.mxu1 %vm1044_vm4, %v945_v5 }
 0x116   : > { %v2730_v10 = vsel %vm866_vm2, 1.0, %v3399_v13  ;;  %v2729_v11 = vsel %vm865_vm3, 1.0, %v3399_v13 }
 0x117   : > { %v946_v12 = vpack.c.bf16 %v2730_v10, %v2729_v11 }
 0x119   : > { %3201 = vmatmul.mubr.msk.bf16.gmra.mrb[36].mxu1 %vm1044_vm4, %v946_v12 }
 0x175   : > { %v3817_v14 = vpop.f32.mrb[0].mxu1 }
 0x176   : > { %v3819_v16 = vpop.f32.mrb[1].mxu1 }
 0x177   : > { %v3821_v18 = vpop.f32.mrb[2].mxu1 }
 0x178   : > { %v1267_v19 = vpack.c.bf16 %v3821_v18, %v3817_v14  ;;  %v3825_v22 = vpop.f32.mrb[3].mxu1 }
 0x179   : > { %v1266_v7 = vpack.c.bf16 %v3825_v22, %v3819_v16  ;;  %v3880_v22 = vld [vmem:[%s4142_s5] ss:$0 sm:$0xff] }
 0x17d   : > { %v3829_v23 = vpop.f32.mrb[4].mxu1 }
 0x17e   : > { %v3831_v13 = vpop.f32.mrb[5].mxu1 }
 0x17f   : > { %v3833_v24 = vpop.f32.mrb[6].mxu1 }
 0x180   : > { %v1269_v25 = vpack.c.bf16 %v3833_v24, %v3829_v23  ;;  %v3837_v26 = vpop.f32.mrb[7].mxu1 }
 0x181   : > { %v1268_v27 = vpack.c.bf16 %v3837_v26, %v3831_v13 }
 0x188   : > { %v3174_v28 = vpop.f32.mrb[8].mxu1 }
 0x189   : > { %v1352_v29 = vpop.f32.mrb[9].mxu1 }
 0x18a   : > { %v3175_v30 = vpop.f32.mrb[10].mxu1 }
 0x18b   : > { %v1480_v33 = vpack.c.bf16 %v3175_v30, %v3174_v28  ;;  %v1355_v34 = vpop.f32.mrb[11].mxu1 }
 0x18c   : > { %v1479_v35 = vpack.c.bf16 %v1355_v34, %v1352_v29  ;;  %v3134_v36 = vpop.f32.mrb[0].mxu0 }
 0x18d   : > { %v1127_v37 = vpop.f32.mrb[1].mxu0 }
 0x18e   : > { %v3135_v38 = vpop.f32.mrb[2].mxu0  ;;  %1662 = vmatprep.mubr.bf16.mxu0 %v1479_v35 }
 0x18f   : > { %v1255_v40 = vpack.c.bf16 %v3135_v38, %v3134_v36  ;;  %v1130_v41 = vpop.f32.mrb[3].mxu0 }
 0x190   : > { %v1254_v42 = vpack.c.bf16 %v1130_v41, %v1127_v37 }
 0x192   : > { %1663 = vmatmul.mubr.bf16.vlgmr.msra.gmra.mrb[24].mxu0 %v1254_v42 }
 0x193   : > { %1670 = vmatprep.mubr.bf16.mxu0 %v1480_v33 }
 0x198   : > { %v3178_v43 = vpop.f32.mrb[12].mxu1 }
 0x199   : > { %v1368_v44 = vpop.f32.mrb[13].mxu1 }
 0x19a   : > { %v3179_v45 = vpop.f32.mrb[14].mxu1  ;;  %1671 = vmatmul.mubr.bf16.gmra.mrb[28].mxu0 %v1255_v40 }
 0x19b   : > { %v1482_v46 = vpack.c.bf16 %v3179_v45, %v3178_v43  ;;  %v1371_v47 = vpop.f32.mrb[15].mxu1 }
 0x19c   : > { %v1481_v48 = vpack.c.bf16 %v1371_v47, %v1368_v44  ;;  %v3138_v49 = vpop.f32.mrb[4].mxu0 }
 0x19d   : > { %v1143_v50 = vpop.f32.mrb[5].mxu0 }
 0x19e   : > { %v3139_v51 = vpop.f32.mrb[6].mxu0  ;;  %1678 = vmatprep.mubr.bf16.mxu0 %v1481_v48 }
 0x19f   : > { %v1257_v52 = vpack.c.bf16 %v3139_v51, %v3138_v49  ;;  %v1146_v53 = vpop.f32.mrb[7].mxu0 }
 0x1a0   : > { %v1256_v54 = vpack.c.bf16 %v1146_v53, %v1143_v50 }
 0x1a2   : > { %1679 = vmatmul.mubr.bf16.gmra.mrb[32].mxu0 %v1256_v54 }
 0x1a3   : > { %1686 = vmatprep.mubr.bf16.mxu0 %v1482_v46 }
 0x1a8   : > { %v3182_v55 = vpop.f32.mrb[16].mxu1 }
 0x1a9   : > { %v1384_v56 = vpop.f32.mrb[17].mxu1 }
 0x1aa   : > { %v3183_v57 = vpop.f32.mrb[18].mxu1  ;;  %1687 = vmatmul.mubr.bf16.gmra.mrb[36].mxu0 %v1257_v52 }
 0x1ab   : > { %v1484_v58 = vpack.c.bf16 %v3183_v57, %v3182_v55  ;;  %v1387_v59 = vpop.f32.mrb[19].mxu1 }
 0x1ac   : > { %v1483_v60 = vpack.c.bf16 %v1387_v59, %v1384_v56  ;;  %v3142_v61 = vpop.f32.mrb[8].mxu0  ;;  %v3330_v56 = vld [vmem:[%s4143_s6 + $0x18] sm:$0xff]  }
 0x1ad   : > { %v1159_v62 = vpop.f32.mrb[9].mxu0  ;;  %3210 = vmatprep.subr.bf16.mxu1 %v3330_v56 }
 0x1ae   : > { %v3143_v63 = vpop.f32.mrb[10].mxu0  ;;  %1694 = vmatprep.mubr.bf16.mxu0 %v1483_v60  ;;  %3211 = vmatpush3.bf16.msra.mxu1 %v3330_v56 }
 0x1af   : > { %v1259_v0 = vpack.c.bf16 %v3143_v63, %v3142_v61  ;;  %v1162_v1 = vpop.f32.mrb[11].mxu0 }
 0x1b0   : > { %v1258_v2 = vpack.c.bf16 %v1162_v1, %v1159_v62  ;;  %v3331_v62 = vld [vmem:[%s4143_s6 + $0x20] sm:$0xff]  }
 0x1b1   : > { %3212 = vmatprep.subr.bf16.mxu1 %v3331_v62 }
 0x1b2   : > { %1695 = vmatmul.mubr.bf16.gmra.mrb[40].mxu0 %v1258_v2  ;;  %3213 = vmatpush3.bf16.msra.mxu1 %v3331_v62 }
 0x1b3   : > { %1702 = vmatprep.mubr.bf16.mxu0 %v1484_v58 }
 0x1b8   : > { %v3186_v3 = vpop.f32.mrb[20].mxu1 }
 0x1b9   : > { %v1400_v4 = vpop.f32.mrb[21].mxu1 }
 0x1ba   : > { %v3187_v5 = vpop.f32.mrb[22].mxu1  ;;  %1703 = vmatmul.mubr.bf16.gmra.mrb[44].mxu0 %v1259_v0  ;;  %v3332_v0 = vld [vmem:[%s4143_s6 + $0x28] sm:$0xff]  }
 0x1bb   : > { %v1486_v8 = vpack.c.bf16 %v3187_v5, %v3186_v3  ;;  %v1403_v9 = vpop.f32.mrb[23].mxu1  ;;  %3214 = vmatprep.subr.bf16.mxu1 %v3332_v0 }
 0x1bc   : > { %v1485_v10 = vpack.c.bf16 %v1403_v9, %v1400_v4  ;;  %v3146_v11 = vpop.f32.mrb[12].mxu0  ;;  %3215 = vmatpush3.bf16.msra.mxu1 %v3332_v0 }
 0x1bd   : > { %v1175_v12 = vpop.f32.mrb[13].mxu0 }
 0x1be   : > { %v3147_v28 = vpop.f32.mrb[14].mxu0  ;;  %1710 = vmatprep.mubr.bf16.mxu0 %v1485_v10  ;;  %v3334_v10 = vld [vmem:[%s4143_s6 + $0x38] sm:$0xff]  }
 0x1bf   : > { %v1261_v29 = vpack.c.bf16 %v3147_v28, %v3146_v11  ;;  %v1178_v30 = vpop.f32.mrb[15].mxu0 }
 0x1c0   : > { %v1260_v31 = vpack.c.bf16 %v1178_v30, %v1175_v12 }
 0x1c2   : > { %1711 = vmatmul.mubr.bf16.gmra.mrb[48].mxu0 %v1260_v31 }
 0x1c3   : > { %1718 = vmatprep.mubr.bf16.mxu0 %v1486_v8  ;;  %v3333_v8 = vld [vmem:[%s4143_s6 + $0x30] sm:$0xff]  }
 0x1c4   : > { %3216 = vmatprep.subr.bf16.mxu1 %v3333_v8 }
 0x1c5   : > { %3217 = vmatpush3.bf16.msra.mxu1 %v3333_v8 }
 0x1c6   : > { %3218 = vmatprep.subr.bf16.mxu1 %v3334_v10 }
 0x1c8   : > { %v3190_v32 = vpop.f32.mrb[24].mxu1 }
 0x1c9   : > { %v1416_v33 = vpop.f32.mrb[25].mxu1  ;;  %3219 = vmatpush3.bf16.msra.mxu1 %v3334_v10 }
 0x1ca   : > { %v3191_v34 = vpop.f32.mrb[26].mxu1  ;;  %1719 = vmatmul.mubr.bf16.gmra.mrb[52].mxu0 %v1261_v29 }
 0x1cb   : > { %v1488_v35 = vpack.c.bf16 %v3191_v34, %v3190_v32  ;;  %v1419_v36 = vpop.f32.mrb[27].mxu1 }
 0x1cc   : > { %v1487_v37 = vpack.c.bf16 %v1419_v36, %v1416_v33  ;;  %v3150_v38 = vpop.f32.mrb[16].mxu0 }
 0x1cd   : > { %v1191_v39 = vpop.f32.mrb[17].mxu0 }
 0x1ce   : > { %v3151_v40 = vpop.f32.mrb[18].mxu0  ;;  %1726 = vmatprep.mubr.bf16.mxu0 %v1487_v37 }
 0x1cf   : > { %v1263_v41 = vpack.c.bf16 %v3151_v40, %v3150_v38  ;;  %v1194_v42 = vpop.f32.mrb[19].mxu0 }
 0x1d0   : > { %v1262_v43 = vpack.c.bf16 %v1194_v42, %v1191_v39 }
 0x1d2   : > { %1727 = vmatmul.mubr.bf16.gmra.mrb[56].mxu0 %v1262_v43 }
 0x1d3   : > { %1734 = vmatprep.mubr.bf16.mxu0 %v1488_v35 }
 0x1d8   : > { %v3194_v44 = vpop.f32.mrb[28].mxu1 }
 0x1d9   : > { %v1432_v45 = vpop.f32.mrb[29].mxu1 }
 0x1da   : > { %v3195_v46 = vpop.f32.mrb[30].mxu1  ;;  %1735 = vmatmul.mubr.bf16.gmra.mrb[60].mxu0 %v1263_v41 }
 0x1db   : > { %v1490_v47 = vpack.c.bf16 %v3195_v46, %v3194_v44  ;;  %v1435_v48 = vpop.f32.mrb[31].mxu1 }
 0x1dc   : > { %v1489_v49 = vpack.c.bf16 %v1435_v48, %v1432_v45  ;;  %v3154_v50 = vpop.f32.mrb[20].mxu0 }
 0x1dd   : > { %v1207_v51 = vpop.f32.mrb[21].mxu0 }
 0x1de   : > { %v3155_v52 = vpop.f32.mrb[22].mxu0  ;;  %1742 = vmatprep.mubr.bf16.mxu0 %v1489_v49 }
 0x1df   : > { %v1265_v53 = vpack.c.bf16 %v3155_v52, %v3154_v50  ;;  %v1210_v54 = vpop.f32.mrb[23].mxu0 }
 0x1e0   : > { %v1264_v55 = vpack.c.bf16 %v1210_v54, %v1207_v51 }
 0x1e2   : > { %1743 = vmatmul.mubr.bf16.gmra.mrb[64].mxu0 %v1264_v55 }
 0x1e3   : > { %1750 = vmatprep.mubr.bf16.mxu0 %v1490_v47 }
 0x1e4   : > { %v3198_v57 = vpop.f32.mrb[32].mxu1 }
 0x1e5   : > { %v1448_v58 = vpop.f32.mrb[33].mxu1 }
 0x1e6   : > { %v3199_v59 = vpop.f32.mrb[34].mxu1 }
 0x1e7   : > { %v1492_v60 = vpack.c.bf16 %v3199_v59, %v3198_v57  ;;  %v1451_v61 = vpop.f32.mrb[35].mxu1 }
 0x1e8   : > { %v1491_v63 = vpack.c.bf16 %v1451_v61, %v1448_v58 }
 0x1ea   : > { %1751 = vmatmul.mubr.bf16.gmra.mrb[68].mxu0 %v1265_v53 }
 0x1eb   : > { %1758 = vmatprep.mubr.bf16.mxu0 %v1491_v63 }
 0x1ec   : > { %v3202_v1 = vpop.f32.mrb[36].mxu1 }
 0x1ed   : > { %v1464_v2 = vpop.f32.mrb[37].mxu1 }
 0x1ee   : > { %v3203_v3 = vpop.f32.mrb[38].mxu1 }
 0x1ef   : > { %v1494_v4 = vpack.c.bf16 %v3203_v3, %v3202_v1  ;;  %v1467_v5 = vpop.f32.mrb[39].mxu1 }
 0x1f0   : > { %v1493_v9 = vpack.c.bf16 %v1467_v5, %v1464_v2 }
 0x1f2   : > { %1759 = vmatmul.mubr.bf16.gmra.mrb[72].mxu0 %v1266_v7 }
 0x1f3   : > { %1766 = vmatprep.mubr.bf16.mxu0 %v1492_v60 }
 0x1fa   : > { %1767 = vmatmul.mubr.bf16.gmra.mrb[76].mxu0 %v1267_v19 }
 0x1fb   : > { %1774 = vmatprep.mubr.bf16.mxu0 %v1493_v9 }
 0x202   : > { %1775 = vmatmul.mubr.bf16.gmra.mrb[80].mxu0 %v1268_v27 }
 0x203   : > { %1782 = vmatprep.mubr.bf16.mxu0 %v1494_v4 }
 0x20a   : > { %1783 = vmatmul.mubr.bf16.gmra.mrb[84].mxu0 %v1269_v25 }
 0x20b   : > { %2391 = vmatprep.mubr.bf16.mxu0 (!%p2825_p6), %v3514_v15  ;;  %v3340_v15 = vld [vmem:[%s4145_s8 + $0x10] sm:$0xff] (!%p2825_p6)  }
 0x265   : > { %v2912_v16 = vpop.f32.mrb[24].mxu0 }
 0x266   : > { %v2913_v7 = vpop.f32.mrb[25].mxu0 }
 0x267   : > { %v2914_v11 = vadd.f32 %v2913_v7, %v2912_v16  ;;  %v2915_v14 = vpop.f32.mrb[26].mxu0 }
 0x268   : > { %v2916_v18 = vpop.f32.mrb[27].mxu0 }
 0x269   : > { %v1665_v19 = vadd.f32 %v2914_v11, %v3880_v22  ;;  %v2917_v12 = vadd.f32 %v2916_v18, %v2915_v14 }
 0x26b   : > { %v1668_v13 = vadd.f32 %v2917_v12, %v3880_v22  ;;  %v1791_v26 = vmax.f32 %v1665_v19, 0.0 }
 0x26d   : > { %v1792_v27 = vmax.f32 %v1668_v13, 0.0  ;;  %v2918_v28 = vpop.f32.mrb[28].mxu0 }
 0x26e   : > { %v2919_v23 = vpop.f32.mrb[29].mxu0 }
 0x26f   : > { %v2920_v24 = vadd.f32 %v2919_v23, %v2918_v28  ;;  %v2921_v25 = vpop.f32.mrb[30].mxu0  ;;  %v1823_v29 = vpack.c.bf16 %v1792_v27, %v1791_v26 }
 0x270   : > { %v2922_v30 = vpop.f32.mrb[31].mxu0 }
 0x271   : > { %v1673_v31 = vadd.f32 %v2920_v24, %v3880_v22  ;;  %v2923_v32 = vadd.f32 %v2922_v30, %v2921_v25  ;;  %3220 = vmatprep.mubr.bf16.mxu1 %v1823_v29 }
 0x273   : > { %v1676_v33 = vadd.f32 %v2923_v32, %v3880_v22  ;;  %v1793_v34 = vmax.f32 %v1673_v31, 0.0 }
 0x275   : > { %v1794_v35 = vmax.f32 %v1676_v33, 0.0  ;;  %v2924_v36 = vpop.f32.mrb[32].mxu0 }
 0x276   : > { %v2925_v37 = vpop.f32.mrb[33].mxu0 }
 0x277   : > { %v1824_v38 = vpack.c.bf16 %v1794_v35, %v1793_v34  ;;  %v2926_v39 = vadd.f32 %v2925_v37, %v2924_v36  ;;  %v2927_v40 = vpop.f32.mrb[34].mxu0 }
 0x278   : > { %v2928_v41 = vpop.f32.mrb[35].mxu0 }
 0x279   : > { %v1681_v42 = vadd.f32 %v2926_v39, %v3880_v22  ;;  %v2929_v43 = vadd.f32 %v2928_v41, %v2927_v40  ;;  %3221 = vmatmul.mubr.bf16.vlgmr.msra.gmra.mrb[40].mxu1 %v1824_v38 }
 0x27b   : > { %v1684_v44 = vadd.f32 %v2929_v43, %v3880_v22  ;;  %v1795_v45 = vmax.f32 %v1681_v42, 0.0 }
 0x27d   : > { %v1796_v46 = vmax.f32 %v1684_v44, 0.0  ;;  %v2930_v47 = vpop.f32.mrb[36].mxu0 }
 0x27e   : > { %v2931_v48 = vpop.f32.mrb[37].mxu0 }
 0x27f   : > { %v2932_v49 = vadd.f32 %v2931_v48, %v2930_v47  ;;  %v2933_v50 = vpop.f32.mrb[38].mxu0  ;;  %v1825_v51 = vpack.c.bf16 %v1796_v46, %v1795_v45 }
 0x280   : > { %v2934_v52 = vpop.f32.mrb[39].mxu0 }
 0x281   : > { %v1689_v53 = vadd.f32 %v2932_v49, %v3880_v22  ;;  %v2935_v54 = vadd.f32 %v2934_v52, %v2933_v50  ;;  %3224 = vmatprep.mubr.bf16.mxu1 %v1825_v51 }
 0x283   : > { %v1692_v55 = vadd.f32 %v2935_v54, %v3880_v22  ;;  %v1797_v56 = vmax.f32 %v1689_v53, 0.0 }
 0x285   : > { %v1798_v57 = vmax.f32 %v1692_v55, 0.0  ;;  %v2936_v58 = vpop.f32.mrb[40].mxu0 }
 0x286   : > { %v2937_v59 = vpop.f32.mrb[41].mxu0 }
 0x287   : > { %v2938_v60 = vadd.f32 %v2937_v59, %v2936_v58  ;;  %v2939_v61 = vpop.f32.mrb[42].mxu0  ;;  %v1826_v62 = vpack.c.bf16 %v1798_v57, %v1797_v56 }
 0x288   : > { %v2940_v63 = vpop.f32.mrb[43].mxu0 }
 0x289   : > { %v1697_v0 = vadd.f32 %v2938_v60, %v3880_v22  ;;  %v2941_v1 = vadd.f32 %v2940_v63, %v2939_v61  ;;  %3225 = vmatmul.mubr.bf16.gmra.mrb[44].mxu1 %v1826_v62 }
 0x28b   : > { %v1700_v2 = vadd.f32 %v2941_v1, %v3880_v22  ;;  %v1799_v3 = vmax.f32 %v1697_v0, 0.0 }
 0x28d   : > { %v1800_v4 = vmax.f32 %v1700_v2, 0.0  ;;  %v2942_v5 = vpop.f32.mrb[44].mxu0 }
 0x28e   : > { %v2943_v8 = vpop.f32.mrb[45].mxu0 }
 0x28f   : > { %v2944_v9 = vadd.f32 %v2943_v8, %v2942_v5  ;;  %v2945_v10 = vpop.f32.mrb[46].mxu0  ;;  %v1827_v16 = vpack.c.bf16 %v1800_v4, %v1799_v3 }
 0x290   : > { %v2946_v7 = vpop.f32.mrb[47].mxu0 }
 0x291   : > { %v1705_v11 = vadd.f32 %v2944_v9, %v3880_v22  ;;  %v2947_v14 = vadd.f32 %v2946_v7, %v2945_v10  ;;  %3228 = vmatprep.mubr.bf16.mxu1 %v1827_v16 }
 0x293   : > { %v1708_v18 = vadd.f32 %v2947_v14, %v3880_v22  ;;  %v1801_v19 = vmax.f32 %v1705_v11, 0.0 }
 0x295   : > { %v1802_v12 = vmax.f32 %v1708_v18, 0.0  ;;  %v2948_v13 = vpop.f32.mrb[48].mxu0 }
 0x296   : > { %v2949_v26 = vpop.f32.mrb[49].mxu0 }
 0x297   : > { %v2950_v27 = vadd.f32 %v2949_v26, %v2948_v13  ;;  %v2951_v28 = vpop.f32.mrb[50].mxu0  ;;  %v1828_v23 = vpack.c.bf16 %v1802_v12, %v1801_v19 }
 0x298   : > { %v2952_v24 = vpop.f32.mrb[51].mxu0 }
 0x299   : > { %v1713_v25 = vadd.f32 %v2950_v27, %v3880_v22  ;;  %v2953_v29 = vadd.f32 %v2952_v24, %v2951_v28  ;;  %3229 = vmatmul.mubr.bf16.gmra.mrb[48].mxu1 %v1828_v23 }
 0x29b   : > { %v1716_v30 = vadd.f32 %v2953_v29, %v3880_v22  ;;  %v1803_v31 = vmax.f32 %v1713_v25, 0.0 }
 0x29d   : > { %v1804_v32 = vmax.f32 %v1716_v30, 0.0  ;;  %v2954_v33 = vpop.f32.mrb[52].mxu0 }
 0x29e   : > { %v2955_v34 = vpop.f32.mrb[53].mxu0 }
 0x29f   : > { %v2956_v35 = vadd.f32 %v2955_v34, %v2954_v33  ;;  %v2957_v36 = vpop.f32.mrb[54].mxu0  ;;  %v1829_v37 = vpack.c.bf16 %v1804_v32, %v1803_v31 }
 0x2a0   : > { %v2958_v38 = vpop.f32.mrb[55].mxu0 }
 0x2a1   : > { %v1721_v39 = vadd.f32 %v2956_v35, %v3880_v22  ;;  %v2959_v40 = vadd.f32 %v2958_v38, %v2957_v36  ;;  %3232 = vmatprep.mubr.bf16.mxu1 %v1829_v37 }
 0x2a3   : > { %v1724_v41 = vadd.f32 %v2959_v40, %v3880_v22  ;;  %v1805_v42 = vmax.f32 %v1721_v39, 0.0 }
 0x2a5   : > { %v1806_v43 = vmax.f32 %v1724_v41, 0.0  ;;  %v2960_v44 = vpop.f32.mrb[56].mxu0 }
 0x2a6   : > { %v2961_v45 = vpop.f32.mrb[57].mxu0 }
 0x2a7   : > { %v2962_v46 = vadd.f32 %v2961_v45, %v2960_v44  ;;  %v2963_v47 = vpop.f32.mrb[58].mxu0  ;;  %v1830_v48 = vpack.c.bf16 %v1806_v43, %v1805_v42 }
 0x2a8   : > { %v2964_v49 = vpop.f32.mrb[59].mxu0 }
 0x2a9   : > { %v1729_v50 = vadd.f32 %v2962_v46, %v3880_v22  ;;  %v2965_v51 = vadd.f32 %v2964_v49, %v2963_v47  ;;  %3233 = vmatmul.mubr.bf16.gmra.mrb[52].mxu1 %v1830_v48 }
 0x2ab   : > { %v1732_v52 = vadd.f32 %v2965_v51, %v3880_v22  ;;  %v1807_v53 = vmax.f32 %v1729_v50, 0.0 }
 0x2ad   : > { %v1808_v54 = vmax.f32 %v1732_v52, 0.0  ;;  %v2966_v55 = vpop.f32.mrb[60].mxu0 }
 0x2ae   : > { %v2967_v56 = vpop.f32.mrb[61].mxu0 }
 0x2af   : > { %v2968_v57 = vadd.f32 %v2967_v56, %v2966_v55  ;;  %v2969_v58 = vpop.f32.mrb[62].mxu0  ;;  %v1831_v59 = vpack.c.bf16 %v1808_v54, %v1807_v53 }
 0x2b0   : > { %v2970_v60 = vpop.f32.mrb[63].mxu0 }
 0x2b1   : > { %v1737_v61 = vadd.f32 %v2968_v57, %v3880_v22  ;;  %v2971_v62 = vadd.f32 %v2970_v60, %v2969_v58  ;;  %3236 = vmatprep.mubr.bf16.mxu1 %v1831_v59 }
 0x2b3   : > { %v1740_v63 = vadd.f32 %v2971_v62, %v3880_v22  ;;  %v1809_v0 = vmax.f32 %v1737_v61, 0.0 }
 0x2b5   : > { %v1810_v1 = vmax.f32 %v1740_v63, 0.0  ;;  %v2972_v2 = vpop.f32.mrb[64].mxu0 }
 0x2b6   : > { %v2973_v3 = vpop.f32.mrb[65].mxu0 }
 0x2b7   : > { %v2974_v4 = vadd.f32 %v2973_v3, %v2972_v2  ;;  %v2975_v5 = vpop.f32.mrb[66].mxu0  ;;  %v1832_v8 = vpack.c.bf16 %v1810_v1, %v1809_v0 }
 0x2b8   : > { %v2976_v9 = vpop.f32.mrb[67].mxu0 }
 0x2b9   : > { %v1745_v10 = vadd.f32 %v2974_v4, %v3880_v22  ;;  %v2977_v16 = vadd.f32 %v2976_v9, %v2975_v5  ;;  %3237 = vmatmul.mubr.bf16.gmra.mrb[56].mxu1 %v1832_v8 }
 0x2bb   : > { %v1748_v7 = vadd.f32 %v2977_v16, %v3880_v22  ;;  %v1811_v11 = vmax.f32 %v1745_v10, 0.0 }
 0x2bd   : > { %v1812_v14 = vmax.f32 %v1748_v7, 0.0  ;;  %v2978_v18 = vpop.f32.mrb[68].mxu0 }
 0x2be   : > { %v2979_v19 = vpop.f32.mrb[69].mxu0 }
 0x2bf   : > { %v2980_v12 = vadd.f32 %v2979_v19, %v2978_v18  ;;  %v2981_v13 = vpop.f32.mrb[70].mxu0  ;;  %v1833_v26 = vpack.c.bf16 %v1812_v14, %v1811_v11  ;;  %v948_v11 = vshrl.u32 %v529_v6, 7  ;;  %v528_v18 = vld [vmem:[%s441_s16] sm:$0x3] }
 0x2c0   : > { %v2982_v27 = vpop.f32.mrb[71].mxu0 }
 0x2c1   : > { %v1753_v28 = vadd.f32 %v2980_v12, %v3880_v22  ;;  %v2983_v23 = vadd.f32 %v2982_v27, %v2981_v13  ;;  %3240 = vmatprep.mubr.bf16.mxu1 %v1833_v26  ;;  %v962_v14 = vsub.s32 1, %v948_v11  ;;  %v958_v19 = vsub.s32 0, %v948_v11  ;;  %v3923_v26 = vld [vmem:[%s4144_s7] ss:$0 sm:$0xff] }
 0x2c2   : > { %v949_v12 = vadd.s32 8, %v948_v11 }
 0x2c3   : > { %v1756_v24 = vadd.f32 %v2983_v23, %v3880_v22  ;;  %v1813_v25 = vmax.f32 %v1753_v28, 0.0  ;;  %v963_v13 = vrot.slane %v528_v18, %v962_v14  ;;  %v3400_v23 = vmov 1.0|1.0  }
 0x2c5   : > { %v1814_v29 = vmax.f32 %v1756_v24, 0.0  ;;  %v2984_v30 = vpop.f32.mrb[72].mxu0  ;;  %vm965_vm4 = vcmp.eq.s32.totalorder %v948_v11, %v963_v13  ;;  %vm967_vm5 = vcmp.eq.s32.totalorder %v949_v12, %v963_v13  ;;  %v2103_v24 = vld [vmem:[#allocation2] sm:$0xff] }
 0x2c6   : > { %v2985_v31 = vpop.f32.mrb[73].mxu0  ;;  %vm2809_vm7 = vmpackc.low %vm967_vm5, %vm965_vm4 }
 0x2c7   : > { %v2986_v32 = vadd.f32 %v2985_v31, %v2984_v30  ;;  %v2987_v33 = vpop.f32.mrb[74].mxu0  ;;  %v1834_v34 = vpack.c.bf16 %v1814_v29, %v1813_v25  ;;  %v950_v30 = vadd.s32 16, %v948_v11  ;;  %v951_v31 = vadd.s32 24, %v948_v11 }
 0x2c8   : > { %v2988_v35 = vpop.f32.mrb[75].mxu0 }
 0x2c9   : > { %v1761_v36 = vadd.f32 %v2986_v32, %v3880_v22  ;;  %v2989_v37 = vadd.f32 %v2988_v35, %v2987_v33  ;;  %3241 = vmatmul.mubr.bf16.gmra.mrb[60].mxu1 %v1834_v34  ;;  %vm969_vm10 = vcmp.eq.s32.totalorder %v950_v30, %v963_v13  ;;  %vm971_vm11 = vcmp.eq.s32.totalorder %v951_v31, %v963_v13 }
 0x2ca   : > { %vm3934_vm12 = vmpackc.low %vm971_vm11, %vm969_vm10 }
 0x2cb   : > { %v1764_v38 = vadd.f32 %v2989_v37, %v3880_v22  ;;  %v1815_v39 = vmax.f32 %v1761_v36, 0.0 }
 0x2cd   : > { %v1816_v40 = vmax.f32 %v1764_v38, 0.0  ;;  %v2990_v41 = vpop.f32.mrb[76].mxu0 }
 0x2ce   : > { %v2991_v42 = vpop.f32.mrb[77].mxu0 }
 0x2cf   : > { %v2992_v43 = vadd.f32 %v2991_v42, %v2990_v41  ;;  %v2993_v44 = vpop.f32.mrb[78].mxu0  ;;  %v1835_v45 = vpack.c.bf16 %v1816_v40, %v1815_v39 }
 0x2d0   : > { %v2994_v46 = vpop.f32.mrb[79].mxu0 }
 0x2d1   : > { %v1769_v47 = vadd.f32 %v2992_v43, %v3880_v22  ;;  %v2995_v48 = vadd.f32 %v2994_v46, %v2993_v44  ;;  %3244 = vmatprep.mubr.bf16.mxu1 %v1835_v45  ;;  %v952_v43 = vadd.s32 32, %v948_v11  ;;  %v953_v44 = vadd.s32 40, %v948_v11 }
 0x2d3   : > { %v1772_v49 = vadd.f32 %v2995_v48, %v3880_v22  ;;  %v1817_v50 = vmax.f32 %v1769_v47, 0.0  ;;  %vm973_vm0 = vcmp.eq.s32.totalorder %v952_v43, %v963_v13  ;;  %vm975_vm1 = vcmp.eq.s32.totalorder %v953_v44, %v963_v13 }
 0x2d4   : > { %vm3946_vm4 = vmpackc.low %vm975_vm1, %vm973_vm0 }
 0x2d5   : > { %v1818_v51 = vmax.f32 %v1772_v49, 0.0  ;;  %v2996_v52 = vpop.f32.mrb[80].mxu0 }
 0x2d6   : > { %v2997_v53 = vpop.f32.mrb[81].mxu0 }
 0x2d7   : > { %v2998_v54 = vadd.f32 %v2997_v53, %v2996_v52  ;;  %v2999_v55 = vpop.f32.mrb[82].mxu0  ;;  %v1836_v56 = vpack.c.bf16 %v1818_v51, %v1817_v50  ;;  %v954_v52 = vadd.s32 48, %v948_v11  ;;  %v955_v53 = vadd.s32 56, %v948_v11 }
 0x2d8   : > { %v3000_v57 = vpop.f32.mrb[83].mxu0 }
 0x2d9   : > { %v1777_v58 = vadd.f32 %v2998_v54, %v3880_v22  ;;  %v3001_v59 = vadd.f32 %v3000_v57, %v2999_v55  ;;  %3245 = vmatmul.mubr.bf16.gmra.mrb[64].mxu1 %v1836_v56 }
 0x2db   : > { %v1780_v60 = vadd.f32 %v3001_v59, %v3880_v22  ;;  %v1819_v61 = vmax.f32 %v1777_v58, 0.0 }
 0x2dd   : > { %v1820_v62 = vmax.f32 %v1780_v60, 0.0  ;;  %v3002_v63 = vpop.f32.mrb[84].mxu0 }
 0x2de   : > { %v3003_v0 = vpop.f32.mrb[85].mxu0 }
 0x2df   : > { %v3004_v1 = vadd.f32 %v3003_v0, %v3002_v63  ;;  %v3005_v2 = vpop.f32.mrb[86].mxu0  ;;  %v1837_v3 = vpack.c.bf16 %v1820_v62, %v1819_v61 }
 0x2e0   : > { %v3006_v4 = vpop.f32.mrb[87].mxu0 }
 0x2e1   : > { %v1785_v5 = vadd.f32 %v3004_v1, %v3880_v22  ;;  %v3007_v8 = vadd.f32 %v3006_v4, %v3005_v2  ;;  %3248 = vmatprep.mubr.bf16.mxu1 %v1837_v3 }
 0x2e3   : > { %v1788_v9 = vadd.f32 %v3007_v8, %v3880_v22  ;;  %v1821_v10 = vmax.f32 %v1785_v5, 0.0  ;;  %v959_v22 = vrot.slane %v528_v18, %v958_v19 }
 0x2e5   : > { %v1822_v16 = vmax.f32 %v1788_v9, 0.0  ;;  %vm966_vm6 = vcmp.eq.s32.totalorder %v949_v12, %v959_v22  ;;  %vm964_vm8 = vcmp.eq.s32.totalorder %v948_v11, %v959_v22  ;;  %vm968_vm13 = vcmp.eq.s32.totalorder %v950_v30, %v959_v22 }
 0x2e6   : > { %vm3927_vm9 = vmpackc.low %vm966_vm6, %vm964_vm8  ;;  %vm970_vm14 = vcmp.eq.s32.totalorder %v951_v31, %v959_v22  ;;  %vm972_vm2 = vcmp.eq.s32.totalorder %v952_v43, %v959_v22  ;;  %vm974_vm3 = vcmp.eq.s32.totalorder %v953_v44, %v959_v22  ;;  %vm977_vm6 = vcmp.eq.s32.totalorder %v954_v52, %v963_v13 }
 0x2e7   : > { %v1838_v7 = vpack.c.bf16 %v1822_v16, %v1821_v10  ;;  %vm3938_vm15 = vmpackc.low %vm970_vm14, %vm968_vm13  ;;  %vm976_vm10 = vcmp.eq.s32.totalorder %v954_v52, %v959_v22  ;;  %vm978_vm11 = vcmp.eq.s32.totalorder %v955_v53, %v959_v22 }
 0x2e8   : > { %vm3950_vm5 = vmpackc.low %vm974_vm3, %vm972_vm2 }
 0x2e9   : > { %3249 = vmatmul.mubr.bf16.gmra.mrb[68].mxu1 %v1838_v7  ;;  %vm3962_vm13 = vmpackc.low %vm978_vm11, %vm976_vm10 }
 0x2ea   : > { %2810 = vmatprep.mubr.msk.bf16.mxu1 %vm2809_vm7, %v3400_v23  ;;  %vm979_vm7 = vcmp.eq.s32.totalorder %v955_v53, %v963_v13 }
 0x2eb   : > { %vm3958_vm8 = vmpackc.low %vm979_vm7, %vm977_vm6 }
 0x34c   : > { %v3222_v27 = vpop.f32.mrb[40].mxu1 }
 0x34d   : > { %v1953_v6 = vadd.f32 %v3222_v27, %v3923_v26  ;;  %v1944_v28 = vpop.f32.mrb[41].mxu1 }
 0x34e   : > { %v1945_v25 = vadd.f32 %v3923_v26, %v1944_v28  ;;  %v3223_v29 = vpop.f32.mrb[42].mxu1 }
 0x34f   : > { %v1956_v32 = vadd.f32 %v3223_v29, %v3923_v26  ;;  %v1947_v33 = vpop.f32.mrb[43].mxu1  ;;  %v2073_v35 = vmax.f32 %v1953_v6, 0.0 }
 0x350   : > { %v1948_v34 = vadd.f32 %v3923_v26, %v1947_v33  ;;  %v2071_v38 = vmax.f32 %v1945_v25, 0.0 }
 0x351   : > { %v2074_v36 = vmax.f32 %v1956_v32, 0.0 }
 0x352   : > { %v2072_v39 = vmax.f32 %v1948_v34, 0.0 }
 0x353   : > { %v3942_v41 = vpack.c.bf16 %v2074_v36, %v2073_v35 }
 0x354   : > { %v3944_v42 = vpack.c.bf16 %v2072_v39, %v2071_v38 }
 0x35c   : > { %v3226_v47 = vpop.f32.mrb[44].mxu1 }
 0x35d   : > { %v1969_v48 = vadd.f32 %v3226_v47, %v3923_v26  ;;  %v1960_v49 = vpop.f32.mrb[45].mxu1 }
 0x35e   : > { %v1961_v50 = vadd.f32 %v3923_v26, %v1960_v49  ;;  %v3227_v51 = vpop.f32.mrb[46].mxu1 }
 0x35f   : > { %v1972_v54 = vadd.f32 %v3227_v51, %v3923_v26  ;;  %v1963_v55 = vpop.f32.mrb[47].mxu1  ;;  %v2077_v57 = vmax.f32 %v1969_v48, 0.0 }
 0x360   : > { %v1964_v56 = vadd.f32 %v3923_v26, %v1963_v55  ;;  %v2075_v60 = vmax.f32 %v1961_v50, 0.0 }
 0x361   : > { %v2078_v58 = vmax.f32 %v1972_v54, 0.0 }
 0x362   : > { %v2076_v61 = vmax.f32 %v1964_v56, 0.0 }
 0x363   : > { %v3966_v63 = vpack.c.bf16 %v2078_v58, %v2077_v57 }
 0x364   : > { %v2113_v0 = vpack.c.bf16 %v2076_v61, %v2075_v60 }
 0x36c   : > { %v3230_v1 = vpop.f32.mrb[48].mxu1 }
 0x36d   : > { %v1985_v2 = vadd.f32 %v3230_v1, %v3923_v26  ;;  %v1976_v3 = vpop.f32.mrb[49].mxu1 }
 0x36e   : > { %v1977_v4 = vadd.f32 %v3923_v26, %v1976_v3  ;;  %v3231_v5 = vpop.f32.mrb[50].mxu1 }
 0x36f   : > { %v1988_v8 = vadd.f32 %v3231_v5, %v3923_v26  ;;  %v1979_v9 = vpop.f32.mrb[51].mxu1  ;;  %v2081_v16 = vmax.f32 %v1985_v2, 0.0 }
 0x370   : > { %v1980_v10 = vadd.f32 %v3923_v26, %v1979_v9  ;;  %v2079_v11 = vmax.f32 %v1977_v4, 0.0 }
 0x371   : > { %v2082_v7 = vmax.f32 %v1988_v8, 0.0 }
 0x372   : > { %v2080_v14 = vmax.f32 %v1980_v10, 0.0 }
 0x373   : > { %v3972_v18 = vpack.c.bf16 %v2082_v7, %v2081_v16 }
 0x374   : > { %v3974_v19 = vpack.c.bf16 %v2080_v14, %v2079_v11 }
 0x37c   : > { %v3234_v12 = vpop.f32.mrb[52].mxu1 }
 0x37d   : > { %v2001_v13 = vadd.f32 %v3234_v12, %v3923_v26  ;;  %v1992_v22 = vpop.f32.mrb[53].mxu1 }
 0x37e   : > { %v1993_v27 = vadd.f32 %v3923_v26, %v1992_v22  ;;  %v3235_v6 = vpop.f32.mrb[54].mxu1 }
 0x37f   : > { %v2004_v28 = vadd.f32 %v3235_v6, %v3923_v26  ;;  %v1995_v25 = vpop.f32.mrb[55].mxu1  ;;  %v2085_v30 = vmax.f32 %v2001_v13, 0.0 }
 0x380   : > { %v1996_v29 = vadd.f32 %v3923_v26, %v1995_v25  ;;  %v2083_v32 = vmax.f32 %v1993_v27, 0.0 }
 0x381   : > { %v2086_v31 = vmax.f32 %v2004_v28, 0.0 }
 0x382   : > { %v2084_v33 = vmax.f32 %v1996_v29, 0.0 }
 0x383   : > { %v3980_v34 = vpack.c.bf16 %v2086_v31, %v2085_v30 }
 0x384   : > { %v3982_v35 = vpack.c.bf16 %v2084_v33, %v2083_v32 }
 0x38c   : > { %v3238_v36 = vpop.f32.mrb[56].mxu1 }
 0x38d   : > { %v2017_v38 = vadd.f32 %v3238_v36, %v3923_v26  ;;  %v2008_v39 = vpop.f32.mrb[57].mxu1 }
 0x38e   : > { %v2009_v43 = vadd.f32 %v3923_v26, %v2008_v39  ;;  %v3239_v44 = vpop.f32.mrb[58].mxu1 }
 0x38f   : > { %v2020_v47 = vadd.f32 %v3239_v44, %v3923_v26  ;;  %v2011_v48 = vpop.f32.mrb[59].mxu1  ;;  %v2089_v50 = vmax.f32 %v2017_v38, 0.0 }
 0x390   : > { %v2012_v49 = vadd.f32 %v3923_v26, %v2011_v48  ;;  %v2087_v52 = vmax.f32 %v2009_v43, 0.0 }
 0x391   : > { %v2090_v51 = vmax.f32 %v2020_v47, 0.0 }
 0x392   : > { %v2088_v53 = vmax.f32 %v2012_v49, 0.0 }
 0x393   : > { %v2120_v54 = vpack.c.bf16 %v2090_v51, %v2089_v50 }
 0x394   : > { %v2119_v55 = vpack.c.bf16 %v2088_v53, %v2087_v52  ;;  %v2105_v52 = vld [vmem:[#allocation2 + $0x10] sm:$0xff] }
 0x396   : > { %3032 = vmatprep.subr.bf16.mxu1 %v2119_v55  ;;  %v2106_v55 = vld [vmem:[#allocation2 + $0x18] sm:$0xff] }
 0x397   : > { %3033 = vmatpush3.bf16.msra.mxu1 %v3944_v42 }
 0x398   : > { %3034 = vmatprep.subr.bf16.mxu1 %v2120_v54 }
 0x39b   : > { %3035 = vmatpush3.bf16.msra.mxu1 %v3942_v41 }
 0x39c   : > { %v3242_v56 = vpop.f32.mrb[60].mxu1 }
 0x39d   : > { %v2033_v57 = vadd.f32 %v3242_v56, %v3923_v26  ;;  %v2024_v58 = vpop.f32.mrb[61].mxu1 }
 0x39e   : > { %v2025_v60 = vadd.f32 %v3923_v26, %v2024_v58  ;;  %v3243_v61 = vpop.f32.mrb[62].mxu1 }
 0x39f   : > { %v2036_v1 = vadd.f32 %v3243_v61, %v3923_v26  ;;  %v2027_v2 = vpop.f32.mrb[63].mxu1  ;;  %v2093_v4 = vmax.f32 %v2033_v57, 0.0 }
 0x3a0   : > { %v2028_v3 = vadd.f32 %v3923_v26, %v2027_v2  ;;  %v2091_v8 = vmax.f32 %v2025_v60, 0.0  ;;  %v2107_v60 = vld [vmem:[#allocation2 + $0x20] sm:$0xff] }
 0x3a1   : > { %v2094_v5 = vmax.f32 %v2036_v1, 0.0 }
 0x3a2   : > { %v2092_v9 = vmax.f32 %v2028_v3, 0.0  ;;  %v2108_v3 = vld [vmem:[#allocation2 + $0x28] sm:$0xff] }
 0x3a3   : > { %v2122_v42 = vpack.c.bf16 %v2094_v5, %v2093_v4 }
 0x3a4   : > { %v2121_v10 = vpack.c.bf16 %v2092_v9, %v2091_v8 }
 0x3a6   : > { %3036 = vmatprep.subr.bf16.mxu1 %v2121_v10  ;;  %v2109_v10 = vld [vmem:[#allocation2 + $0x30] sm:$0xff] }
 0x3a7   : > { %3037 = vmatpush3.bf16.msra.mxu1 %v2113_v0 }
 0x3a8   : > { %3038 = vmatprep.subr.bf16.mxu1 %v2122_v42 }
 0x3ab   : > { %3039 = vmatpush3.bf16.msra.mxu1 %v3966_v63 }
 0x3ac   : > { %v3246_v41 = vpop.f32.mrb[64].mxu1 }
 0x3ad   : > { %v2049_v16 = vadd.f32 %v3246_v41, %v3923_v26  ;;  %v2040_v7 = vpop.f32.mrb[65].mxu1 }
 0x3ae   : > { %v2041_v11 = vadd.f32 %v3923_v26, %v2040_v7  ;;  %v3247_v14 = vpop.f32.mrb[66].mxu1 }
 0x3af   : > { %v2052_v12 = vadd.f32 %v3247_v14, %v3923_v26  ;;  %v2043_v13 = vpop.f32.mrb[67].mxu1  ;;  %v2097_v27 = vmax.f32 %v2049_v16, 0.0 }
 0x3b0   : > { %v2044_v22 = vadd.f32 %v3923_v26, %v2043_v13  ;;  %v2095_v28 = vmax.f32 %v2041_v11, 0.0  ;;  %v2110_v11 = vld [vmem:[#allocation2 + $0x38] sm:$0xff] }
 0x3b1   : > { %v2098_v6 = vmax.f32 %v2052_v12, 0.0 }
 0x3b2   : > { %v2096_v25 = vmax.f32 %v2044_v22, 0.0 }
 0x3b3   : > { %v2124_v0 = vpack.c.bf16 %v2098_v6, %v2097_v27  ;;  %v3335_v27 = vld [vmem:[%s4145_s8 + $0x40] sm:$0xff] (!%p2825_p6)  }
 0x3b4   : > { %v2123_v29 = vpack.c.bf16 %v2096_v25, %v2095_v28  ;;  %v3336_v6 = vld [vmem:[%s4145_s8] sm:$0xff] (!%p2825_p6)   ;;  %3072 = vmatprep.subr.bf16.mxu0 (!%p2825_p6), %v3335_v27  ;;  %v3337_v28 = vld [vmem:[%s4145_s8 + $0x48] sm:$0xff] (!%p2825_p6)  }
 0x3b5   : > { %3073 = vmatpush3.bf16.msra.mxu0 (!%p2825_p6), %v3336_v6  ;;  %v3338_v25 = vld [vmem:[%s4145_s8 + $0x8] sm:$0xff] (!%p2825_p6)  }
 0x3b6   : > { %3040 = vmatprep.subr.bf16.mxu1 %v2123_v29  ;;  %3074 = vmatprep.subr.bf16.mxu0 (!%p2825_p6), %v3337_v28  ;;  %v3341_v29 = vld [vmem:[%s4145_s8 + $0x58] sm:$0xff] (!%p2825_p6)  }
 0x3b7   : > { %3041 = vmatpush3.bf16.msra.mxu1 %v3974_v19 }
 0x3b8   : > { %3042 = vmatprep.subr.bf16.mxu1 %v2124_v0  ;;  %v3339_v0 = vld [vmem:[%s4145_s8 + $0x50] sm:$0xff] (!%p2825_p6)  }
 0x3b9   : > { %3075 = vmatpush3.bf16.msra.mxu0 (!%p2825_p6), %v3338_v25 }
 0x3ba   : > { %3076 = vmatprep.subr.bf16.mxu0 (!%p2825_p6), %v3339_v0 }
 0x3bb   : > { %3043 = vmatpush3.bf16.msra.mxu1 %v3972_v18 }
 0x3bc   : > { %v3250_v63 = vpop.f32.mrb[68].mxu1 }
 0x3bd   : > { %v2065_v30 = vadd.f32 %v3250_v63, %v3923_v26  ;;  %v2056_v31 = vpop.f32.mrb[69].mxu1  ;;  %3077 = vmatpush3.bf16.msra.mxu0 (!%p2825_p6), %v3340_v15  ;;  %v3342_v63 = vld [vmem:[%s4145_s8 + $0x18] sm:$0xff] (!%p2825_p6)  }
 0x3be   : > { %v2057_v32 = vadd.f32 %v3923_v26, %v2056_v31  ;;  %v3251_v33 = vpop.f32.mrb[70].mxu1  ;;  %3078 = vmatprep.subr.bf16.mxu0 (!%p2825_p6), %v3341_v29  ;;  %v3344_v31 = vld [vmem:[%s4145_s8 + $0x20] sm:$0xff] (!%p2825_p6)  }
 0x3bf   : > { %v2068_v36 = vadd.f32 %v3251_v33, %v3923_v26  ;;  %v2059_v38 = vpop.f32.mrb[71].mxu1  ;;  %v2101_v43 = vmax.f32 %v2065_v30, 0.0  ;;  %v3343_v30 = vld [vmem:[%s4145_s8 + $0x60] sm:$0xff] (!%p2825_p6)   ;;  %v3346_v33 = vld [vmem:[%s4145_s8 + $0x28] sm:$0xff] (!%p2825_p6)  }
 0x3c0   : > { %v2060_v39 = vadd.f32 %v3923_v26, %v2059_v38  ;;  %v2099_v47 = vmax.f32 %v2057_v32, 0.0  ;;  %v3345_v32 = vld [vmem:[%s4145_s8 + $0x68] sm:$0xff] (!%p2825_p6)   ;;  %v3351_v38 = vld [vmem:[%s4147_s10] sm:$0xff] (!%p2825_p6)  }
 0x3c1   : > { %v2102_v44 = vmax.f32 %v2068_v36, 0.0  ;;  %3079 = vmatpush3.bf16.msra.mxu0 (!%p2825_p6), %v3342_v63  ;;  %v3347_v36 = vld [vmem:[%s4145_s8 + $0x70] sm:$0xff] (!%p2825_p6)  }
 0x3c2   : > { %v2100_v48 = vmax.f32 %v2060_v39, 0.0  ;;  %3080 = vmatprep.subr.bf16.mxu0 (!%p2825_p6), %v3343_v30  ;;  %v3352_v39 = vld [vmem:[%s4147_s10 + $0x8] sm:$0xff] (!%p2825_p6)  }
 0x3c3   : > { %v2126_v19 = vpack.c.bf16 %v2102_v44, %v2101_v43  ;;  %v3348_v43 = vld [vmem:[%s4145_s8 + $0x30] sm:$0xff] (!%p2825_p6)  }
 0x3c4   : > { %v2125_v49 = vpack.c.bf16 %v2100_v48, %v2099_v47  ;;  %v3353_v44 = vld [vmem:[%s4147_s10 + $0x10] sm:$0xff] (!%p2825_p6)   ;;  %v3349_v47 = vld [vmem:[%s4145_s8 + $0x78] sm:$0xff] (!%p2825_p6)  }
 0x3c5   : > { %3081 = vmatpush3.bf16.msra.mxu0 (!%p2825_p6), %v3344_v31  ;;  %v3350_v48 = vld [vmem:[%s4145_s8 + $0x38] sm:$0xff] (!%p2825_p6)  }
 0x3c6   : > { %3044 = vmatprep.subr.bf16.mxu1 %v2125_v49  ;;  %3082 = vmatprep.subr.bf16.mxu0 (!%p2825_p6), %v3345_v32 }
 0x3c7   : > { %3045 = vmatpush3.bf16.msra.mxu1 %v3982_v35 }
 0x3c8   : > { %3046 = vmatprep.subr.bf16.mxu1 %v2126_v19 }
 0x3c9   : > { %3083 = vmatpush3.bf16.msra.mxu0 (!%p2825_p6), %v3346_v33 }
 0x3ca   : > { %3084 = vmatprep.subr.bf16.mxu0 (!%p2825_p6), %v3347_v36 }
 0x3cb   : > { %3047 = vmatpush3.bf16.msra.mxu1 %v3980_v34  ;;  %v2104_v34 = vld [vmem:[#allocation2 + $0x8] sm:$0xff] }
 0x3cc   : > { %3252 = vmatprep.subr.bf16.mxu1 (!%p2825_p6), %v3351_v38 }
 0x3cd   : > { %3085 = vmatpush3.bf16.msra.mxu0 (!%p2825_p6), %v3348_v43 }
 0x3ce   : > { %2812 = vmatmul.mubr.msk.bf16.vlgmr.msra.gmra.mrb[72].mxu1 %vm3927_vm9, %v3400_v23  ;;  %3086 = vmatprep.subr.bf16.mxu0 (!%p2825_p6), %v3349_v47  ;;  %v2843_v47 = vld [vmem:[%s4148_s11] ss:$0 sm:$0xff] (!%p2825_p6) }
 0x3cf   : > { %2814 = vmatprep.mubr.msk.bf16.mxu1 %vm3934_vm12, %v3400_v23  ;;  %3253 = vmatpush3.bf16.msra.mxu1 (!%p2825_p6), %v3351_v38 }
 0x3d0   : > { %3254 = vmatprep.subr.bf16.mxu1 (!%p2825_p6), %v3352_v39 }
 0x3d1   : > { %3087 = vmatpush3.bf16.msra.mxu0 (!%p2825_p6), %v3350_v48 }
 0x3d3   : > { %3255 = vmatpush3.bf16.msra.mxu1 (!%p2825_p6), %v3352_v39 }
 0x3d4   : > { %3256 = vmatprep.subr.bf16.mxu1 (!%p2825_p6), %v3353_v44 }
 0x3d6   : > { %2816 = vmatmul.mubr.msk.bf16.gmra.mrb[76].mxu1 %vm3938_vm15, %v3400_v23 }
 0x3d7   : > { %2818 = vmatprep.mubr.msk.bf16.mxu1 %vm3946_vm4, %v3400_v23  ;;  %3257 = vmatpush3.bf16.msra.mxu1 (!%p2825_p6), %v3353_v44 }
 0x3de   : > { %2820 = vmatmul.mubr.msk.bf16.gmra.mrb[80].mxu1 %vm3950_vm5, %v3400_v23 }
 0x3df   : > { %2822 = vmatprep.mubr.msk.bf16.mxu1 %vm3958_vm8, %v3400_v23 }
 0x3e6   : > { %2824 = vmatmul.mubr.msk.bf16.gmra.mrb[84].mxu1 %vm3962_vm13, %v3400_v23 }
 0x4a1   : > { %v3048_v26 = vpop.f32.mrb[72].mxu1 }
 0x4a2   : > { %v3049_v37 = vpop.f32.mrb[73].mxu1 }
 0x4a3   : > { %v3050_v40 = vadd.f32 %v3049_v37, %v3048_v26  ;;  %v3051_v18 = vpop.f32.mrb[74].mxu1 }
 0x4a4   : > { %v3052_v45 = vpop.f32.mrb[75].mxu1 }
 0x4a5   : > { %v2192_v35 = vadd.f32 %v3050_v40, %v2103_v24  ;;  %v3053_v50 = vadd.f32 %v3052_v45, %v3051_v18 }
 0x4a7   : > { %2200 = vst [vmem:[#allocation2] sm:$0xff] %v2192_v35  ;;  %v2193_v46 = vadd.f32 %v3053_v50, %v2104_v34 }
 0x4a9   : > { %2201 = vst [vmem:[#allocation2 + $0x8] sm:$0xff] %v2193_v46  ;;  %v3054_v51 = vpop.f32.mrb[76].mxu1 }
 0x4aa   : > { %v3055_v59 = vpop.f32.mrb[77].mxu1 }
 0x4ab   : > { %v3056_v53 = vadd.f32 %v3055_v59, %v3054_v51  ;;  %v3057_v54 = vpop.f32.mrb[78].mxu1  ;;  %v3357_v51 = vld [vmem:[%s4147_s10 + $0x30] sm:$0xff] (!%p2825_p6)  }
 0x4ac   : > { %v3058_v62 = vpop.f32.mrb[79].mxu1 }
 0x4ad   : > { %v2194_v23 = vadd.f32 %v3056_v53, %v2105_v52  ;;  %v3059_v56 = vadd.f32 %v3058_v62, %v3057_v54  ;;  %v3358_v52 = vld [vmem:[%s4147_s10 + $0x38] sm:$0xff] (!%p2825_p6)   ;;  %v2826_v54 = vld [vmem:[%s4146_s9] ss:$0 sm:$0xff] (!%p2825_p6) }
 0x4ae   : > { %v2212_v19 = vld [vmem:[#allocation2] sm:$0xff] (!%p2825_p6) }
 0x4af   : > { %2202 = vst [vmem:[#allocation2 + $0x10] sm:$0xff] %v2194_v23  ;;  %v2195_v57 = vadd.f32 %v3059_v56, %v2106_v55 }
 0x4b0   : > { %v2213_v49 = vld [vmem:[#allocation2 + $0x8] sm:$0xff] (!%p2825_p6) }
 0x4b1   : > { %2203 = vst [vmem:[#allocation2 + $0x18] sm:$0xff] %v2195_v57  ;;  %v3060_v58 = vpop.f32.mrb[80].mxu1  ;;  %v2220_v26 = vpack.c.bf16 (!%p2825_p6), %v2213_v49, %v2212_v19 }
 0x4b2   : > { %v3061_v61 = vpop.f32.mrb[81].mxu1 }
 0x4b3   : > { %v3062_v1 = vadd.f32 %v3061_v61, %v3060_v58  ;;  %v3063_v2 = vpop.f32.mrb[82].mxu1  ;;  %2392 = vmatmul.mubr.bf16.vlgmr.msra.gmra.mrb[0].mxu0 (!%p2825_p6), %v2220_v26 }
 0x4b4   : > { %v3064_v4 = vpop.f32.mrb[83].mxu1  ;;  %2399 = vmatprep.mubr.bf16.mxu0 (!%p2825_p6), %v3521_v17  ;;  %v3354_v17 = vld [vmem:[%s4147_s10 + $0x18] sm:$0xff] (!%p2825_p6)  }
 0x4b5   : > { %v2196_v5 = vadd.f32 %v3062_v1, %v2107_v60  ;;  %v3065_v8 = vadd.f32 %v3064_v4, %v3063_v2  ;;  %3258 = vmatprep.subr.bf16.mxu1 (!%p2825_p6), %v3354_v17 }
 0x4b6   : > { %v2214_v24 = vld [vmem:[#allocation2 + $0x10] sm:$0xff] (!%p2825_p6)  ;;  %3259 = vmatpush3.bf16.msra.mxu1 (!%p2825_p6), %v3354_v17 }
 0x4b7   : > { %2204 = vst [vmem:[#allocation2 + $0x20] sm:$0xff] %v2196_v5  ;;  %v2197_v9 = vadd.f32 %v3065_v8, %v2108_v3 }
 0x4b8   : > { %v2215_v37 = vld [vmem:[#allocation2 + $0x18] sm:$0xff] (!%p2825_p6) }
 0x4b9   : > { %2205 = vst [vmem:[#allocation2 + $0x28] sm:$0xff] %v2197_v9  ;;  %v3066_v42 = vpop.f32.mrb[84].mxu1  ;;  %v2221_v40 = vpack.c.bf16 (!%p2825_p6), %v2215_v37, %v2214_v24 }
 0x4ba   : > { %v3067_v41 = vpop.f32.mrb[85].mxu1 }
 0x4bb   : > { %v3068_v16 = vadd.f32 %v3067_v41, %v3066_v42  ;;  %v3069_v7 = vpop.f32.mrb[86].mxu1  ;;  %2211 = sbr.rel (%p2825_p6) target bundleno = 1670 (0x686), region = 76  ;;  %2400 = vmatmul.mubr.bf16.gmra.mrb[4].mxu0 (!%p2825_p6), %v2221_v40 }
 0x4bc   : > { %v3070_v14 = vpop.f32.mrb[87].mxu1  ;;  %2407 = vmatprep.mubr.bf16.mxu0 (!%p2825_p6), %v3532_v20  ;;  %v3355_v20 = vld [vmem:[%s4147_s10 + $0x20] sm:$0xff] (!%p2825_p6)  }
 0x4bd   : > { %v2198_v12 = vadd.f32 %v3068_v16, %v2109_v10  ;;  %v3071_v13 = vadd.f32 %v3070_v14, %v3069_v7  ;;  %3260 = vmatprep.subr.bf16.mxu1 (!%p2825_p6), %v3355_v20 }
 0x4be   : > { %v2216_v18 = vld [vmem:[#allocation2 + $0x20] sm:$0xff] (!%p2825_p6)  ;;  %3261 = vmatpush3.bf16.msra.mxu1 (!%p2825_p6), %v3355_v20 }
 0x4bf   : > { %2206 = vst [vmem:[#allocation2 + $0x30] sm:$0xff] %v2198_v12  ;;  %v2199_v22 = vadd.f32 %v3071_v13, %v2110_v11 }
 0x4c0   : > { %v2217_v34 = vld [vmem:[#allocation2 + $0x28] sm:$0xff] (!%p2825_p6) }
 0x4c1   : > { %2207 = vst [vmem:[#allocation2 + $0x38] sm:$0xff] %v2199_v22  ;;  %v2222_v45 = vpack.c.bf16 (!%p2825_p6), %v2217_v34, %v2216_v18 }
 0x4c3   : > { %2408 = vmatmul.mubr.bf16.gmra.mrb[8].mxu0 %v2222_v45 }
 0x4c4   : > { %2415 = vmatprep.mubr.bf16.mxu0 %v3538_v21  ;;  %v3356_v21 = vld [vmem:[%s4147_s10 + $0x28] sm:$0xff]  }
 0x4c5   : > { %3262 = vmatprep.subr.bf16.mxu1 %v3356_v21 }
 0x4c6   : > { %v2218_v35 = vld [vmem:[#allocation2 + $0x30] sm:$0xff]  ;;  %3263 = vmatpush3.bf16.msra.mxu1 %v3356_v21 }
 0x4c7   : > { %3264 = vmatprep.subr.bf16.mxu1 %v3357_v51 }
 0x4c8   : > { %v2219_v50 = vld [vmem:[#allocation2 + $0x38] sm:$0xff] }
 0x4c9   : > { %v2223_v46 = vpack.c.bf16 %v2219_v50, %v2218_v35 }
 0x4ca   : > { %3265 = vmatpush3.bf16.msra.mxu1 %v3357_v51 }
 0x4cb   : > { %2416 = vmatmul.mubr.bf16.gmra.mrb[12].mxu0 %v2223_v46  ;;  %3266 = vmatprep.subr.bf16.mxu1 %v3358_v52 }
 0x4ce   : > { %3267 = vmatpush3.bf16.msra.mxu1 %v3358_v52 }
 0x586   : > { %v3088_v59 = vpop.f32.mrb[0].mxu0 }
 0x587   : > { %v3089_v53 = vpop.f32.mrb[1].mxu0 }
 0x588   : > { %v3090_v55 = vadd.f32 %v3089_v53, %v3088_v59  ;;  %v3091_v62 = vpop.f32.mrb[2].mxu0 }
 0x589   : > { %v3092_v23 = vpop.f32.mrb[3].mxu0 }
 0x58a   : > { %v3093_v56 = vadd.f32 %v3092_v23, %v3091_v62  ;;  %v2394_v57 = vadd.f32 %v3090_v55, %v2826_v54 }
 0x58c   : > { %v2397_v58 = vadd.f32 %v3093_v56, %v2826_v54  ;;  %v2424_v61 = vmax.f32 %v2394_v57, 0.0 }
 0x58e   : > { %v3094_v60 = vpop.f32.mrb[4].mxu0  ;;  %v2425_v1 = vmax.f32 %v2397_v58, 0.0 }
 0x58f   : > { %v3095_v2 = vpop.f32.mrb[5].mxu0 }
 0x590   : > { %v3096_v3 = vadd.f32 %v3095_v2, %v3094_v60  ;;  %v3097_v4 = vpop.f32.mrb[6].mxu0  ;;  %v2432_v5 = vpack.c.bf16 %v2425_v1, %v2424_v61 }
 0x591   : > { %v3098_v8 = vpop.f32.mrb[7].mxu0 }
 0x592   : > { %v2402_v9 = vadd.f32 %v3096_v3, %v2826_v54  ;;  %v3099_v42 = vadd.f32 %v3098_v8, %v3097_v4  ;;  %3268 = vmatprep.mubr.bf16.mxu1 %v2432_v5 }
 0x594   : > { %v2405_v10 = vadd.f32 %v3099_v42, %v2826_v54  ;;  %v2426_v41 = vmax.f32 %v2402_v9, 0.0 }
 0x596   : > { %v2427_v16 = vmax.f32 %v2405_v10, 0.0  ;;  %v3100_v7 = vpop.f32.mrb[8].mxu0 }
 0x597   : > { %v3101_v11 = vpop.f32.mrb[9].mxu0 }
 0x598   : > { %v3102_v14 = vadd.f32 %v3101_v11, %v3100_v7  ;;  %v3103_v12 = vpop.f32.mrb[10].mxu0  ;;  %v2433_v13 = vpack.c.bf16 %v2427_v16, %v2426_v41 }
 0x599   : > { %v3104_v22 = vpop.f32.mrb[11].mxu0 }
 0x59a   : > { %v2410_v27 = vadd.f32 %v3102_v14, %v2826_v54  ;;  %v3105_v6 = vadd.f32 %v3104_v22, %v3103_v12  ;;  %3269 = vmatmul.mubr.bf16.vlgmr.msra.gmra.mrb[0].mxu1 %v2433_v13 }
 0x59c   : > { %v2413_v28 = vadd.f32 %v3105_v6, %v2826_v54  ;;  %v2428_v25 = vmax.f32 %v2410_v27, 0.0 }
 0x59e   : > { %v2429_v0 = vmax.f32 %v2413_v28, 0.0  ;;  %v3106_v15 = vpop.f32.mrb[12].mxu0 }
 0x59f   : > { %v3107_v29 = vpop.f32.mrb[13].mxu0 }
 0x5a0   : > { %v3108_v63 = vadd.f32 %v3107_v29, %v3106_v15  ;;  %v3109_v30 = vpop.f32.mrb[14].mxu0  ;;  %v2434_v31 = vpack.c.bf16 %v2429_v0, %v2428_v25 }
 0x5a1   : > { %v3110_v32 = vpop.f32.mrb[15].mxu0 }
 0x5a2   : > { %v2418_v33 = vadd.f32 %v3108_v63, %v2826_v54  ;;  %v3111_v36 = vadd.f32 %v3110_v32, %v3109_v30  ;;  %3272 = vmatprep.mubr.bf16.mxu1 %v2434_v31 }
 0x5a4   : > { %v2421_v38 = vadd.f32 %v3111_v36, %v2826_v54  ;;  %v2430_v39 = vmax.f32 %v2418_v33, 0.0 }
 0x5a6   : > { %v2431_v43 = vmax.f32 %v2421_v38, 0.0 }
 0x5a8   : > { %v2435_v44 = vpack.c.bf16 %v2431_v43, %v2430_v39 }
 0x5aa   : > { %3273 = vmatmul.mubr.bf16.gmra.mrb[4].mxu1 %v2435_v44 }
 0x66d   : > { %v3270_v48 = vpop.f32.mrb[0].mxu1 }
 0x66e   : > { %v2550_v19 = vadd.f32 %v3270_v48, %v2843_v47  ;;  %v2541_v49 = vpop.f32.mrb[1].mxu1 }
 0x66f   : > { %v2542_v26 = vadd.f32 %v2843_v47, %v2541_v49  ;;  %v3271_v24 = vpop.f32.mrb[2].mxu1 }
 0x670   : > { %v2574_v37 = vmax.f32 %v2550_v19, 0.0  ;;  %v2553_v40 = vadd.f32 %v3271_v24, %v2843_v47  ;;  %v2544_v18 = vpop.f32.mrb[3].mxu1 }
 0x671   : > { %v2572_v34 = vmax.f32 %v2542_v26, 0.0  ;;  %v2545_v45 = vadd.f32 %v2843_v47, %v2544_v18 }
 0x672   : > { %2582 = vst [vmem:[#allocation3 + $0x10] sm:$0xff] %v2574_v37  ;;  %v2575_v35 = vmax.f32 %v2553_v40, 0.0 }
 0x673   : > { %2580 = vst [vmem:[#allocation3] sm:$0xff] %v2572_v34  ;;  %v2573_v50 = vmax.f32 %v2545_v45, 0.0 }
 0x674   : > { %2583 = vst [vmem:[#allocation3 + $0x18] sm:$0xff] %v2575_v35 }
 0x675   : > { %2581 = vst [vmem:[#allocation3 + $0x8] sm:$0xff] %v2573_v50 }
 0x67d   : > { %v3274_v46 = vpop.f32.mrb[4].mxu1 }
 0x67e   : > { %v2566_v17 = vadd.f32 %v3274_v46, %v2843_v47  ;;  %v2557_v20 = vpop.f32.mrb[5].mxu1 }
 0x67f   : > { %v2558_v21 = vadd.f32 %v2843_v47, %v2557_v20  ;;  %v3275_v51 = vpop.f32.mrb[6].mxu1 }
 0x680   : > { %v2578_v52 = vmax.f32 %v2566_v17, 0.0  ;;  %v2569_v59 = vadd.f32 %v3275_v51, %v2843_v47  ;;  %v2560_v53 = vpop.f32.mrb[7].mxu1 }
 0x681   : > { %v2576_v54 = vmax.f32 %v2558_v21, 0.0  ;;  %v2561_v55 = vadd.f32 %v2843_v47, %v2560_v53 }
 0x682   : > { %2586 = vst [vmem:[#allocation3 + $0x30] sm:$0xff] %v2578_v52  ;;  %v2579_v62 = vmax.f32 %v2569_v59, 0.0 }
 0x683   : > { %2584 = vst [vmem:[#allocation3 + $0x20] sm:$0xff] %v2576_v54  ;;  %v2577_v23 = vmax.f32 %v2561_v55, 0.0 }
 0x684   : > { %2587 = vst [vmem:[#allocation3 + $0x38] sm:$0xff] %v2579_v62 }
 0x685   : > { %2585 = vst [vmem:[#allocation3 + $0x28] sm:$0xff] %v2577_v23 }
 0x686 PF: > { %p3288_p7 = scmp.eq.s32.totalorder %s3475_s22, 2  ;;  %s3401_s28 = smov [#allocation3]  }
 0x687   : > { %s2594_s29 = sshll.u32 %s3401_s28, 4  ;;  %s2595_s29 = int_to_ptr.vmem [resolvable:$true] %s2594_s29 }
 0x688   : > { %s3359_s30 = scalar_lea.vmem %s2595_s29, 1024  ;;  %p3366_p11 = scmp.lt.s32.totalorder %s2595_s29, %s2595_s29 }
 0x689   : > { %p3360_p8 = scmp.ne.s32.totalorder %s2595_s29, %s3359_s30  ;;  %p3367_p12 = scmp.lt.s32.totalorder %s3359_s30, %s3359_s30 }
 0x68b   : > { %p3361_p9 = pnand %p3360_p8, %p3288_p7  ;;  %p3368_p13 = por %p3367_p12, %p3366_p11 }
 0x68d   : > { %p3362_p10 = pneg %p3361_p9 }
 0x68f   : > { %p3369_p0 = pnand %p3368_p13, %p3362_p10 }
 0x691   : > { %3372 = shalt.err (!%p3369_p0)
}
 0x692   : > { %s3373_s15 = scalar_lea.hbm %s4149_s12, 1024 }
 0x693   : > { %p3374_p1 = scmp.ne.s32.totalorder %s4149_s12, %s3373_s15  ;;  %p3379_p4 = scmp.lt.u32.totalorder %s3373_s15, %s4149_s12 }
 0x695   : > { %p3375_p2 = pnand %p3374_p1, %p3288_p7 }
 0x697   : > { %p3376_p3 = pneg %p3375_p2 }
 0x699   : > { %p3381_p5 = pnand %p3379_p4, %p3376_p3 }
 0x69b   : > { %3384 = shalt.err (!%p3381_p5)
}
 0x69c   : > { %s3402_s23 = smov 128   ;;  %s3403_s25 = smov 8  }
 0x69d   : > { %3285 = dma.vmem_to_hbm [thread:$0]  (%p3288_p7), %s2595_s29, 1024, %s4149_s12, [#allocation4], %s3402_s23, %s3402_s23, %s3403_s25  }
 0x69e   : > { %3390 = dma.done.wait (%p3288_p7), [#allocation4], 1024  }
 0x69f   : > { %3392 = vsyncadd (%p3288_p7), [#allocation4], 4294966272 }
 0x6a0 PF: > { %s23_s21 = sadd.s32 1, %s3395_s21  }
 0x6a1   : > { %p20_p6 = scmp.ge.s32.totalorder %s23_s21, 5  }
 0x6a3   :  { %22 = sbr.rel (!%p20_p6) target bundleno = 1 (0x1), region = 109 }
 0x6aa   :  { %2610 = vsyncpa [#allocation4], 1 }
 0x6ab   :  { %2612 = vsyncpa [#allocation4 + $0x1], 1 }

</bundles_post_ra>
